<compile_context>
chip_gen: v7x
topology: tpu7x:2x2x1
jax: 0.10.0
libtpu: 0.0.40
codegen_flags: <defaults>
</compile_context>

<pallas_src>
import math

import jax
import jax.numpy as jnp
from jax.experimental import pallas as pl
from jax.experimental.pallas import tpu as pltpu


def geb_kernel(x_ref, v_ref,
               wv_ref,                      # fused [vec1_proj | vec2_proj], (H, H+O)
               wu1a_ref, wu1b_ref, bu1_ref, # update_net[0] split over the concat
               wu2_ref, bu2_ref,            # update_net[2], full (I, 2*O)
               u_ref, vo_ref):
    _, TN, H = v_ref.shape                  # v block: (3, tn, H), component-major
    O = vo_ref.shape[-1]

    # ---- fused vec1_proj / vec2_proj: one (3*tn, H) @ (H, H+O) matmul ----
    v2d = v_ref[...].reshape(3 * TN, H)     # leading-dim merge; tn%8==0 -> layout-free
    vb = jnp.dot(v2d, wv_ref[...], preferred_element_type=jnp.float32)  # (3*tn, H+O)

    # per-node norm over the 3 spatial components: pure lane-aligned VPU math
    b0 = vb[0 * TN:1 * TN, :H]
    b1 = vb[1 * TN:2 * TN, :H]
    b2 = vb[2 * TN:3 * TN, :H]
    vec1 = jnp.sqrt(b0 * b0 + b1 * b1 + b2 * b2)          # (tn, H)

    vec2 = vb[:, H:]                                      # (3*tn, O)

    # ---- update_net( cat([x, vec1], -1) ) ----
    # concat folded into two matmuls: [x, vec1] @ Wu1 = x @ Wu1a + vec1 @ Wu1b
    x = x_ref[...]
    h = (jnp.dot(x, wu1a_ref[...], preferred_element_type=jnp.float32)
         + jnp.dot(vec1, wu1b_ref[...], preferred_element_type=jnp.float32)
         + bu1_ref[...])
    h = h * jax.nn.sigmoid(h)                             # SiLU

    # second linear kept as a single wide matmul; u = [x_out | gate]
    u = jnp.dot(h, wu2_ref[...], preferred_element_type=jnp.float32) + bu2_ref[...]
    gate = u[:, O:]                                       # (tn, O)

    u_ref[...] = u.astype(u_ref.dtype)                    # split into x_out/gate in wrapper
    vo_ref[...] = (vec2.reshape(3, TN, O) * gate[None, :, :]).astype(vo_ref.dtype)


def gated_equivariant_block(x, v, params, *, tn=256):
    """x: (N, H), v: (N, 3, H) -> (x_out (N, O), v_out (N, 3, O))."""
    N, H = x.shape
    O = params["w2"].shape[1]
    I = params["wu1"].shape[1]
    out_dtype = x.dtype

    # node tile: multiple of 8 (prefer multiple of 128); pad N to a tile multiple
    tn = max(8, ((min(tn, N) + 7) // 8) * 8)
    Np = pl.cdiv(N, tn) * tn
    if Np != N:
        x = jnp.pad(x, ((0, Np - N), (0, 0)))
        v = jnp.pad(v, ((0, Np - N), (0, 0), (0, 0)))

    # component-major vectors: (3, Np, H) -- wrapper-side layout plumbing
    v_cm = jnp.transpose(v, (1, 0, 2))

    # fuse vec1_proj / vec2_proj weights; split update_net[0] over the concat
    wv = jnp.concatenate([params["w1"], params["w2"]], axis=1)   # (H, H+O)
    wu1a = params["wu1"][:H, :]
    wu1b = params["wu1"][H:, :]

    grid = (Np // tn,)
    const2 = lambda i: (0, 0)
    # weights / biases never change across the grid -> single buffer (saves VMEM
    # at large H/I; matters most on v7x's 64 MiB VMEM)
    wspec = lambda shape: pl.BlockSpec(shape, const2, pipeline_mode=pl.Buffered(1))

    in_specs = [
        pl.BlockSpec((tn, H), lambda i: (i, 0)),           # x tile
        pl.BlockSpec((3, tn, H), lambda i: (0, i, 0)),     # v tile (component-major)
        wspec((H, H + O)),                                 # fused vec proj weight
        wspec((H, I)),                                     # wu1a
        wspec((H, I)),                                     # wu1b
        wspec((1, I)),                                     # bu1
        wspec((I, 2 * O)),                                 # wu2
        wspec((1, 2 * O)),                                 # bu2
    ]
    out_specs = [
        pl.BlockSpec((tn, 2 * O), lambda i: (i, 0)),       # u = [x_out | gate]
        pl.BlockSpec((3, tn, O), lambda i: (0, i, 0)),     # v_out (component-major)
    ]
    out_shape = [
        jax.ShapeDtypeStruct((Np, 2 * O), out_dtype),
        jax.ShapeDtypeStruct((3, Np, O), out_dtype),
    ]

    u, vo = pl.pallas_call(
        geb_kernel,
        grid_spec=pltpu.PrefetchScalarGridSpec(
            num_scalar_prefetch=0,
            grid=grid,
            in_specs=in_specs,
            out_specs=out_specs,
        ),
        out_shape=out_shape,
        compiler_params=pltpu.CompilerParams(
            dimension_semantics=("parallel",)),
    )(x, v_cm, wv, wu1a, wu1b, params["bu1"], params["wu2"], params["bu2"])

    x_out = u[:N, :O]
    v_out = jnp.transpose(vo, (1, 0, 2))[:N]               # back to (N, 3, O)
    return x_out, v_out


def init_params(key, hidden_channels, out_channels, intermediate_channels=None):
    """Xavier-uniform weights (as in reset_parameters); small random biases to
    exercise the bias path."""
    if intermediate_channels is None:
        intermediate_channels = hidden_channels
    H, O, I = hidden_channels, out_channels, intermediate_channels

    def xavier(key, fan_in, fan_out):
        bound = math.sqrt(6.0 / (fan_in + fan_out))
        # stored as (in, out) so kernel does  y = x @ W
        return jax.random.uniform(key, (fan_in, fan_out), jnp.float32, -bound, bound)

    k1, k2, k3, k4, k5, k6 = jax.random.split(key, 6)
    return {
        "w1": xavier(k1, H, H),                            # vec1_proj (no bias)
        "w2": xavier(k2, H, O),                            # vec2_proj (no bias)
        "wu1": xavier(k3, 2 * H, I),                       # update_net[0]
        "bu1": 0.1 * jax.random.normal(k5, (1, I), jnp.float32),
        "wu2": xavier(k4, I, 2 * O),                       # update_net[2]
        "bu2": 0.1 * jax.random.normal(k6, (1, 2 * O), jnp.float32),
    }


def reference_forward(x, v, params):
    """Pure-JAX reference mirroring the PyTorch forward."""
    vec1_buffer = v @ params["w1"]
    vec1 = jnp.sqrt(jnp.sum(vec1_buffer ** 2, axis=-2))    # norm over dim=-2
    vec2 = v @ params["w2"]
    h = jnp.concatenate([x, vec1], axis=-1) @ params["wu1"] + params["bu1"][0]
    h = h * jax.nn.sigmoid(h)                              # SiLU
    u = h @ params["wu2"] + params["bu2"][0]
    O = params["w2"].shape[1]
    x_out, gate = u[:, :O], u[:, O:]
    v_out = gate[:, None, :] * vec2
    return x_out, v_out


if __name__ == "__main__":
    N = 500             # number of nodes/atoms (not a tile multiple -> exercises padding)
    HIDDEN = 32
    OUT = 16

    key = jax.random.PRNGKey(0)
    kx, kv, kp = jax.random.split(key, 3)
    x = jax.random.normal(kx, (N, HIDDEN), jnp.float32)
    v = jax.random.normal(kv, (N, 3, HIDDEN), jnp.float32)
    params = init_params(kp, HIDDEN, OUT)

    x_out, v_out = gated_equivariant_block(x, v, params, tn=256)
    jax.block_until_ready((x_out, v_out))

    x_ref, v_ref = reference_forward(x, v, params)
    assert x_out.shape == (N, OUT) and v_out.shape == (N, 3, OUT)
    assert jnp.allclose(x_out, x_ref, atol=1e-4, rtol=1e-4)
    assert jnp.allclose(v_out, v_ref, atol=1e-4, rtol=1e-4)
    print("KERNEL_OK")
</pallas_src>

<mosaic_0001>
module attributes {stable_mosaic.version = 11 : i64} {
  func.func @geb_kernel(%arg0: i32, %arg1: memref<256x32xf32, #tpu.memory_space<vmem>>, %arg2: memref<3x256x32xf32, #tpu.memory_space<vmem>>, %arg3: memref<32x48xf32, #tpu.memory_space<vmem>>, %arg4: memref<32x32xf32, #tpu.memory_space<vmem>>, %arg5: memref<32x32xf32, #tpu.memory_space<vmem>>, %arg6: memref<1x32xf32, #tpu.memory_space<vmem>>, %arg7: memref<32x32xf32, #tpu.memory_space<vmem>>, %arg8: memref<1x32xf32, #tpu.memory_space<vmem>>, %arg9: memref<256x32xf32, #tpu.memory_space<vmem>>, %arg10: memref<3x256x16xf32, #tpu.memory_space<vmem>>) attributes {dimension_semantics = [#tpu.dimension_semantics<parallel>], iteration_bounds = array<i64: 2>, scalar_prefetch = 0 : i64, scratch_operands = 0 : i64, tpu.core_type = #tpu.core_type<tc>, window_params = [{transform_indices = @transform_0, window_bounds = array<i64: 256, 32>}, {transform_indices = @transform_1, window_bounds = array<i64: 3, 256, 32>}, {pipeline_mode = #tpu.pipeline_mode<synchronous>, transform_indices = @transform_2, window_bounds = array<i64: 32, 48>}, {pipeline_mode = #tpu.pipeline_mode<synchronous>, transform_indices = @transform_3, window_bounds = array<i64: 32, 32>}, {pipeline_mode = #tpu.pipeline_mode<synchronous>, transform_indices = @transform_4, window_bounds = array<i64: 32, 32>}, {pipeline_mode = #tpu.pipeline_mode<synchronous>, transform_indices = @transform_5, window_bounds = array<i64: 1, 32>}, {pipeline_mode = #tpu.pipeline_mode<synchronous>, transform_indices = @transform_6, window_bounds = array<i64: 32, 32>}, {pipeline_mode = #tpu.pipeline_mode<synchronous>, transform_indices = @transform_7, window_bounds = array<i64: 1, 32>}, {transform_indices = @transform_8, window_bounds = array<i64: 256, 32>}, {transform_indices = @transform_9, window_bounds = array<i64: 3, 256, 16>}]} {
    %c0 = arith.constant 0 : index
    %c0_0 = arith.constant 0 : index
    %c0_1 = arith.constant 0 : index
    %0 = vector.load %arg2[%c0, %c0_0, %c0_1] : memref<3x256x32xf32, #tpu.memory_space<vmem>>, vector<3x256x32xf32>
    %1 = vector.shape_cast %0 : vector<3x256x32xf32> to vector<768x32xf32>
    %c0_2 = arith.constant 0 : index
    %c0_3 = arith.constant 0 : index
    %2 = vector.load %arg3[%c0_2, %c0_3] : memref<32x48xf32, #tpu.memory_space<vmem>>, vector<32x48xf32>
    %cst = arith.constant dense<0.000000e+00> : vector<768x48xf32>
    %3 = tpu.matmul %1, %2, %cst {dimension_numbers = #tpu.dot_dimension_numbers<[1], [0], [0], [1], [0, 0, 1, 1], [], []>} : vector<768x32xf32>, vector<32x48xf32>, vector<768x48xf32> -> vector<768x48xf32>
    %4 = vector.extract_strided_slice %3 {offsets = [0, 0], sizes = [256, 32], strides = [1, 1]} : vector<768x48xf32> to vector<256x32xf32>
    %5 = vector.extract_strided_slice %3 {offsets = [256, 0], sizes = [256, 32], strides = [1, 1]} : vector<768x48xf32> to vector<256x32xf32>
    %6 = vector.extract_strided_slice %3 {offsets = [512, 0], sizes = [256, 32], strides = [1, 1]} : vector<768x48xf32> to vector<256x32xf32>
    %7 = arith.mulf %4, %4 : vector<256x32xf32>
    %8 = arith.mulf %5, %5 : vector<256x32xf32>
    %9 = arith.addf %7, %8 : vector<256x32xf32>
    %10 = arith.mulf %6, %6 : vector<256x32xf32>
    %11 = arith.addf %9, %10 : vector<256x32xf32>
    %12 = math.sqrt %11 : vector<256x32xf32>
    %13 = vector.extract_strided_slice %3 {offsets = [0, 32], sizes = [768, 16], strides = [1, 1]} : vector<768x48xf32> to vector<768x16xf32>
    %c0_4 = arith.constant 0 : index
    %c0_5 = arith.constant 0 : index
    %14 = vector.load %arg1[%c0_4, %c0_5] : memref<256x32xf32, #tpu.memory_space<vmem>>, vector<256x32xf32>
    %c0_6 = arith.constant 0 : index
    %c0_7 = arith.constant 0 : index
    %15 = vector.load %arg4[%c0_6, %c0_7] : memref<32x32xf32, #tpu.memory_space<vmem>>, vector<32x32xf32>
    %cst_8 = arith.constant dense<0.000000e+00> : vector<256x32xf32>
    %16 = tpu.matmul %14, %15, %cst_8 {dimension_numbers = #tpu.dot_dimension_numbers<[1], [0], [0], [1], [0, 0, 1, 1], [], []>} : vector<256x32xf32>, vector<32x32xf32>, vector<256x32xf32> -> vector<256x32xf32>
    %c0_9 = arith.constant 0 : index
    %c0_10 = arith.constant 0 : index
    %17 = vector.load %arg5[%c0_9, %c0_10] : memref<32x32xf32, #tpu.memory_space<vmem>>, vector<32x32xf32>
    %cst_11 = arith.constant dense<0.000000e+00> : vector<256x32xf32>
    %18 = tpu.matmul %12, %17, %cst_11 {dimension_numbers = #tpu.dot_dimension_numbers<[1], [0], [0], [1], [0, 0, 1, 1], [], []>} : vector<256x32xf32>, vector<32x32xf32>, vector<256x32xf32> -> vector<256x32xf32>
    %19 = arith.addf %16, %18 : vector<256x32xf32>
    %c0_12 = arith.constant 0 : index
    %c0_13 = arith.constant 0 : index
    %20 = vector.load %arg6[%c0_12, %c0_13] : memref<1x32xf32, #tpu.memory_space<vmem>>, vector<1x32xf32>
    %21 = vector.broadcast %20 : vector<1x32xf32> to vector<256x32xf32>
    %22 = arith.addf %19, %21 : vector<256x32xf32>
    %23 = arith.negf %22 : vector<256x32xf32>
    %24 = math.exp %23 : vector<256x32xf32>
    %cst_14 = arith.constant 1.000000e+00 : f32
    %25 = vector.broadcast %cst_14 : f32 to vector<256x32xf32>
    %26 = arith.addf %25, %24 : vector<256x32xf32>
    %27 = arith.divf %25, %26 : vector<256x32xf32>
    %28 = arith.mulf %22, %27 : vector<256x32xf32>
    %c0_15 = arith.constant 0 : index
    %c0_16 = arith.constant 0 : index
    %29 = vector.load %arg7[%c0_15, %c0_16] : memref<32x32xf32, #tpu.memory_space<vmem>>, vector<32x32xf32>
    %cst_17 = arith.constant dense<0.000000e+00> : vector<256x32xf32>
    %30 = tpu.matmul %28, %29, %cst_17 {dimension_numbers = #tpu.dot_dimension_numbers<[1], [0], [0], [1], [0, 0, 1, 1], [], []>} : vector<256x32xf32>, vector<32x32xf32>, vector<256x32xf32> -> vector<256x32xf32>
    %c0_18 = arith.constant 0 : index
    %c0_19 = arith.constant 0 : index
    %31 = vector.load %arg8[%c0_18, %c0_19] : memref<1x32xf32, #tpu.memory_space<vmem>>, vector<1x32xf32>
    %32 = vector.broadcast %31 : vector<1x32xf32> to vector<256x32xf32>
    %33 = arith.addf %30, %32 : vector<256x32xf32>
    %34 = vector.extract_strided_slice %33 {offsets = [0, 16], sizes = [256, 16], strides = [1, 1]} : vector<256x32xf32> to vector<256x16xf32>
    %c0_20 = arith.constant 0 : index
    %c0_21 = arith.constant 0 : index
    %35 = vector.load %arg9[%c0_20, %c0_21] : memref<256x32xf32, #tpu.memory_space<vmem>>, vector<256x32xf32>
    tpu.vector_store %arg9[%c0_20, %c0_21], %33 {strides = array<i32>} : memref<256x32xf32, #tpu.memory_space<vmem>>, vector<256x32xf32>,
    %36 = vector.shape_cast %13 : vector<768x16xf32> to vector<3x256x16xf32>
    %37 = vector.shape_cast %34 : vector<256x16xf32> to vector<1x256x16xf32>
    %38 = vector.broadcast %37 : vector<1x256x16xf32> to vector<3x256x16xf32>
    %39 = arith.mulf %36, %38 : vector<3x256x16xf32>
    %c0_22 = arith.constant 0 : index
    %c0_23 = arith.constant 0 : index
    %c0_24 = arith.constant 0 : index
    %40 = vector.load %arg10[%c0_22, %c0_23, %c0_24] : memref<3x256x16xf32, #tpu.memory_space<vmem>>, vector<3x256x16xf32>
    tpu.vector_store %arg10[%c0_22, %c0_23, %c0_24], %39 {strides = array<i32>} : memref<3x256x16xf32, #tpu.memory_space<vmem>>, vector<3x256x16xf32>,
    return
  }
  func.func @transform_0(%arg0: i32) -> (i32, i32) {
    %c0_i32 = arith.constant 0 : i32
    %c0_i32_0 = arith.constant 0 : i32
    return %arg0, %c0_i32 : i32, i32
  }
  func.func @transform_1(%arg0: i32) -> (i32, i32, i32) {
    %c0_i32 = arith.constant 0 : i32
    %c0_i32_0 = arith.constant 0 : i32
    %c0_i32_1 = arith.constant 0 : i32
    return %c0_i32, %arg0, %c0_i32_0 : i32, i32, i32
  }
  func.func @transform_2(%arg0: i32) -> (i32, i32) {
    %c0_i32 = arith.constant 0 : i32
    %c0_i32_0 = arith.constant 0 : i32
    %c0_i32_1 = arith.constant 0 : i32
    return %c0_i32, %c0_i32_0 : i32, i32
  }
  func.func @transform_3(%arg0: i32) -> (i32, i32) {
    %c0_i32 = arith.constant 0 : i32
    %c0_i32_0 = arith.constant 0 : i32
    %c0_i32_1 = arith.constant 0 : i32
    return %c0_i32, %c0_i32_0 : i32, i32
  }
  func.func @transform_4(%arg0: i32) -> (i32, i32) {
    %c0_i32 = arith.constant 0 : i32
    %c0_i32_0 = arith.constant 0 : i32
    %c0_i32_1 = arith.constant 0 : i32
    return %c0_i32, %c0_i32_0 : i32, i32
  }
  func.func @transform_5(%arg0: i32) -> (i32, i32) {
    %c0_i32 = arith.constant 0 : i32
    %c0_i32_0 = arith.constant 0 : i32
    %c0_i32_1 = arith.constant 0 : i32
    return %c0_i32, %c0_i32_0 : i32, i32
  }
  func.func @transform_6(%arg0: i32) -> (i32, i32) {
    %c0_i32 = arith.constant 0 : i32
    %c0_i32_0 = arith.constant 0 : i32
    %c0_i32_1 = arith.constant 0 : i32
    return %c0_i32, %c0_i32_0 : i32, i32
  }
  func.func @transform_7(%arg0: i32) -> (i32, i32) {
    %c0_i32 = arith.constant 0 : i32
    %c0_i32_0 = arith.constant 0 : i32
    %c0_i32_1 = arith.constant 0 : i32
    return %c0_i32, %c0_i32_0 : i32, i32
  }
  func.func @transform_8(%arg0: i32) -> (i32, i32) {
    %c0_i32 = arith.constant 0 : i32
    %c0_i32_0 = arith.constant 0 : i32
    return %arg0, %c0_i32 : i32, i32
  }
  func.func @transform_9(%arg0: i32) -> (i32, i32, i32) {
    %c0_i32 = arith.constant 0 : i32
    %c0_i32_0 = arith.constant 0 : i32
    %c0_i32_1 = arith.constant 0 : i32
    return %c0_i32, %arg0, %c0_i32_0 : i32, i32, i32
  }
}

</mosaic_0001>

<bundles_post_ra>
// kernel: tpu_custom_call.1
= control target key start
LH: loop header
LB: loop body
LE: loop exit
PB: predicated region body
PF: predicated region fallthrough
CT: control target
= control target key end

     0   :  { %s5767_s30 = smov 0   ;;  %s5769_s10 = smov 0   ;;  %s8212_s0 = inlined_call_operand.vmem [shape: f32[512,32], index: 0, kind: input, shape index: {}]   ;;  %s8213_s1 = inlined_call_operand.vmem [shape: f32[3,512,32], index: 1, kind: input, shape index: {}]   ;;  %s8214_s2 = inlined_call_operand.vmem [shape: f32[32,48], index: 2, kind: input, shape index: {}]   ;;  %s8215_s3 = inlined_call_operand.vmem [shape: f32[32,32], index: 3, kind: input, shape index: {}]   ;;  %s8216_s4 = inlined_call_operand.vmem [shape: f32[32,32], index: 4, kind: input, shape index: {}]   ;;  %s8217_s5 = inlined_call_operand.vmem [shape: f32[1,32], index: 5, kind: input, shape index: {}]   ;;  %s8218_s6 = inlined_call_operand.vmem [shape: f32[32,32], index: 6, kind: input, shape index: {}]   ;;  %s8219_s7 = inlined_call_operand.vmem [shape: f32[1,32], index: 7, kind: input, shape index: {}]   ;;  %s8220_s8 = inlined_call_operand.vmem [shape: f32[512,32], index: 8, kind: output, shape index: {0}]   ;;  %s8221_s9 = inlined_call_operand.vmem [shape: f32[3,512,16], index: 9, kind: output, shape index: {1}]  }
   0x1   :  { %s5771_s11 = smov 0  }
   0x2 LB: > { %s5783_s12 = sadd.s32 4294967295, %s5713_s11   ;;  %s5786_s13 = sadd.s32 1, %s5713_s11   ;;  %s5713_s11 = sphi %s5771_s11, %s8424_s11   ;;  %s5709_s10 = sphi %s5769_s10, %s8423_s10   ;;  %s5705_s30 = sphi %s5767_s30, %s8422_s30  }
   0x3   : > { %s50_s14 = ssub.s32 %s5713_s11, %s5786_s13  ;;  %s53_s15 = sadd.s32 1, %s5709_s10 }
   0x4   : > { %p51_p0 = scmp.eq.s32.totalorder %s50_s14, 0  ;;  %p60_p1 = scmp.ne.s32.totalorder %s5709_s10, %s5705_s30 }
   0x5   : > { %p61_p2 = scmp.eq.s32.totalorder %s5713_s11, 0  ;;  %p242_p3 = scmp.eq.s32.totalorder %s5783_s12, 1 }
   0x6   : > { %s5796_s16 = scalar_select %p51_p0, %s5709_s10, %s53_s15  }
   0x7   : > { %p62_p4 = por %p61_p2, %p60_p1  ;;  %p5798_p5 = por %p242_p3, %p60_p1 }
   0x8   : > { %p4639_p6 = scmp.ge.s32.totalorder %s5713_s11, 2 }
   0xa   : > { %282 = sbr.rel (%p4639_p6) target bundleno = 70 (0x46), region = 40 }
  0x11   : > { %294 = sbr.rel (!%p62_p4) target bundleno = 70 (0x46), region = 48  ;;  %s296_s18 = sand.u32 (%p62_p4), 1, %s5709_s10  }
  0x12   : > { %s4877_s19 = sshll.u32 (%p62_p4), %s5713_s11, 8  ;;  %s5471_s20 = smul.u32 (%p62_p4), 768, %s296_s18 }
  0x13   : > { %s5808_s23 = scalar_lea.vmem (%p62_p4), %s8213_s1, %s4877_s19 }
  0x14   : > { %v519_v0 = vld [vmem:[%s5808_s23] sm:$0xff] (%p62_p4)  ;;  %v521_v1 = vld [vmem:[%s5808_s23 + $0x8] sm:$0xff] (%p62_p4)  ;;  %v523_v2 = vld [vmem:[%s5808_s23 + $0x10] sm:$0xff] (%p62_p4)  ;;  %s5816_s24 = scalar_lea.vmem (%p62_p4), [#allocation2], %s5471_s20 }
  0x15   : > { %v525_v3 = vld [vmem:[%s5808_s23 + $0x18] sm:$0xff] (%p62_p4)  ;;  %v527_v4 = vld [vmem:[%s5808_s23 + $0x20] sm:$0xff] (%p62_p4)  ;;  %v529_v5 = vld [vmem:[%s5808_s23 + $0x28] sm:$0xff] (%p62_p4)  ;;  %520 = vst [vmem:[%s5816_s24] sm:$0xff] (%p62_p4), %v519_v0 }
  0x16   : > { %522 = vst [vmem:[%s5816_s24 + $0x8] sm:$0xff] (%p62_p4), %v521_v1  ;;  %524 = vst [vmem:[%s5816_s24 + $0x10] sm:$0xff] (%p62_p4), %v523_v2  ;;  %v531_v6 = vld [vmem:[%s5808_s23 + $0x30] sm:$0xff] (%p62_p4)  ;;  %v533_v7 = vld [vmem:[%s5808_s23 + $0x38] sm:$0xff] (%p62_p4) }
  0x17   : > { %526 = vst [vmem:[%s5816_s24 + $0x18] sm:$0xff] (%p62_p4), %v525_v3  ;;  %528 = vst [vmem:[%s5816_s24 + $0x20] sm:$0xff] (%p62_p4), %v527_v4  ;;  %v535_v8 = vld [vmem:[%s5808_s23 + $0x40] sm:$0xff] (%p62_p4)  ;;  %v537_v9 = vld [vmem:[%s5808_s23 + $0x48] sm:$0xff] (%p62_p4) }
  0x18   : > { %530 = vst [vmem:[%s5816_s24 + $0x28] sm:$0xff] %v529_v5  ;;  %532 = vst [vmem:[%s5816_s24 + $0x30] sm:$0xff] %v531_v6  ;;  %v539_v10 = vld [vmem:[%s5808_s23 + $0x50] sm:$0xff]  ;;  %v541_v11 = vld [vmem:[%s5808_s23 + $0x58] sm:$0xff] }
  0x19   : > { %534 = vst [vmem:[%s5816_s24 + $0x38] sm:$0xff] %v533_v7  ;;  %536 = vst [vmem:[%s5816_s24 + $0x40] sm:$0xff] %v535_v8  ;;  %v543_v12 = vld [vmem:[%s5808_s23 + $0x60] sm:$0xff]  ;;  %v545_v13 = vld [vmem:[%s5808_s23 + $0x68] sm:$0xff] }
  0x1a   : > { %538 = vst [vmem:[%s5816_s24 + $0x48] sm:$0xff] %v537_v9  ;;  %540 = vst [vmem:[%s5816_s24 + $0x50] sm:$0xff] %v539_v10  ;;  %v547_v14 = vld [vmem:[%s5808_s23 + $0x70] sm:$0xff]  ;;  %v549_v15 = vld [vmem:[%s5808_s23 + $0x78] sm:$0xff] }
  0x1b   : > { %542 = vst [vmem:[%s5816_s24 + $0x58] sm:$0xff] %v541_v11  ;;  %544 = vst [vmem:[%s5816_s24 + $0x60] sm:$0xff] %v543_v12  ;;  %v551_v16 = vld [vmem:[%s5808_s23 + $0x80] sm:$0xff]  ;;  %v553_v17 = vld [vmem:[%s5808_s23 + $0x88] sm:$0xff] }
  0x1c   : > { %546 = vst [vmem:[%s5816_s24 + $0x68] sm:$0xff] %v545_v13  ;;  %548 = vst [vmem:[%s5816_s24 + $0x70] sm:$0xff] %v547_v14  ;;  %v555_v18 = vld [vmem:[%s5808_s23 + $0x90] sm:$0xff]  ;;  %v557_v19 = vld [vmem:[%s5808_s23 + $0x98] sm:$0xff] }
  0x1d   : > { %550 = vst [vmem:[%s5816_s24 + $0x78] sm:$0xff] %v549_v15  ;;  %552 = vst [vmem:[%s5816_s24 + $0x80] sm:$0xff] %v551_v16  ;;  %v559_v20 = vld [vmem:[%s5808_s23 + $0xa0] sm:$0xff]  ;;  %v561_v21 = vld [vmem:[%s5808_s23 + $0xa8] sm:$0xff] }
  0x1e   : > { %554 = vst [vmem:[%s5816_s24 + $0x88] sm:$0xff] %v553_v17  ;;  %556 = vst [vmem:[%s5816_s24 + $0x90] sm:$0xff] %v555_v18  ;;  %v563_v22 = vld [vmem:[%s5808_s23 + $0xb0] sm:$0xff]  ;;  %v565_v23 = vld [vmem:[%s5808_s23 + $0xb8] sm:$0xff] }
  0x1f   : > { %558 = vst [vmem:[%s5816_s24 + $0x98] sm:$0xff] %v557_v19  ;;  %560 = vst [vmem:[%s5816_s24 + $0xa0] sm:$0xff] %v559_v20  ;;  %v567_v24 = vld [vmem:[%s5808_s23 + $0xc0] sm:$0xff]  ;;  %v569_v25 = vld [vmem:[%s5808_s23 + $0xc8] sm:$0xff] }
  0x20   : > { %562 = vst [vmem:[%s5816_s24 + $0xa8] sm:$0xff] %v561_v21  ;;  %564 = vst [vmem:[%s5816_s24 + $0xb0] sm:$0xff] %v563_v22  ;;  %v571_v26 = vld [vmem:[%s5808_s23 + $0xd0] sm:$0xff]  ;;  %v573_v27 = vld [vmem:[%s5808_s23 + $0xd8] sm:$0xff] }
  0x21   : > { %566 = vst [vmem:[%s5816_s24 + $0xb8] sm:$0xff] %v565_v23  ;;  %568 = vst [vmem:[%s5816_s24 + $0xc0] sm:$0xff] %v567_v24  ;;  %v575_v28 = vld [vmem:[%s5808_s23 + $0xe0] sm:$0xff]  ;;  %v577_v29 = vld [vmem:[%s5808_s23 + $0xe8] sm:$0xff] }
  0x22   : > { %570 = vst [vmem:[%s5816_s24 + $0xc8] sm:$0xff] %v569_v25  ;;  %572 = vst [vmem:[%s5816_s24 + $0xd0] sm:$0xff] %v571_v26  ;;  %v579_v30 = vld [vmem:[%s5808_s23 + $0xf0] sm:$0xff]  ;;  %v581_v31 = vld [vmem:[%s5808_s23 + $0xf8] sm:$0xff] }
  0x23   : > { %574 = vst [vmem:[%s5816_s24 + $0xd8] sm:$0xff] %v573_v27  ;;  %576 = vst [vmem:[%s5816_s24 + $0xe0] sm:$0xff] %v575_v28  ;;  %v583_v32 = vld [vmem:[%s5808_s23 + $0x200] sm:$0xff]  ;;  %v585_v33 = vld [vmem:[%s5808_s23 + $0x208] sm:$0xff] }
  0x24   : > { %578 = vst [vmem:[%s5816_s24 + $0xe8] sm:$0xff] %v577_v29  ;;  %580 = vst [vmem:[%s5816_s24 + $0xf0] sm:$0xff] %v579_v30  ;;  %v587_v34 = vld [vmem:[%s5808_s23 + $0x210] sm:$0xff]  ;;  %v589_v35 = vld [vmem:[%s5808_s23 + $0x218] sm:$0xff] }
  0x25   : > { %582 = vst [vmem:[%s5816_s24 + $0xf8] sm:$0xff] %v581_v31  ;;  %584 = vst [vmem:[%s5816_s24 + $0x100] sm:$0xff] %v583_v32  ;;  %v591_v36 = vld [vmem:[%s5808_s23 + $0x220] sm:$0xff]  ;;  %v593_v37 = vld [vmem:[%s5808_s23 + $0x228] sm:$0xff] }
  0x26   : > { %586 = vst [vmem:[%s5816_s24 + $0x108] sm:$0xff] %v585_v33  ;;  %588 = vst [vmem:[%s5816_s24 + $0x110] sm:$0xff] %v587_v34  ;;  %v595_v38 = vld [vmem:[%s5808_s23 + $0x230] sm:$0xff]  ;;  %v597_v39 = vld [vmem:[%s5808_s23 + $0x238] sm:$0xff] }
  0x27   : > { %590 = vst [vmem:[%s5816_s24 + $0x118] sm:$0xff] %v589_v35  ;;  %592 = vst [vmem:[%s5816_s24 + $0x120] sm:$0xff] %v591_v36  ;;  %v599_v40 = vld [vmem:[%s5808_s23 + $0x240] sm:$0xff]  ;;  %v601_v41 = vld [vmem:[%s5808_s23 + $0x248] sm:$0xff] }
  0x28   : > { %594 = vst [vmem:[%s5816_s24 + $0x128] sm:$0xff] %v593_v37  ;;  %596 = vst [vmem:[%s5816_s24 + $0x130] sm:$0xff] %v595_v38  ;;  %v603_v42 = vld [vmem:[%s5808_s23 + $0x250] sm:$0xff]  ;;  %v605_v43 = vld [vmem:[%s5808_s23 + $0x258] sm:$0xff] }
  0x29   : > { %598 = vst [vmem:[%s5816_s24 + $0x138] sm:$0xff] %v597_v39  ;;  %600 = vst [vmem:[%s5816_s24 + $0x140] sm:$0xff] %v599_v40  ;;  %v607_v44 = vld [vmem:[%s5808_s23 + $0x260] sm:$0xff]  ;;  %v609_v45 = vld [vmem:[%s5808_s23 + $0x268] sm:$0xff] }
  0x2a   : > { %602 = vst [vmem:[%s5816_s24 + $0x148] sm:$0xff] %v601_v41  ;;  %604 = vst [vmem:[%s5816_s24 + $0x150] sm:$0xff] %v603_v42  ;;  %v611_v46 = vld [vmem:[%s5808_s23 + $0x270] sm:$0xff]  ;;  %v613_v47 = vld [vmem:[%s5808_s23 + $0x278] sm:$0xff] }
  0x2b   : > { %606 = vst [vmem:[%s5816_s24 + $0x158] sm:$0xff] %v605_v43  ;;  %608 = vst [vmem:[%s5816_s24 + $0x160] sm:$0xff] %v607_v44  ;;  %v615_v48 = vld [vmem:[%s5808_s23 + $0x280] sm:$0xff]  ;;  %v617_v49 = vld [vmem:[%s5808_s23 + $0x288] sm:$0xff] }
  0x2c   : > { %610 = vst [vmem:[%s5816_s24 + $0x168] sm:$0xff] %v609_v45  ;;  %612 = vst [vmem:[%s5816_s24 + $0x170] sm:$0xff] %v611_v46  ;;  %v619_v50 = vld [vmem:[%s5808_s23 + $0x290] sm:$0xff]  ;;  %v621_v51 = vld [vmem:[%s5808_s23 + $0x298] sm:$0xff] }
  0x2d   : > { %614 = vst [vmem:[%s5816_s24 + $0x178] sm:$0xff] %v613_v47  ;;  %616 = vst [vmem:[%s5816_s24 + $0x180] sm:$0xff] %v615_v48  ;;  %v623_v52 = vld [vmem:[%s5808_s23 + $0x2a0] sm:$0xff]  ;;  %v625_v53 = vld [vmem:[%s5808_s23 + $0x2a8] sm:$0xff] }
  0x2e   : > { %618 = vst [vmem:[%s5816_s24 + $0x188] sm:$0xff] %v617_v49  ;;  %620 = vst [vmem:[%s5816_s24 + $0x190] sm:$0xff] %v619_v50  ;;  %v627_v54 = vld [vmem:[%s5808_s23 + $0x2b0] sm:$0xff]  ;;  %v629_v55 = vld [vmem:[%s5808_s23 + $0x2b8] sm:$0xff] }
  0x2f   : > { %622 = vst [vmem:[%s5816_s24 + $0x198] sm:$0xff] %v621_v51  ;;  %624 = vst [vmem:[%s5816_s24 + $0x1a0] sm:$0xff] %v623_v52  ;;  %v631_v56 = vld [vmem:[%s5808_s23 + $0x2c0] sm:$0xff]  ;;  %v633_v57 = vld [vmem:[%s5808_s23 + $0x2c8] sm:$0xff] }
  0x30   : > { %626 = vst [vmem:[%s5816_s24 + $0x1a8] sm:$0xff] %v625_v53  ;;  %628 = vst [vmem:[%s5816_s24 + $0x1b0] sm:$0xff] %v627_v54  ;;  %v635_v58 = vld [vmem:[%s5808_s23 + $0x2d0] sm:$0xff]  ;;  %v637_v59 = vld [vmem:[%s5808_s23 + $0x2d8] sm:$0xff] }
  0x31   : > { %630 = vst [vmem:[%s5816_s24 + $0x1b8] sm:$0xff] %v629_v55  ;;  %632 = vst [vmem:[%s5816_s24 + $0x1c0] sm:$0xff] %v631_v56  ;;  %v639_v60 = vld [vmem:[%s5808_s23 + $0x2e0] sm:$0xff]  ;;  %v641_v61 = vld [vmem:[%s5808_s23 + $0x2e8] sm:$0xff] }
  0x32   : > { %634 = vst [vmem:[%s5816_s24 + $0x1c8] sm:$0xff] %v633_v57  ;;  %636 = vst [vmem:[%s5816_s24 + $0x1d0] sm:$0xff] %v635_v58  ;;  %v643_v62 = vld [vmem:[%s5808_s23 + $0x2f0] sm:$0xff]  ;;  %v645_v63 = vld [vmem:[%s5808_s23 + $0x2f8] sm:$0xff] }
  0x33   : > { %638 = vst [vmem:[%s5816_s24 + $0x1d8] sm:$0xff] %v637_v59  ;;  %640 = vst [vmem:[%s5816_s24 + $0x1e0] sm:$0xff] %v639_v60  ;;  %v647_v0 = vld [vmem:[%s5808_s23 + $0x400] sm:$0xff]  ;;  %v649_v1 = vld [vmem:[%s5808_s23 + $0x408] sm:$0xff] }
  0x34   : > { %642 = vst [vmem:[%s5816_s24 + $0x1e8] sm:$0xff] %v641_v61  ;;  %644 = vst [vmem:[%s5816_s24 + $0x1f0] sm:$0xff] %v643_v62  ;;  %v651_v2 = vld [vmem:[%s5808_s23 + $0x410] sm:$0xff]  ;;  %v653_v3 = vld [vmem:[%s5808_s23 + $0x418] sm:$0xff] }
  0x35   : > { %646 = vst [vmem:[%s5816_s24 + $0x1f8] sm:$0xff] %v645_v63  ;;  %648 = vst [vmem:[%s5816_s24 + $0x200] sm:$0xff] %v647_v0  ;;  %v655_v4 = vld [vmem:[%s5808_s23 + $0x420] sm:$0xff]  ;;  %v657_v5 = vld [vmem:[%s5808_s23 + $0x428] sm:$0xff] }
  0x36   : > { %650 = vst [vmem:[%s5816_s24 + $0x208] sm:$0xff] %v649_v1  ;;  %652 = vst [vmem:[%s5816_s24 + $0x210] sm:$0xff] %v651_v2  ;;  %v659_v6 = vld [vmem:[%s5808_s23 + $0x430] sm:$0xff]  ;;  %v661_v7 = vld [vmem:[%s5808_s23 + $0x438] sm:$0xff] }
  0x37   : > { %654 = vst [vmem:[%s5816_s24 + $0x218] sm:$0xff] %v653_v3  ;;  %656 = vst [vmem:[%s5816_s24 + $0x220] sm:$0xff] %v655_v4  ;;  %v663_v8 = vld [vmem:[%s5808_s23 + $0x440] sm:$0xff]  ;;  %v665_v9 = vld [vmem:[%s5808_s23 + $0x448] sm:$0xff] }
  0x38   : > { %658 = vst [vmem:[%s5816_s24 + $0x228] sm:$0xff] %v657_v5  ;;  %660 = vst [vmem:[%s5816_s24 + $0x230] sm:$0xff] %v659_v6  ;;  %v667_v10 = vld [vmem:[%s5808_s23 + $0x450] sm:$0xff]  ;;  %v669_v11 = vld [vmem:[%s5808_s23 + $0x458] sm:$0xff] }
  0x39   : > { %662 = vst [vmem:[%s5816_s24 + $0x238] sm:$0xff] %v661_v7  ;;  %664 = vst [vmem:[%s5816_s24 + $0x240] sm:$0xff] %v663_v8  ;;  %v671_v12 = vld [vmem:[%s5808_s23 + $0x460] sm:$0xff]  ;;  %v673_v13 = vld [vmem:[%s5808_s23 + $0x468] sm:$0xff] }
  0x3a   : > { %666 = vst [vmem:[%s5816_s24 + $0x248] sm:$0xff] %v665_v9  ;;  %668 = vst [vmem:[%s5816_s24 + $0x250] sm:$0xff] %v667_v10  ;;  %v675_v14 = vld [vmem:[%s5808_s23 + $0x470] sm:$0xff]  ;;  %v677_v15 = vld [vmem:[%s5808_s23 + $0x478] sm:$0xff] }
  0x3b   : > { %670 = vst [vmem:[%s5816_s24 + $0x258] sm:$0xff] %v669_v11  ;;  %672 = vst [vmem:[%s5816_s24 + $0x260] sm:$0xff] %v671_v12  ;;  %v679_v16 = vld [vmem:[%s5808_s23 + $0x480] sm:$0xff]  ;;  %v681_v17 = vld [vmem:[%s5808_s23 + $0x488] sm:$0xff] }
  0x3c   : > { %674 = vst [vmem:[%s5816_s24 + $0x268] sm:$0xff] %v673_v13  ;;  %676 = vst [vmem:[%s5816_s24 + $0x270] sm:$0xff] %v675_v14  ;;  %v683_v18 = vld [vmem:[%s5808_s23 + $0x490] sm:$0xff]  ;;  %v685_v19 = vld [vmem:[%s5808_s23 + $0x498] sm:$0xff] }
  0x3d   : > { %678 = vst [vmem:[%s5816_s24 + $0x278] sm:$0xff] %v677_v15  ;;  %680 = vst [vmem:[%s5816_s24 + $0x280] sm:$0xff] %v679_v16  ;;  %v687_v20 = vld [vmem:[%s5808_s23 + $0x4a0] sm:$0xff]  ;;  %v689_v21 = vld [vmem:[%s5808_s23 + $0x4a8] sm:$0xff] }
  0x3e   : > { %682 = vst [vmem:[%s5816_s24 + $0x288] sm:$0xff] %v681_v17  ;;  %684 = vst [vmem:[%s5816_s24 + $0x290] sm:$0xff] %v683_v18  ;;  %v691_v22 = vld [vmem:[%s5808_s23 + $0x4b0] sm:$0xff]  ;;  %v693_v23 = vld [vmem:[%s5808_s23 + $0x4b8] sm:$0xff] }
  0x3f   : > { %686 = vst [vmem:[%s5816_s24 + $0x298] sm:$0xff] %v685_v19  ;;  %688 = vst [vmem:[%s5816_s24 + $0x2a0] sm:$0xff] %v687_v20  ;;  %v695_v24 = vld [vmem:[%s5808_s23 + $0x4c0] sm:$0xff]  ;;  %v697_v25 = vld [vmem:[%s5808_s23 + $0x4c8] sm:$0xff] }
  0x40   : > { %690 = vst [vmem:[%s5816_s24 + $0x2a8] sm:$0xff] %v689_v21  ;;  %692 = vst [vmem:[%s5816_s24 + $0x2b0] sm:$0xff] %v691_v22  ;;  %v699_v26 = vld [vmem:[%s5808_s23 + $0x4d0] sm:$0xff]  ;;  %v701_v27 = vld [vmem:[%s5808_s23 + $0x4d8] sm:$0xff] }
  0x41   : > { %694 = vst [vmem:[%s5816_s24 + $0x2b8] sm:$0xff] %v693_v23  ;;  %696 = vst [vmem:[%s5816_s24 + $0x2c0] sm:$0xff] %v695_v24  ;;  %v703_v28 = vld [vmem:[%s5808_s23 + $0x4e0] sm:$0xff]  ;;  %v705_v29 = vld [vmem:[%s5808_s23 + $0x4e8] sm:$0xff] }
  0x42   : > { %698 = vst [vmem:[%s5816_s24 + $0x2c8] sm:$0xff] %v697_v25  ;;  %700 = vst [vmem:[%s5816_s24 + $0x2d0] sm:$0xff] %v699_v26  ;;  %v707_v30 = vld [vmem:[%s5808_s23 + $0x4f0] sm:$0xff]  ;;  %v709_v31 = vld [vmem:[%s5808_s23 + $0x4f8] sm:$0xff] }
  0x43   : > { %702 = vst [vmem:[%s5816_s24 + $0x2d8] sm:$0xff] %v701_v27  ;;  %704 = vst [vmem:[%s5816_s24 + $0x2e0] sm:$0xff] %v703_v28 }
  0x44   : > { %706 = vst [vmem:[%s5816_s24 + $0x2e8] sm:$0xff] %v705_v29  ;;  %708 = vst [vmem:[%s5816_s24 + $0x2f0] sm:$0xff] %v707_v30 }
  0x45   : > { %710 = vst [vmem:[%s5816_s24 + $0x2f8] sm:$0xff] %v709_v31 }
  0x46 PF: > { %p4642_p7 = scmp.ge.s32.totalorder %s5713_s11, 1  ;;  %p715_p8 = scmp.lt.s32.totalorder %s5713_s11, 3 }
  0x48   : > { %p716_p9 = pnand %p4642_p7, %p715_p8 }
  0x4a   : > { %719 = sbr.rel (%p716_p9) target bundleno = 1413 (0x585), region = 86 }
  0x51   : > { %v876_v32 = vld [vmem:[%s8214_s2] sm:$0xff]  ;;  %v877_v33 = vld [vmem:[%s8214_s2 + $0x8] sm:$0xff]  ;;  %v878_v34 = vld [vmem:[%s8214_s2 + $0x10] sm:$0xff]  ;;  %s722_s15 = sand.u32 1, %s5705_s30   ;;  %vm880_vm0 = vcmask 261120   ;;  %s4643_s21 = sshll.u32 %s5783_s12, 5 }
  0x52   : > { %v5407_v35 = vpack.c.bf16 %v877_v33, %v876_v32  ;;  %v879_v36 = vld [vmem:[%s8214_s2 + $0x18] sm:$0xff]  ;;  %s6019_s11 = smul.u32 768, %s722_s15  ;;  %p7021_p10 = scmp.lt.s32.totalorder %s4643_s21, 63 }
  0x53   : > { %v5411_v37 = vpack.c.bf16 %v879_v36, %v878_v34  ;;  %s5715_s29 = smov 16  }
  0x54   : > { %5408 = vmatprep.subr.bf16.mxu0 %v5407_v35  ;;  %s6022_s20 = scalar_lea.vmem [#allocation2], %s6019_s11  ;;  %s8426_s21 = smov (!%p7021_p10, %s4643_s21), 63 }
  0x55   : > { %5410 = vmatpush3.bf16.msra.mxu0 %v5407_v35  ;;  %v780_v38 = vld [vmem:[%s6022_s20] sm:$0xff]  ;;  %v781_v39 = vld [vmem:[%s6022_s20 + $0x8] sm:$0xff]  ;;  %v782_v40 = vld [vmem:[%s6022_s20 + $0x10] sm:$0xff]  ;;  %s4644_s27 = sshll.u32 %s8426_s21, 3  ;;  %s5716_s21 = smov 96  }
  0x56   : > { %5412 = vmatprep.subr.bf16.mxu0 %v5411_v37  ;;  %5095 = vmatprep.mubr.msk.f32.mxu0 %vm880_vm0, %v780_v38  ;;  %v783_v41 = vld [vmem:[%s6022_s20 + $0x18] sm:$0xff]  ;;  %v784_v42 = vld [vmem:[%s6022_s20 + $0x20] sm:$0xff]  ;;  %v785_v43 = vld [vmem:[%s6022_s20 + $0x28] sm:$0xff]  ;;  %s7076_s14 = scalar_lea.vmem %s8212_s0, %s4644_s27  ;;  %s7362_s28 = scalar_lea.vmem %s8220_s8, %s4644_s27 }
  0x57   : > { %v786_v44 = vld [vmem:[%s6022_s20 + $0x30] sm:$0xff]  ;;  %v787_v45 = vld [vmem:[%s6022_s20 + $0x38] sm:$0xff]  ;;  %v788_v46 = vld [vmem:[%s6022_s20 + $0x40] sm:$0xff]  ;;  %s7701_s27 = scalar_lea.vmem [#allocation3], %s6019_s11  ;;  %s4878_s11 = sshll.u32 (%p5798_p5), %s5783_s12, 8 }
  0x58   : > { %v789_v47 = vld [vmem:[%s6022_s20 + $0x48] sm:$0xff]  ;;  %v790_v48 = vld [vmem:[%s6022_s20 + $0x50] sm:$0xff]  ;;  %v791_v49 = vld [vmem:[%s6022_s20 + $0x58] sm:$0xff]  ;;  %s8011_s18 = scalar_lea.vmem (%p5798_p5), %s8221_s9, %s4878_s11 }
  0x59   : > { %5414 = vmatpush3.bf16.msra.mxu0 %v5411_v37  ;;  %v792_v50 = vld [vmem:[%s6022_s20 + $0x60] sm:$0xff]  ;;  %v793_v51 = vld [vmem:[%s6022_s20 + $0x68] sm:$0xff]  ;;  %v794_v52 = vld [vmem:[%s6022_s20 + $0x70] sm:$0xff] }
  0x5a   : > { %v795_v53 = vld [vmem:[%s6022_s20 + $0x78] sm:$0xff]  ;;  %v796_v54 = vld [vmem:[%s6022_s20 + $0x80] sm:$0xff]  ;;  %v797_v55 = vld [vmem:[%s6022_s20 + $0x88] sm:$0xff] }
  0x5b   : > { %v798_v56 = vld [vmem:[%s6022_s20 + $0x90] sm:$0xff]  ;;  %v799_v57 = vld [vmem:[%s6022_s20 + $0x98] sm:$0xff]  ;;  %v800_v58 = vld [vmem:[%s6022_s20 + $0xa0] sm:$0xff] }
  0x5c   : > { %5096 = vmatmul.mubr.msk.f32.vlgmr.msra.gmra.mrb[0].mxu0 %vm880_vm0, %v781_v39  ;;  %v801_v59 = vld [vmem:[%s6022_s20 + $0xa8] sm:$0xff]  ;;  %v802_v60 = vld [vmem:[%s6022_s20 + $0xb0] sm:$0xff]  ;;  %v803_v61 = vld [vmem:[%s6022_s20 + $0xb8] sm:$0xff] }
  0x5d   : > { %5098 = vmatprep.mubr.msk.f32.mxu0 %vm880_vm0, %v782_v40  ;;  %v804_v62 = vld [vmem:[%s6022_s20 + $0xc0] sm:$0xff]  ;;  %v805_v63 = vld [vmem:[%s6022_s20 + $0xc8] sm:$0xff]  ;;  %v806_v0 = vld [vmem:[%s6022_s20 + $0xd0] sm:$0xff] }
  0x5e   : > { %v807_v1 = vld [vmem:[%s6022_s20 + $0xd8] sm:$0xff]  ;;  %v808_v2 = vld [vmem:[%s6022_s20 + $0xe0] sm:$0xff]  ;;  %v809_v3 = vld [vmem:[%s6022_s20 + $0xe8] sm:$0xff] }
  0x5f   : > { %v810_v4 = vld [vmem:[%s6022_s20 + $0xf0] sm:$0xff]  ;;  %v811_v5 = vld [vmem:[%s6022_s20 + $0xf8] sm:$0xff]  ;;  %v812_v6 = vld [vmem:[%s6022_s20 + $0x100] sm:$0xff] }
  0x60   : > { %5099 = vmatmul.mubr.msk.f32.gmra.mrb[2].mxu0 %vm880_vm0, %v783_v41  ;;  %v813_v7 = vld [vmem:[%s6022_s20 + $0x108] sm:$0xff]  ;;  %v814_v8 = vld [vmem:[%s6022_s20 + $0x110] sm:$0xff]  ;;  %v815_v9 = vld [vmem:[%s6022_s20 + $0x118] sm:$0xff] }
  0x61   : > { %5101 = vmatprep.mubr.msk.f32.mxu0 %vm880_vm0, %v784_v42  ;;  %v816_v10 = vld [vmem:[%s6022_s20 + $0x120] sm:$0xff]  ;;  %v817_v11 = vld [vmem:[%s6022_s20 + $0x128] sm:$0xff]  ;;  %v818_v12 = vld [vmem:[%s6022_s20 + $0x130] sm:$0xff] }
  0x62   : > { %v819_v13 = vld [vmem:[%s6022_s20 + $0x138] sm:$0xff]  ;;  %v820_v14 = vld [vmem:[%s6022_s20 + $0x140] sm:$0xff]  ;;  %v821_v15 = vld [vmem:[%s6022_s20 + $0x148] sm:$0xff] }
  0x63   : > { %v822_v16 = vld [vmem:[%s6022_s20 + $0x150] sm:$0xff]  ;;  %v823_v17 = vld [vmem:[%s6022_s20 + $0x158] sm:$0xff]  ;;  %v824_v18 = vld [vmem:[%s6022_s20 + $0x160] sm:$0xff] }
  0x64   : > { %5102 = vmatmul.mubr.msk.f32.gmra.mrb[4].mxu0 %vm880_vm0, %v785_v43  ;;  %v825_v19 = vld [vmem:[%s6022_s20 + $0x168] sm:$0xff]  ;;  %v826_v20 = vld [vmem:[%s6022_s20 + $0x170] sm:$0xff]  ;;  %v827_v21 = vld [vmem:[%s6022_s20 + $0x178] sm:$0xff] }
  0x65   : > { %5104 = vmatprep.mubr.msk.f32.mxu0 %vm880_vm0, %v786_v44  ;;  %v828_v22 = vld [vmem:[%s6022_s20 + $0x180] sm:$0xff]  ;;  %v829_v23 = vld [vmem:[%s6022_s20 + $0x188] sm:$0xff]  ;;  %v830_v24 = vld [vmem:[%s6022_s20 + $0x190] sm:$0xff] }
  0x66   : > { %v831_v25 = vld [vmem:[%s6022_s20 + $0x198] sm:$0xff]  ;;  %v832_v26 = vld [vmem:[%s6022_s20 + $0x1a0] sm:$0xff]  ;;  %v833_v27 = vld [vmem:[%s6022_s20 + $0x1a8] sm:$0xff] }
  0x67   : > { %v834_v28 = vld [vmem:[%s6022_s20 + $0x1b0] sm:$0xff]  ;;  %v835_v29 = vld [vmem:[%s6022_s20 + $0x1b8] sm:$0xff]  ;;  %v836_v30 = vld [vmem:[%s6022_s20 + $0x1c0] sm:$0xff] }
  0x68   : > { %5105 = vmatmul.mubr.msk.f32.gmra.mrb[6].mxu0 %vm880_vm0, %v787_v45  ;;  %v837_v31 = vld [vmem:[%s6022_s20 + $0x1c8] sm:$0xff]  ;;  %v838_v32 = vld [vmem:[%s6022_s20 + $0x1d0] sm:$0xff]  ;;  %v839_v33 = vld [vmem:[%s6022_s20 + $0x1d8] sm:$0xff] }
  0x69   : > { %5107 = vmatprep.mubr.msk.f32.mxu0 %vm880_vm0, %v788_v46  ;;  %v840_v34 = vld [vmem:[%s6022_s20 + $0x1e0] sm:$0xff]  ;;  %v841_v35 = vld [vmem:[%s6022_s20 + $0x1e8] sm:$0xff]  ;;  %v842_v36 = vld [vmem:[%s6022_s20 + $0x1f0] sm:$0xff] }
  0x6a   : > { %v843_v37 = vld [vmem:[%s6022_s20 + $0x1f8] sm:$0xff]  ;;  %v844_v38 = vld [vmem:[%s6022_s20 + $0x200] sm:$0xff]  ;;  %v845_v39 = vld [vmem:[%s6022_s20 + $0x208] sm:$0xff] }
  0x6b   : > { %v846_v40 = vld [vmem:[%s6022_s20 + $0x210] sm:$0xff]  ;;  %v847_v41 = vld [vmem:[%s6022_s20 + $0x218] sm:$0xff]  ;;  %v848_v42 = vld [vmem:[%s6022_s20 + $0x220] sm:$0xff] }
  0x6c   : > { %5108 = vmatmul.mubr.msk.f32.gmra.mrb[8].mxu0 %vm880_vm0, %v789_v47  ;;  %v849_v43 = vld [vmem:[%s6022_s20 + $0x228] sm:$0xff]  ;;  %v850_v44 = vld [vmem:[%s6022_s20 + $0x230] sm:$0xff]  ;;  %v851_v45 = vld [vmem:[%s6022_s20 + $0x238] sm:$0xff] }
  0x6d   : > { %5110 = vmatprep.mubr.msk.f32.mxu0 %vm880_vm0, %v790_v48  ;;  %v852_v46 = vld [vmem:[%s6022_s20 + $0x240] sm:$0xff]  ;;  %v853_v47 = vld [vmem:[%s6022_s20 + $0x248] sm:$0xff]  ;;  %v854_v48 = vld [vmem:[%s6022_s20 + $0x250] sm:$0xff] }
  0x70   : > { %5111 = vmatmul.mubr.msk.f32.gmra.mrb[10].mxu0 %vm880_vm0, %v791_v49  ;;  %v855_v49 = vld [vmem:[%s6022_s20 + $0x258] sm:$0xff] }
  0x71   : > { %5113 = vmatprep.mubr.msk.f32.mxu0 %vm880_vm0, %v792_v50  ;;  %v856_v50 = vld [vmem:[%s6022_s20 + $0x260] sm:$0xff] }
  0x74   : > { %5114 = vmatmul.mubr.msk.f32.gmra.mrb[12].mxu0 %vm880_vm0, %v793_v51  ;;  %v857_v51 = vld [vmem:[%s6022_s20 + $0x268] sm:$0xff] }
  0x75   : > { %5116 = vmatprep.mubr.msk.f32.mxu0 %vm880_vm0, %v794_v52  ;;  %v858_v52 = vld [vmem:[%s6022_s20 + $0x270] sm:$0xff] }
  0x78   : > { %5117 = vmatmul.mubr.msk.f32.gmra.mrb[14].mxu0 %vm880_vm0, %v795_v53  ;;  %v859_v53 = vld [vmem:[%s6022_s20 + $0x278] sm:$0xff] }
  0x79   : > { %5119 = vmatprep.mubr.msk.f32.mxu0 %vm880_vm0, %v796_v54  ;;  %v860_v54 = vld [vmem:[%s6022_s20 + $0x280] sm:$0xff] }
  0x7c   : > { %5120 = vmatmul.mubr.msk.f32.gmra.mrb[16].mxu0 %vm880_vm0, %v797_v55  ;;  %v861_v55 = vld [vmem:[%s6022_s20 + $0x288] sm:$0xff] }
  0x7d   : > { %5122 = vmatprep.mubr.msk.f32.mxu0 %vm880_vm0, %v798_v56  ;;  %v862_v56 = vld [vmem:[%s6022_s20 + $0x290] sm:$0xff] }
  0x80   : > { %5123 = vmatmul.mubr.msk.f32.gmra.mrb[18].mxu0 %vm880_vm0, %v799_v57  ;;  %v863_v57 = vld [vmem:[%s6022_s20 + $0x298] sm:$0xff] }
  0x81   : > { %5125 = vmatprep.mubr.msk.f32.mxu0 %vm880_vm0, %v800_v58  ;;  %v864_v58 = vld [vmem:[%s6022_s20 + $0x2a0] sm:$0xff] }
  0x84   : > { %5126 = vmatmul.mubr.msk.f32.gmra.mrb[20].mxu0 %vm880_vm0, %v801_v59  ;;  %v865_v59 = vld [vmem:[%s6022_s20 + $0x2a8] sm:$0xff] }
  0x85   : > { %5128 = vmatprep.mubr.msk.f32.mxu0 %vm880_vm0, %v802_v60  ;;  %v866_v60 = vld [vmem:[%s6022_s20 + $0x2b0] sm:$0xff] }
  0x88   : > { %5129 = vmatmul.mubr.msk.f32.gmra.mrb[22].mxu0 %vm880_vm0, %v803_v61  ;;  %v867_v61 = vld [vmem:[%s6022_s20 + $0x2b8] sm:$0xff] }
  0x89   : > { %5131 = vmatprep.mubr.msk.f32.mxu0 %vm880_vm0, %v804_v62  ;;  %v868_v62 = vld [vmem:[%s6022_s20 + $0x2c0] sm:$0xff] }
  0x8c   : > { %5132 = vmatmul.mubr.msk.f32.gmra.mrb[24].mxu0 %vm880_vm0, %v805_v63  ;;  %v869_v63 = vld [vmem:[%s6022_s20 + $0x2c8] sm:$0xff] }
  0x8d   : > { %5134 = vmatprep.mubr.msk.f32.mxu0 %vm880_vm0, %v806_v0  ;;  %v870_v0 = vld [vmem:[%s6022_s20 + $0x2d0] sm:$0xff] }
  0x90   : > { %5135 = vmatmul.mubr.msk.f32.gmra.mrb[26].mxu0 %vm880_vm0, %v807_v1  ;;  %v871_v1 = vld [vmem:[%s6022_s20 + $0x2d8] sm:$0xff] }
  0x91   : > { %5137 = vmatprep.mubr.msk.f32.mxu0 %vm880_vm0, %v808_v2  ;;  %v872_v2 = vld [vmem:[%s6022_s20 + $0x2e0] sm:$0xff] }
  0x94   : > { %5138 = vmatmul.mubr.msk.f32.gmra.mrb[28].mxu0 %vm880_vm0, %v809_v3  ;;  %v873_v3 = vld [vmem:[%s6022_s20 + $0x2e8] sm:$0xff] }
  0x95   : > { %5140 = vmatprep.mubr.msk.f32.mxu0 %vm880_vm0, %v810_v4  ;;  %v874_v4 = vld [vmem:[%s6022_s20 + $0x2f0] sm:$0xff] }
  0x98   : > { %5141 = vmatmul.mubr.msk.f32.gmra.mrb[30].mxu0 %vm880_vm0, %v811_v5  ;;  %v875_v5 = vld [vmem:[%s6022_s20 + $0x2f8] sm:$0xff] }
  0x99   : > { %5143 = vmatprep.mubr.msk.f32.mxu0 %vm880_vm0, %v812_v6 }
  0x9c   : > { %5144 = vmatmul.mubr.msk.f32.gmra.mrb[32].mxu0 %vm880_vm0, %v813_v7 }
  0x9d   : > { %5146 = vmatprep.mubr.msk.f32.mxu0 %vm880_vm0, %v814_v8 }
  0xa0   : > { %5147 = vmatmul.mubr.msk.f32.gmra.mrb[34].mxu0 %vm880_vm0, %v815_v9 }
  0xa1   : > { %5149 = vmatprep.mubr.msk.f32.mxu0 %vm880_vm0, %v816_v10 }
  0xa4   : > { %5150 = vmatmul.mubr.msk.f32.gmra.mrb[36].mxu0 %vm880_vm0, %v817_v11 }
  0xa5   : > { %5152 = vmatprep.mubr.msk.f32.mxu0 %vm880_vm0, %v818_v12  ;;  %v2134_v12 = vld [vmem:[%s8216_s4] sm:$0xff] }
  0xa8   : > { %5153 = vmatmul.mubr.msk.f32.gmra.mrb[38].mxu0 %vm880_vm0, %v819_v13  ;;  %v2135_v13 = vld [vmem:[%s8216_s4 + $0x8] sm:$0xff] }
  0xa9   : > { %5155 = vmatprep.mubr.msk.f32.mxu0 %vm880_vm0, %v820_v14 }
  0xac   : > { %5156 = vmatmul.mubr.msk.f32.gmra.mrb[40].mxu0 %vm880_vm0, %v821_v15  ;;  %v5415_v15 = vpack.c.bf16 %v2135_v13, %v2134_v12 }
  0xad   : > { %5158 = vmatprep.mubr.msk.f32.mxu0 %vm880_vm0, %v822_v16 }
  0xae   : > { %5416 = vmatprep.subr.bf16.mxu1 %v5415_v15 }
  0xaf   : > { %5418 = vmatpush3.bf16.msra.mxu1 %v5415_v15 }
  0xb0   : > { %5159 = vmatmul.mubr.msk.f32.gmra.mrb[42].mxu0 %vm880_vm0, %v823_v17  ;;  %v2136_v17 = vld [vmem:[%s8216_s4 + $0x10] sm:$0xff] }
  0xb1   : > { %5161 = vmatprep.mubr.msk.f32.mxu0 %vm880_vm0, %v824_v18  ;;  %v2137_v18 = vld [vmem:[%s8216_s4 + $0x18] sm:$0xff] }
  0xb4   : > { %5162 = vmatmul.mubr.msk.f32.gmra.mrb[44].mxu0 %vm880_vm0, %v825_v19 }
  0xb5   : > { %5164 = vmatprep.mubr.msk.f32.mxu0 %vm880_vm0, %v826_v20  ;;  %v5419_v20 = vpack.c.bf16 %v2137_v18, %v2136_v17 }
  0xb7   : > { %5420 = vmatprep.subr.bf16.mxu1 %v5419_v20 }
  0xb8   : > { %5165 = vmatmul.mubr.msk.f32.gmra.mrb[46].mxu0 %vm880_vm0, %v827_v21  ;;  %5422 = vmatpush3.bf16.msra.mxu1 %v5419_v20 }
  0xb9   : > { %5167 = vmatprep.mubr.msk.f32.mxu0 %vm880_vm0, %v828_v22 }
  0xbc   : > { %5168 = vmatmul.mubr.msk.f32.gmra.mrb[48].mxu0 %vm880_vm0, %v829_v23 }
  0xbd   : > { %5170 = vmatprep.mubr.msk.f32.mxu0 %vm880_vm0, %v830_v24 }
  0xc0   : > { %5171 = vmatmul.mubr.msk.f32.gmra.mrb[50].mxu0 %vm880_vm0, %v831_v25  ;;  %v2130_v25 = vld [vmem:[%s8215_s3] sm:$0xff] }
  0xc1   : > { %5173 = vmatprep.mubr.msk.f32.mxu0 %vm880_vm0, %v832_v26  ;;  %v2131_v26 = vld [vmem:[%s8215_s3 + $0x8] sm:$0xff] }
  0xc4   : > { %5174 = vmatmul.mubr.msk.f32.gmra.mrb[52].mxu0 %vm880_vm0, %v833_v27 }
  0xc5   : > { %5176 = vmatprep.mubr.msk.f32.mxu0 %vm880_vm0, %v834_v28  ;;  %v6262_v28 = vpack.c.bf16 %v2131_v26, %v2130_v25 }
  0xc7   : > { %5424 = vmatprep.subr.bf16.mxu1 %v6262_v28 }
  0xc8   : > { %5177 = vmatmul.mubr.msk.f32.gmra.mrb[54].mxu0 %vm880_vm0, %v835_v29 }
  0xc9   : > { %5179 = vmatprep.mubr.msk.f32.mxu0 %vm880_vm0, %v836_v30 }
  0xcc   : > { %5180 = vmatmul.mubr.msk.f32.gmra.mrb[56].mxu0 %vm880_vm0, %v837_v31 }
  0xcd   : > { %5182 = vmatprep.mubr.msk.f32.mxu0 %vm880_vm0, %v838_v32 }
  0xd0   : > { %5183 = vmatmul.mubr.msk.f32.gmra.mrb[58].mxu0 %vm880_vm0, %v839_v33 }
  0xd1   : > { %5185 = vmatprep.mubr.msk.f32.mxu0 %vm880_vm0, %v840_v34 }
  0xd4   : > { %5186 = vmatmul.mubr.msk.f32.gmra.mrb[60].mxu0 %vm880_vm0, %v841_v35 }
  0xd5   : > { %5188 = vmatprep.mubr.msk.f32.mxu0 %vm880_vm0, %v842_v36 }
  0xd8   : > { %5189 = vmatmul.mubr.msk.f32.gmra.mrb[62].mxu0 %vm880_vm0, %v843_v37 }
  0xd9   : > { %5191 = vmatprep.mubr.msk.f32.mxu0 %vm880_vm0, %v844_v38 }
  0xdc   : > { %5192 = vmatmul.mubr.msk.f32.gmra.mrb[64].mxu0 %vm880_vm0, %v845_v39 }
  0xdd   : > { %5194 = vmatprep.mubr.msk.f32.mxu0 %vm880_vm0, %v846_v40 }
  0xe0   : > { %5195 = vmatmul.mubr.msk.f32.gmra.mrb[66].mxu0 %vm880_vm0, %v847_v41 }
  0xe1   : > { %5197 = vmatprep.mubr.msk.f32.mxu0 %vm880_vm0, %v848_v42 }
  0xe4   : > { %5198 = vmatmul.mubr.msk.f32.gmra.mrb[68].mxu0 %vm880_vm0, %v849_v43 }
  0xe5   : > { %5200 = vmatprep.mubr.msk.f32.mxu0 %vm880_vm0, %v850_v44 }
  0xe8   : > { %5201 = vmatmul.mubr.msk.f32.gmra.mrb[70].mxu0 %vm880_vm0, %v851_v45 }
  0xe9   : > { %5203 = vmatprep.mubr.msk.f32.mxu0 %vm880_vm0, %v852_v46 }
  0xec   : > { %5204 = vmatmul.mubr.msk.f32.gmra.mrb[72].mxu0 %vm880_vm0, %v853_v47 }
  0xed   : > { %5206 = vmatprep.mubr.msk.f32.mxu0 %vm880_vm0, %v854_v48 }
  0xf0   : > { %5207 = vmatmul.mubr.msk.f32.gmra.mrb[74].mxu0 %vm880_vm0, %v855_v49 }
  0xf1   : > { %5209 = vmatprep.mubr.msk.f32.mxu0 %vm880_vm0, %v856_v50 }
  0xf4   : > { %5210 = vmatmul.mubr.msk.f32.gmra.mrb[76].mxu0 %vm880_vm0, %v857_v51 }
  0xf5   : > { %5212 = vmatprep.mubr.msk.f32.mxu0 %vm880_vm0, %v858_v52 }
  0xf8   : > { %5213 = vmatmul.mubr.msk.f32.gmra.mrb[78].mxu0 %vm880_vm0, %v859_v53 }
  0xf9   : > { %5215 = vmatprep.mubr.msk.f32.mxu0 %vm880_vm0, %v860_v54 }
  0xfc   : > { %5216 = vmatmul.mubr.msk.f32.gmra.mrb[80].mxu0 %vm880_vm0, %v861_v55 }
  0xfd   : > { %5218 = vmatprep.mubr.msk.f32.mxu0 %vm880_vm0, %v862_v56 }
 0x100   : > { %5219 = vmatmul.mubr.msk.f32.gmra.mrb[82].mxu0 %vm880_vm0, %v863_v57 }
 0x101   : > { %5221 = vmatprep.mubr.msk.f32.mxu0 %vm880_vm0, %v864_v58 }
 0x104   : > { %5222 = vmatmul.mubr.msk.f32.gmra.mrb[84].mxu0 %vm880_vm0, %v865_v59 }
 0x105   : > { %5224 = vmatprep.mubr.msk.f32.mxu0 %vm880_vm0, %v866_v60 }
 0x108   : > { %5225 = vmatmul.mubr.msk.f32.gmra.mrb[86].mxu0 %vm880_vm0, %v867_v61 }
 0x109   : > { %5227 = vmatprep.mubr.msk.f32.mxu0 %vm880_vm0, %v868_v62 }
 0x10c   : > { %5228 = vmatmul.mubr.msk.f32.gmra.mrb[88].mxu0 %vm880_vm0, %v869_v63 }
 0x10d   : > { %5230 = vmatprep.mubr.msk.f32.mxu0 %vm880_vm0, %v870_v0 }
 0x110   : > { %5231 = vmatmul.mubr.msk.f32.gmra.mrb[90].mxu0 %vm880_vm0, %v871_v1 }
 0x111   : > { %5233 = vmatprep.mubr.msk.f32.mxu0 %vm880_vm0, %v872_v2 }
 0x114   : > { %5234 = vmatmul.mubr.msk.f32.gmra.mrb[92].mxu0 %vm880_vm0, %v873_v3 }
 0x115   : > { %5236 = vmatprep.mubr.msk.f32.mxu0 %vm880_vm0, %v874_v4 }
 0x118   : > { %5237 = vmatmul.mubr.msk.f32.gmra.mrb[94].mxu0 %vm880_vm0, %v875_v5 }
 0x12f   : > { %v6216_v6 = vpop.f32.mrb[0].mxu0 }
 0x130   : > { %v6218_v7 = vpop.f32.mrb[1].mxu0  ;;  %v1715_v48 = vmul.f32 %v6216_v6, %v6216_v6 }
 0x131   : > { %v1714_v51 = vmul.f32 %v6218_v7, %v6218_v7 }
 0x133   : > { %v6220_v8 = vpop.f32.mrb[2].mxu0 }
 0x134   : > { %v6222_v9 = vpop.f32.mrb[3].mxu0  ;;  %v1717_v56 = vmul.f32 %v6220_v8, %v6220_v8 }
 0x135   : > { %v1716_v59 = vmul.f32 %v6222_v9, %v6222_v9 }
 0x137   : > { %v6224_v10 = vpop.f32.mrb[4].mxu0 }
 0x138   : > { %v6226_v11 = vpop.f32.mrb[5].mxu0  ;;  %v1719_v0 = vmul.f32 %v6224_v10, %v6224_v10 }
 0x139   : > { %v1718_v3 = vmul.f32 %v6226_v11, %v6226_v11 }
 0x13b   : > { %v6234_v14 = vpop.f32.mrb[6].mxu0 }
 0x13c   : > { %8289 = vst [vmem:[#allocation4_spill] sm:$0xff] %v6234_v14  ;;  %v6236_v16 = vpop.f32.mrb[7].mxu0  ;;  %v1721_v15 = vmul.f32 %v6234_v14, %v6234_v14 }
 0x13d   : > { %8290 = vst [vmem:[#allocation5_spill] sm:$0xff] %v6236_v16  ;;  %v1720_v20 = vmul.f32 %v6236_v16, %v6236_v16 }
 0x13f   : > { %v6244_v19 = vpop.f32.mrb[8].mxu0 }
 0x140   : > { %8291 = vst [vmem:[#allocation6_spill] sm:$0xff] %v6244_v19  ;;  %v6246_v21 = vpop.f32.mrb[9].mxu0 }
 0x141   : > { %8292 = vst [vmem:[#allocation7_spill] sm:$0xff] %v6246_v21 }
 0x143   : > { %v6248_v22 = vpop.f32.mrb[10].mxu0 }
 0x144   : > { %8293 = vst [vmem:[#allocation8_spill] sm:$0xff] %v6248_v22  ;;  %v6250_v23 = vpop.f32.mrb[11].mxu0 }
 0x145   : > { %8294 = vst [vmem:[#allocation9_spill] sm:$0xff] %v6250_v23 }
 0x147   : > { %v6252_v24 = vpop.f32.mrb[12].mxu0 }
 0x148   : > { %8295 = vst [vmem:[#allocation10_spill] sm:$0xff] %v6252_v24  ;;  %v6260_v27 = vpop.f32.mrb[13].mxu0 }
 0x149   : > { %8296 = vst [vmem:[#allocation11_spill] sm:$0xff] %v6260_v27 }
 0x14b   : > { %v6265_v29 = vpop.f32.mrb[14].mxu0 }
 0x14c   : > { %8297 = vst [vmem:[#allocation12_spill] sm:$0xff] %v6265_v29  ;;  %v6267_v30 = vpop.f32.mrb[15].mxu0 }
 0x14d   : > { %8298 = vst [vmem:[#allocation13_spill] sm:$0xff] %v6267_v30 }
 0x14f   : > { %v6269_v31 = vpop.f32.mrb[16].mxu0 }
 0x150   : > { %8299 = vst [vmem:[#allocation14_spill] sm:$0xff] %v6269_v31  ;;  %v6271_v32 = vpop.f32.mrb[17].mxu0 }
 0x151   : > { %8300 = vst [vmem:[#allocation15_spill] sm:$0xff] %v6271_v32 }
 0x153   : > { %v6273_v33 = vpop.f32.mrb[18].mxu0 }
 0x154   : > { %8301 = vst [vmem:[#allocation16_spill] sm:$0xff] %v6273_v33  ;;  %v6275_v34 = vpop.f32.mrb[19].mxu0 }
 0x155   : > { %8302 = vst [vmem:[#allocation17_spill] sm:$0xff] %v6275_v34 }
 0x157   : > { %v6277_v35 = vpop.f32.mrb[20].mxu0 }
 0x158   : > { %8303 = vst [vmem:[#allocation18_spill] sm:$0xff] %v6277_v35  ;;  %v6279_v36 = vpop.f32.mrb[21].mxu0 }
 0x159   : > { %8304 = vst [vmem:[#allocation19_spill] sm:$0xff] %v6279_v36 }
 0x15b   : > { %v6281_v37 = vpop.f32.mrb[22].mxu0 }
 0x15c   : > { %8305 = vst [vmem:[#allocation20_spill] sm:$0xff] %v6281_v37  ;;  %v6283_v38 = vpop.f32.mrb[23].mxu0 }
 0x15d   : > { %8306 = vst [vmem:[#allocation21_spill] sm:$0xff] %v6283_v38 }
 0x15f   : > { %v6285_v39 = vpop.f32.mrb[24].mxu0 }
 0x160   : > { %8307 = vst [vmem:[#allocation22_spill] sm:$0xff] %v6285_v39  ;;  %v6287_v40 = vpop.f32.mrb[25].mxu0 }
 0x161   : > { %8308 = vst [vmem:[#allocation23_spill] sm:$0xff] %v6287_v40 }
 0x163   : > { %v6289_v41 = vpop.f32.mrb[26].mxu0 }
 0x164   : > { %8309 = vst [vmem:[#allocation24_spill] sm:$0xff] %v6289_v41  ;;  %v6291_v42 = vpop.f32.mrb[27].mxu0 }
 0x165   : > { %8310 = vst [vmem:[#allocation25_spill] sm:$0xff] %v6291_v42 }
 0x167   : > { %v6293_v43 = vpop.f32.mrb[28].mxu0 }
 0x168   : > { %8311 = vst [vmem:[#allocation26_spill] sm:$0xff] %v6293_v43  ;;  %v6295_v44 = vpop.f32.mrb[29].mxu0 }
 0x169   : > { %8312 = vst [vmem:[#allocation27_spill] sm:$0xff] %v6295_v44 }
 0x16b   : > { %v6297_v45 = vpop.f32.mrb[30].mxu0 }
 0x16c   : > { %8313 = vst [vmem:[#allocation28_spill] sm:$0xff] %v6297_v45  ;;  %v6299_v46 = vpop.f32.mrb[31].mxu0 }
 0x16d   : > { %8314 = vst [vmem:[#allocation29_spill] sm:$0xff] %v6299_v46 }
 0x16f   : > { %v6301_v47 = vpop.f32.mrb[32].mxu0 }
 0x170   : > { %v1747_v49 = vmul.f32 %v6301_v47, %v6301_v47  ;;  %v6307_v50 = vpop.f32.mrb[33].mxu0 }
 0x171   : > { %v1746_v52 = vmul.f32 %v6307_v50, %v6307_v50 }
 0x172   : > { %v6313_v53 = vadd.f32 %v1747_v49, %v1715_v48 }
 0x173   : > { %v6315_v54 = vadd.f32 %v1746_v52, %v1714_v51  ;;  %v6317_v55 = vpop.f32.mrb[34].mxu0  ;;  %v1723_v51 = vmul.f32 %v6244_v19, %v6244_v19 }
 0x174   : > { %v1749_v57 = vmul.f32 %v6317_v55, %v6317_v55  ;;  %v6323_v58 = vpop.f32.mrb[35].mxu0 }
 0x175   : > { %v1748_v60 = vmul.f32 %v6323_v58, %v6323_v58 }
 0x176   : > { %v6329_v61 = vadd.f32 %v1749_v57, %v1717_v56  ;;  %v1722_v57 = vmul.f32 %v6246_v21, %v6246_v21 }
 0x177   : > { %v6331_v62 = vadd.f32 %v1748_v60, %v1716_v59  ;;  %v6333_v63 = vpop.f32.mrb[36].mxu0 }
 0x178   : > { %v1751_v1 = vmul.f32 %v6333_v63, %v6333_v63  ;;  %v6339_v2 = vpop.f32.mrb[37].mxu0 }
 0x179   : > { %8315 = vst [vmem:[#allocation30_spill] sm:$0xff] %v6339_v2  ;;  %v1750_v4 = vmul.f32 %v6339_v2, %v6339_v2 }
 0x17a   : > { %v6345_v5 = vadd.f32 %v1751_v1, %v1719_v0 }
 0x17b   : > { %v6347_v12 = vadd.f32 %v1750_v4, %v1718_v3  ;;  %v6349_v13 = vpop.f32.mrb[38].mxu0  ;;  %v1725_v3 = vmul.f32 %v6248_v22, %v6248_v22 }
 0x17c   : > { %8316 = vst [vmem:[#allocation31_spill] sm:$0xff] %v6349_v13  ;;  %v1753_v17 = vmul.f32 %v6349_v13, %v6349_v13  ;;  %v6355_v18 = vpop.f32.mrb[39].mxu0 }
 0x17d   : > { %8317 = vst [vmem:[#allocation32_spill] sm:$0xff] %v6355_v18  ;;  %v1752_v25 = vmul.f32 %v6355_v18, %v6355_v18 }
 0x17e   : > { %v6361_v26 = vadd.f32 %v1753_v17, %v1721_v15  ;;  %v1724_v17 = vmul.f32 %v6250_v23, %v6250_v23  ;;  %v1726_v23 = vmul.f32 %v6260_v27, %v6260_v27  ;;  %v1728_v27 = vmul.f32 %v6267_v30, %v6267_v30 }
 0x17f   : > { %v6363_v48 = vadd.f32 %v1752_v25, %v1720_v20  ;;  %v6365_v49 = vpop.f32.mrb[40].mxu0  ;;  %v1730_v30 = vmul.f32 %v6271_v32, %v6271_v32  ;;  %v1732_v32 = vmul.f32 %v6275_v34, %v6275_v34  ;;  %v1734_v34 = vmul.f32 %v6279_v36, %v6279_v36 }
 0x180   : > { %8318 = vst [vmem:[#allocation33_spill] sm:$0xff] %v6365_v49  ;;  %v1755_v52 = vmul.f32 %v6365_v49, %v6365_v49  ;;  %v6371_v56 = vpop.f32.mrb[41].mxu0  ;;  %v1736_v36 = vmul.f32 %v6283_v38, %v6283_v38  ;;  %v1738_v38 = vmul.f32 %v6287_v40, %v6287_v40  ;;  %v1740_v40 = vmul.f32 %v6291_v42, %v6291_v42 }
 0x181   : > { %8319 = vst [vmem:[#allocation34_spill] sm:$0xff] %v6371_v56  ;;  %v1754_v59 = vmul.f32 %v6371_v56, %v6371_v56  ;;  %v1742_v42 = vmul.f32 %v6295_v44, %v6295_v44  ;;  %v1744_v44 = vmul.f32 %v6299_v46, %v6299_v46 }
 0x182   : > { %v6377_v60 = vadd.f32 %v1755_v52, %v1723_v51 }
 0x183   : > { %v6379_v0 = vadd.f32 %v1754_v59, %v1722_v57  ;;  %v6381_v1 = vpop.f32.mrb[42].mxu0  ;;  %v1727_v57 = vmul.f32 %v6252_v24, %v6252_v24 }
 0x184   : > { %8320 = vst [vmem:[#allocation35_spill] sm:$0xff] %v6381_v1  ;;  %v1757_v4 = vmul.f32 %v6381_v1, %v6381_v1  ;;  %v6387_v15 = vpop.f32.mrb[43].mxu0 }
 0x185   : > { %8321 = vst [vmem:[#allocation36_spill] sm:$0xff] %v6387_v15  ;;  %v1756_v20 = vmul.f32 %v6387_v15, %v6387_v15 }
 0x186   : > { %v6393_v25 = vadd.f32 %v1757_v4, %v1725_v3 }
 0x187   : > { %v6395_v51 = vadd.f32 %v1756_v20, %v1724_v17  ;;  %v6397_v52 = vpop.f32.mrb[44].mxu0  ;;  %v1729_v20 = vmul.f32 %v6265_v29, %v6265_v29 }
 0x188   : > { %8322 = vst [vmem:[#allocation37_spill] sm:$0xff] %v6397_v52  ;;  %v1759_v59 = vmul.f32 %v6397_v52, %v6397_v52  ;;  %v6403_v1 = vpop.f32.mrb[45].mxu0 }
 0x189   : > { %8323 = vst [vmem:[#allocation38_spill] sm:$0xff] %v6403_v1  ;;  %v1758_v15 = vmul.f32 %v6403_v1, %v6403_v1 }
 0x18a   : > { %v6409_v3 = vadd.f32 %v1759_v59, %v1727_v57  ;;  %v1731_v59 = vmul.f32 %v6269_v31, %v6269_v31 }
 0x18b   : > { %v6411_v4 = vadd.f32 %v1758_v15, %v1726_v23  ;;  %v6413_v17 = vpop.f32.mrb[46].mxu0 }
 0x18c   : > { %8324 = vst [vmem:[#allocation39_spill] sm:$0xff] %v6413_v17  ;;  %v1761_v52 = vmul.f32 %v6413_v17, %v6413_v17  ;;  %v6419_v24 = vpop.f32.mrb[47].mxu0 }
 0x18d   : > { %8325 = vst [vmem:[#allocation40_spill] sm:$0xff] %v6419_v24  ;;  %v1760_v1 = vmul.f32 %v6419_v24, %v6419_v24 }
 0x18e   : > { %v6425_v57 = vadd.f32 %v1761_v52, %v1729_v20  ;;  %v1733_v20 = vmul.f32 %v6273_v33, %v6273_v33 }
 0x18f   : > { %v6427_v23 = vadd.f32 %v1760_v1, %v1728_v27  ;;  %v6429_v15 = vpop.f32.mrb[48].mxu0 }
 0x190   : > { %8326 = vst [vmem:[#allocation41_spill] sm:$0xff] %v6429_v15  ;;  %v1763_v17 = vmul.f32 %v6429_v15, %v6429_v15  ;;  %v6435_v29 = vpop.f32.mrb[49].mxu0 }
 0x191   : > { %8327 = vst [vmem:[#allocation42_spill] sm:$0xff] %v6435_v29  ;;  %v1762_v24 = vmul.f32 %v6435_v29, %v6435_v29 }
 0x192   : > { %v6441_v52 = vadd.f32 %v1763_v17, %v1731_v59  ;;  %v1735_v59 = vmul.f32 %v6277_v35, %v6277_v35 }
 0x193   : > { %v6443_v27 = vadd.f32 %v1762_v24, %v1730_v30  ;;  %v6445_v1 = vpop.f32.mrb[50].mxu0 }
 0x194   : > { %8328 = vst [vmem:[#allocation43_spill] sm:$0xff] %v6445_v1  ;;  %v1765_v15 = vmul.f32 %v6445_v1, %v6445_v1  ;;  %v6451_v31 = vpop.f32.mrb[51].mxu0 }
 0x195   : > { %8329 = vst [vmem:[#allocation44_spill] sm:$0xff] %v6451_v31  ;;  %v1764_v29 = vmul.f32 %v6451_v31, %v6451_v31 }
 0x196   : > { %v6457_v17 = vadd.f32 %v1765_v15, %v1733_v20  ;;  %v1737_v20 = vmul.f32 %v6281_v37, %v6281_v37 }
 0x197   : > { %v6459_v24 = vadd.f32 %v1764_v29, %v1732_v32  ;;  %v6461_v30 = vpop.f32.mrb[52].mxu0 }
 0x198   : > { %8330 = vst [vmem:[#allocation45_spill] sm:$0xff] %v6461_v30  ;;  %v1767_v1 = vmul.f32 %v6461_v30, %v6461_v30  ;;  %v6467_v33 = vpop.f32.mrb[53].mxu0 }
 0x199   : > { %8331 = vst [vmem:[#allocation46_spill] sm:$0xff] %v6467_v33  ;;  %v1766_v31 = vmul.f32 %v6467_v33, %v6467_v33 }
 0x19a   : > { %v6473_v15 = vadd.f32 %v1767_v1, %v1735_v59  ;;  %v1739_v59 = vmul.f32 %v6285_v39, %v6285_v39 }
 0x19b   : > { %v6475_v29 = vadd.f32 %v1766_v31, %v1734_v34  ;;  %v6477_v32 = vpop.f32.mrb[54].mxu0 }
 0x19c   : > { %8332 = vst [vmem:[#allocation47_spill] sm:$0xff] %v6477_v32  ;;  %v1769_v30 = vmul.f32 %v6477_v32, %v6477_v32  ;;  %v6483_v35 = vpop.f32.mrb[55].mxu0 }
 0x19d   : > { %8333 = vst [vmem:[#allocation48_spill] sm:$0xff] %v6483_v35  ;;  %v1768_v33 = vmul.f32 %v6483_v35, %v6483_v35 }
 0x19e   : > { %v6489_v1 = vadd.f32 %v1769_v30, %v1737_v20  ;;  %v1741_v20 = vmul.f32 %v6289_v41, %v6289_v41 }
 0x19f   : > { %v6491_v31 = vadd.f32 %v1768_v33, %v1736_v36  ;;  %v6493_v34 = vpop.f32.mrb[56].mxu0 }
 0x1a0   : > { %8334 = vst [vmem:[#allocation49_spill] sm:$0xff] %v6493_v34  ;;  %v1771_v32 = vmul.f32 %v6493_v34, %v6493_v34  ;;  %v6499_v37 = vpop.f32.mrb[57].mxu0 }
 0x1a1   : > { %8335 = vst [vmem:[#allocation50_spill] sm:$0xff] %v6499_v37  ;;  %v1770_v35 = vmul.f32 %v6499_v37, %v6499_v37 }
 0x1a2   : > { %v6505_v30 = vadd.f32 %v1771_v32, %v1739_v59  ;;  %v1743_v59 = vmul.f32 %v6293_v43, %v6293_v43 }
 0x1a3   : > { %v6507_v33 = vadd.f32 %v1770_v35, %v1738_v38  ;;  %v6509_v36 = vpop.f32.mrb[58].mxu0 }
 0x1a4   : > { %8336 = vst [vmem:[#allocation51_spill] sm:$0xff] %v6509_v36  ;;  %v1773_v34 = vmul.f32 %v6509_v36, %v6509_v36  ;;  %v6515_v39 = vpop.f32.mrb[59].mxu0 }
 0x1a5   : > { %8337 = vst [vmem:[#allocation52_spill] sm:$0xff] %v6515_v39  ;;  %v1772_v37 = vmul.f32 %v6515_v39, %v6515_v39 }
 0x1a6   : > { %v6521_v32 = vadd.f32 %v1773_v34, %v1741_v20  ;;  %v1745_v20 = vmul.f32 %v6297_v45, %v6297_v45 }
 0x1a7   : > { %v6523_v35 = vadd.f32 %v1772_v37, %v1740_v40  ;;  %v6525_v38 = vpop.f32.mrb[60].mxu0 }
 0x1a8   : > { %8338 = vst [vmem:[#allocation53_spill] sm:$0xff] %v6525_v38  ;;  %v1775_v36 = vmul.f32 %v6525_v38, %v6525_v38  ;;  %v6531_v41 = vpop.f32.mrb[61].mxu0 }
 0x1a9   : > { %8339 = vst [vmem:[#allocation54_spill] sm:$0xff] %v6531_v41  ;;  %v1774_v39 = vmul.f32 %v6531_v41, %v6531_v41 }
 0x1aa   : > { %v6537_v34 = vadd.f32 %v1775_v36, %v1743_v59 }
 0x1ab   : > { %v6539_v37 = vadd.f32 %v1774_v39, %v1742_v42  ;;  %v6541_v40 = vpop.f32.mrb[62].mxu0 }
 0x1ac   : > { %8340 = vst [vmem:[#allocation55_spill] sm:$0xff] %v6541_v40  ;;  %v1777_v38 = vmul.f32 %v6541_v40, %v6541_v40  ;;  %v6547_v43 = vpop.f32.mrb[63].mxu0 }
 0x1ad   : > { %8341 = vst [vmem:[#allocation56_spill] sm:$0xff] %v6547_v43  ;;  %v1776_v41 = vmul.f32 %v6547_v43, %v6547_v43 }
 0x1ae   : > { %v6553_v36 = vadd.f32 %v1777_v38, %v1745_v20 }
 0x1af   : > { %v6555_v39 = vadd.f32 %v1776_v41, %v1744_v44  ;;  %v6557_v42 = vpop.f32.mrb[64].mxu0 }
 0x1b0   : > { %v1811_v59 = vmul.f32 %v6557_v42, %v6557_v42  ;;  %v6561_v45 = vpop.f32.mrb[65].mxu0 }
 0x1b1   : > { %v1810_v40 = vmul.f32 %v6561_v45, %v6561_v45 }
 0x1b2   : > { %v6566_v22 = vadd.f32 %v1811_v59, %v6313_v53 }
 0x1b3   : > { %v1842_v46 = vadd.f32 %v1810_v40, %v6315_v54  ;;  %v6569_v43 = vpop.f32.mrb[66].mxu0 }
 0x1b4   : > { %v1813_v41 = vmul.f32 %v6569_v43, %v6569_v43  ;;  %v6573_v44 = vpop.f32.mrb[67].mxu0  ;;  %5499 = vrsqrt.f32 %v6566_v22  ;;  %vm1883_vm1 = vcmp.eq.f32.partialorder %v6566_v22, inf  ;;  %vm1885_vm4 = vcmp.eq.f32.partialorder %v6566_v22, 0.0 }
 0x1b5   : > { %v1812_v38 = vmul.f32 %v6573_v44, %v6573_v44  ;;  %5501 = vrsqrt.f32 %v1842_v46  ;;  %vm1876_vm2 = vcmp.eq.f32.partialorder %v1842_v46, inf  ;;  %vm1878_vm3 = vcmp.eq.f32.partialorder %v1842_v46, 0.0 }
 0x1b6   : > { %v6579_v20 = vadd.f32 %v1813_v41, %v6329_v61  ;;  %v2133_v41 = vld [vmem:[%s8215_s3 + $0x18] sm:$0xff] }
 0x1b7   : > { %v6582_v53 = vadd.f32 %v1812_v38, %v6331_v62  ;;  %v6584_v54 = vpop.f32.mrb[68].mxu0  ;;  %v2132_v62 = vld [vmem:[%s8215_s3 + $0x10] sm:$0xff] }
 0x1b8   : > { %8342 = vst [vmem:[#allocation57_spill] sm:$0xff] %v6584_v54  ;;  %v1815_v40 = vmul.f32 %v6584_v54, %v6584_v54  ;;  %v6588_v59 = vpop.f32.mrb[69].mxu0  ;;  %5503 = vrsqrt.f32 %v6579_v20  ;;  %vm1897_vm5 = vcmp.eq.f32.partialorder %v6579_v20, inf  ;;  %vm1899_vm6 = vcmp.eq.f32.partialorder %v6579_v20, 0.0 }
 0x1b9   : > { %8343 = vst [vmem:[#allocation58_spill] sm:$0xff] %v6588_v59  ;;  %v1814_v56 = vmul.f32 %v6588_v59, %v6588_v59  ;;  %5505 = vrsqrt.f32 %v6582_v53  ;;  %vm1890_vm7 = vcmp.eq.f32.partialorder %v6582_v53, inf  ;;  %vm1892_vm8 = vcmp.eq.f32.partialorder %v6582_v53, 0.0 }
 0x1ba   : > { %v6595_v61 = vadd.f32 %v1815_v40, %v6345_v5  ;;  %v6617_v40 = vpack.c.bf16 %v2133_v41, %v2132_v62  ;;  %v1886_v62 = vand.u32 2147483648, %v6566_v22  ;;  %v1893_v2 = vand.u32 2147483648, %v6582_v53 }
 0x1bb   : > { %v6604_v38 = vadd.f32 %v1814_v56, %v6347_v12  ;;  %v6606_v21 = vpop.f32.mrb[70].mxu0 }
 0x1bc   : > { %8344 = vst [vmem:[#allocation59_spill] sm:$0xff] %v6606_v21  ;;  %v1817_v49 = vmul.f32 %v6606_v21, %v6606_v21  ;;  %v6610_v19 = vpop.f32.mrb[71].mxu0  ;;  %5507 = vrsqrt.f32 %v6595_v61  ;;  %vm1911_vm9 = vcmp.eq.f32.partialorder %v6595_v61, inf  ;;  %vm1913_vm11 = vcmp.eq.f32.partialorder %v6595_v61, 0.0 }
 0x1bd   : > { %8345 = vst [vmem:[#allocation60_spill] sm:$0xff] %v6610_v19  ;;  %v1816_v5 = vmul.f32 %v6610_v19, %v6610_v19  ;;  %5509 = vrsqrt.f32 %v6604_v38  ;;  %v1879_v19 = vand.u32 2147483648, %v1842_v46  ;;  %vm1904_vm10 = vcmp.eq.f32.partialorder %v6604_v38, inf }
 0x1be   : > { %v5500_v12 = vpop.eup %5499  ;;  %v6620_v56 = vadd.f32 %v1817_v49, %v6361_v26  ;;  %vm1906_vm12 = vcmp.eq.f32.partialorder %v6604_v38, 0.0 }
 0x1bf   : > { %v5502_v18 = vpop.eup %5501  ;;  %v6624_v21 = vadd.f32 %v1816_v5, %v6363_v48  ;;  %v6626_v16 = vpop.f32.mrb[72].mxu0  ;;  %v1882_v13 = vmul.f32 %v5500_v12, %v6566_v22 }
 0x1c0   : > { %8346 = vst [vmem:[#allocation61_spill] sm:$0xff] %v6626_v16  ;;  %v1819_v41 = vmul.f32 %v6626_v16, %v6626_v16  ;;  %v6632_v26 = vpop.f32.mrb[73].mxu0  ;;  %v1875_v49 = vmul.f32 %v5502_v18, %v1842_v46  ;;  %5511 = vrsqrt.f32 %v6620_v56  ;;  %vm1925_vm13 = vcmp.eq.f32.partialorder %v6620_v56, inf }
 0x1c1   : > { %8347 = vst [vmem:[#allocation62_spill] sm:$0xff] %v6632_v26  ;;  %v1818_v48 = vmul.f32 %v6632_v26, %v6632_v26  ;;  %v1884_v5 = vsel %vm1883_vm1, %v6566_v22, %v1882_v13  ;;  %5513 = vrsqrt.f32 %v6624_v21  ;;  %vm1918_vm14 = vcmp.eq.f32.partialorder %v6624_v21, inf }
 0x1c2   : > { %v5504_v12 = vpop.eup %5503  ;;  %v6644_v16 = vadd.f32 %v1819_v41, %v6377_v60  ;;  %v1877_v18 = vsel %vm1876_vm2, %v1842_v46, %v1875_v49  ;;  %v1887_v49 = vsel %vm1885_vm4, %v1886_v62, %v1884_v5  ;;  %vm1920_vm15 = vcmp.eq.f32.partialorder %v6624_v21, 0.0 }
 0x1c3   : > { %v5506_v59 = vpop.eup %5505  ;;  %v6650_v26 = vadd.f32 %v1818_v48, %v6379_v0  ;;  %v6652_v14 = vpop.f32.mrb[74].mxu0  ;;  %v1880_v13 = vsel %vm1878_vm3, %v1879_v19, %v1877_v18  ;;  %v1896_v54 = vmul.f32 %v5504_v12, %v6579_v20  ;;  %v1900_v48 = vand.u32 2147483648, %v6579_v20 }
 0x1c4   : > { %v1821_v60 = vmul.f32 %v6652_v14, %v6652_v14  ;;  %v6659_v41 = vpop.f32.mrb[75].mxu0  ;;  %5247 = vmatprep.mubr.msk.f32.mxu1 %vm880_vm0, %v1880_v13  ;;  %v1889_v0 = vmul.f32 %v5506_v59, %v6582_v53  ;;  %vm1927_vm1 = vcmp.eq.f32.partialorder %v6620_v56, 0.0  ;;  %vm1939_vm4 = vcmp.eq.f32.partialorder %v6644_v16, inf }
 0x1c5   : > { %v1820_v19 = vmul.f32 %v6659_v41, %v6659_v41  ;;  %5248 = vmatmul.mubr.msk.f32.vlgmr.msra.gmra.mrb[0].mxu1 %vm880_vm0, %v1887_v49  ;;  %v1898_v46 = vsel %vm1897_vm5, %v6579_v20, %v1896_v54  ;;  %5515 = vrsqrt.f32 %v6650_v26  ;;  %vm1932_vm2 = vcmp.eq.f32.partialorder %v6650_v26, inf }
 0x1c6   : > { %v5508_v12 = vpop.eup %5507  ;;  %v6675_v22 = vadd.f32 %v1821_v60, %v6393_v25  ;;  %5426 = vmatpush3.bf16.msra.mxu1 %v6262_v28  ;;  %v1891_v59 = vsel %vm1890_vm7, %v6582_v53, %v1889_v0  ;;  %5517 = vrsqrt.f32 %v6644_v16  ;;  %v1907_v53 = vand.u32 2147483648, %v6604_v38 }
 0x1c7   : > { %v5510_v62 = vpop.eup %5509  ;;  %v6684_v54 = vadd.f32 %v1820_v19, %v6395_v51  ;;  %v6686_v5 = vpop.f32.mrb[76].mxu0  ;;  %v1894_v25 = vsel %vm1892_vm8, %v1893_v2, %v1891_v59  ;;  %v1910_v28 = vmul.f32 %v5508_v12, %v6595_v61  ;;  %5428 = vmatprep.subr.bf16.mxu1 %v6617_v40  ;;  %v1901_v51 = vsel %vm1899_vm6, %v1900_v48, %v1898_v46 }
 0x1c8   : > { %v1823_v18 = vmul.f32 %v6686_v5, %v6686_v5  ;;  %v6695_v13 = vpop.f32.mrb[77].mxu0  ;;  %5250 = vmatprep.mubr.msk.f32.mxu1 %vm880_vm0, %v1894_v25  ;;  %v1903_v60 = vmul.f32 %v5510_v62, %v6604_v38  ;;  %v1914_v0 = vand.u32 2147483648, %v6595_v61  ;;  %vm1934_vm3 = vcmp.eq.f32.partialorder %v6650_v26, 0.0 }
 0x1c9   : > { %v1822_v2 = vmul.f32 %v6695_v13, %v6695_v13  ;;  %5251 = vmatmul.mubr.msk.f32.gmra.mrb[2].mxu1 %vm880_vm0, %v1901_v51  ;;  %v1912_v49 = vsel %vm1911_vm9, %v6595_v61, %v1910_v28  ;;  %5519 = vrsqrt.f32 %v6684_v54  ;;  %vm1941_vm5 = vcmp.eq.f32.partialorder %v6644_v16, 0.0 }
 0x1ca   : > { %v5512_v19 = vpop.eup %5511  ;;  %v6711_v20 = vadd.f32 %v1823_v18, %v6409_v3  ;;  %v1905_v48 = vsel %vm1904_vm10, %v6604_v38, %v1903_v60  ;;  %5430 = vmatpush3.bf16.msra.mxu1 %v6617_v40  ;;  %v1921_v18 = vand.u32 2147483648, %v6624_v21  ;;  %5521 = vrsqrt.f32 %v6675_v22 }
 0x1cb   : > { %v5514_v46 = vpop.eup %5513  ;;  %v6720_v12 = vadd.f32 %v1822_v2, %v6411_v4  ;;  %v6722_v59 = vpop.f32.mrb[78].mxu0  ;;  %v1908_v3 = vsel %vm1906_vm12, %v1907_v53, %v1905_v48  ;;  %v1924_v62 = vmul.f32 %v5512_v19, %v6620_v56  ;;  %v1915_v4 = vsel %vm1913_vm11, %v1914_v0, %v1912_v49 }
 0x1cc   : > { %v1825_v25 = vmul.f32 %v6722_v59, %v6722_v59  ;;  %v6730_v28 = vpop.f32.mrb[79].mxu0  ;;  %5253 = vmatprep.mubr.msk.f32.mxu1 %vm880_vm0, %v1908_v3  ;;  %v1917_v40 = vmul.f32 %v5514_v46, %v6624_v21  ;;  %v1928_v2 = vand.u32 2147483648, %v6620_v56  ;;  %v1935_v46 = vand.u32 2147483648, %v6650_v26 }
 0x1cd   : > { %v1824_v38 = vmul.f32 %v6730_v28, %v6730_v28  ;;  %5254 = vmatmul.mubr.msk.f32.gmra.mrb[4].mxu1 %vm880_vm0, %v1915_v4  ;;  %v1926_v51 = vsel %vm1925_vm13, %v6620_v56, %v1924_v62  ;;  %5523 = vrsqrt.f32 %v6720_v12  ;;  %v1942_v4 = vand.u32 2147483648, %v6644_v16 }
 0x1ce   : > { %v6746_v61 = vadd.f32 %v1825_v25, %v6425_v57  ;;  %v1919_v60 = vsel %vm1918_vm14, %v6624_v21, %v1917_v40  ;;  %v1929_v21 = vsel %vm1927_vm1, %v1928_v2, %v1926_v51  ;;  %5525 = vrsqrt.f32 %v6711_v20 }
 0x1cf   : > { %v5516_v53 = vpop.eup %5515  ;;  %v6752_v49 = vadd.f32 %v1824_v38, %v6427_v23  ;;  %v6754_v0 = vpop.f32.mrb[80].mxu0  ;;  %v1922_v19 = vsel %vm1920_vm15, %v1921_v18, %v1919_v60  ;;  %vm1946_vm6 = vcmp.eq.f32.partialorder %v6684_v54, inf  ;;  %vm1948_vm7 = vcmp.eq.f32.partialorder %v6684_v54, 0.0 }
 0x1d0   : > { %v1827_v57 = vmul.f32 %v6754_v0, %v6754_v0  ;;  %v6760_v48 = vpop.f32.mrb[81].mxu0  ;;  %5256 = vmatprep.mubr.msk.f32.mxu1 %vm880_vm0, %v1922_v19  ;;  %v1931_v56 = vmul.f32 %v5516_v53, %v6650_v26  ;;  %v5518_v3 = vpop.eup %5517  ;;  %vm1953_vm8 = vcmp.eq.f32.partialorder %v6675_v22, inf  ;;  %vm1955_vm9 = vcmp.eq.f32.partialorder %v6675_v22, 0.0 }
 0x1d1   : > { %v1826_v23 = vmul.f32 %v6760_v48, %v6760_v48  ;;  %5257 = vmatmul.mubr.msk.f32.gmra.mrb[6].mxu1 %vm880_vm0, %v1929_v21  ;;  %v1938_v51 = vmul.f32 %v5518_v3, %v6644_v16  ;;  %5527 = vrsqrt.f32 %v6752_v49  ;;  %vm1960_vm10 = vcmp.eq.f32.partialorder %v6720_v12, inf }
 0x1d2   : > { %v6772_v62 = vadd.f32 %v1827_v57, %v6441_v52  ;;  %v1933_v25 = vsel %vm1932_vm2, %v6650_v26, %v1931_v56  ;;  %5529 = vrsqrt.f32 %v6746_v61  ;;  %vm1962_vm11 = vcmp.eq.f32.partialorder %v6720_v12, 0.0 }
 0x1d3   : > { %v6778_v40 = vadd.f32 %v1826_v23, %v6443_v27  ;;  %v6780_v38 = vpop.f32.mrb[82].mxu0  ;;  %v1936_v18 = vsel %vm1934_vm3, %v1935_v46, %v1933_v25  ;;  %v5520_v60 = vpop.eup %5519  ;;  %v1949_v27 = vand.u32 2147483648, %v6684_v54  ;;  %v1940_v53 = vsel %vm1939_vm4, %v6644_v16, %v1938_v51 }
 0x1d4   : > { %v1829_v52 = vmul.f32 %v6780_v38, %v6780_v38  ;;  %v6786_v2 = vpop.f32.mrb[83].mxu0  ;;  %5259 = vmatprep.mubr.msk.f32.mxu1 %vm880_vm0, %v1936_v18  ;;  %v1945_v19 = vmul.f32 %v5520_v60, %v6684_v54  ;;  %v1943_v21 = vsel %vm1941_vm5, %v1942_v4, %v1940_v53  ;;  %v5522_v56 = vpop.eup %5521  ;;  %v1963_v60 = vand.u32 2147483648, %v6720_v12 }
 0x1d5   : > { %v1828_v26 = vmul.f32 %v6786_v2, %v6786_v2  ;;  %5260 = vmatmul.mubr.msk.f32.gmra.mrb[8].mxu1 %vm880_vm0, %v1943_v21  ;;  %5531 = vrsqrt.f32 %v6778_v40  ;;  %vm1967_vm12 = vcmp.eq.f32.partialorder %v6711_v20, inf  ;;  %vm1969_vm13 = vcmp.eq.f32.partialorder %v6711_v20, 0.0 }
 0x1d6   : > { %v6800_v57 = vadd.f32 %v1829_v52, %v6457_v17  ;;  %v1947_v3 = vsel %vm1946_vm6, %v6684_v54, %v1945_v19  ;;  %v1956_v17 = vand.u32 2147483648, %v6675_v22  ;;  %5533 = vrsqrt.f32 %v6772_v62 }
 0x1d7   : > { %v6807_v23 = vadd.f32 %v1828_v26, %v6459_v24  ;;  %v6810_v46 = vpop.f32.mrb[84].mxu0  ;;  %v1950_v4 = vsel %vm1948_vm7, %v1949_v27, %v1947_v3  ;;  %v1952_v24 = vmul.f32 %v5522_v56, %v6675_v22  ;;  %v5524_v18 = vpop.eup %5523  ;;  %vm1974_vm14 = vcmp.eq.f32.partialorder %v6752_v49, inf }
 0x1d8   : > { %v1831_v16 = vmul.f32 %v6810_v46, %v6810_v46  ;;  %v6817_v25 = vpop.f32.mrb[85].mxu0  ;;  %5262 = vmatprep.mubr.msk.f32.mxu1 %vm880_vm0, %v1950_v4  ;;  %v1959_v27 = vmul.f32 %v5524_v18, %v6720_v12  ;;  %v5526_v26 = vpop.eup %5525  ;;  %vm1976_vm15 = vcmp.eq.f32.partialorder %v6752_v49, 0.0  ;;  %vm1981_vm1 = vcmp.eq.f32.partialorder %v6746_v61, inf }
 0x1d9   : > { %v1830_v51 = vmul.f32 %v6817_v25, %v6817_v25  ;;  %v1954_v54 = vsel %vm1953_vm8, %v6675_v22, %v1952_v24  ;;  %v1966_v22 = vmul.f32 %v5526_v26, %v6711_v20  ;;  %5535 = vrsqrt.f32 %v6807_v23 }
 0x1da   : > { %v6830_v52 = vadd.f32 %v1831_v16, %v6473_v15  ;;  %v1957_v19 = vsel %vm1955_vm9, %v1956_v17, %v1954_v54  ;;  %v1970_v15 = vand.u32 2147483648, %v6711_v20  ;;  %v1977_v54 = vand.u32 2147483648, %v6752_v49 }
 0x1db   : > { %v6838_v53 = vadd.f32 %v1830_v51, %v6475_v29  ;;  %v6842_v21 = vpop.f32.mrb[86].mxu0  ;;  %5263 = vmatmul.mubr.msk.f32.gmra.mrb[10].mxu1 %vm880_vm0, %v1957_v19  ;;  %v1961_v29 = vsel %vm1960_vm10, %v6720_v12, %v1959_v27  ;;  %v5528_v17 = vpop.eup %5527  ;;  %v1968_v18 = vsel %vm1967_vm12, %v6711_v20, %v1966_v22  ;;  %5537 = vrsqrt.f32 %v6800_v57 }
 0x1dc   : > { %v1833_v56 = vmul.f32 %v6842_v21, %v6842_v21  ;;  %v6849_v3 = vpop.f32.mrb[87].mxu0  ;;  %v1964_v4 = vsel %vm1962_vm11, %v1963_v60, %v1961_v29  ;;  %v1973_v51 = vmul.f32 %v5528_v17, %v6752_v49  ;;  %v5530_v27 = vpop.eup %5529  ;;  %v1971_v60 = vsel %vm1969_vm13, %v1970_v15, %v1968_v18 }
 0x1dd   : > { %8348 = vst [vmem:[#allocation63_spill] sm:$0xff] %v6849_v3  ;;  %v1832_v16 = vmul.f32 %v6849_v3, %v6849_v3  ;;  %5265 = vmatprep.mubr.msk.f32.mxu1 %vm880_vm0, %v1964_v4  ;;  %v1980_v20 = vmul.f32 %v5530_v27, %v6746_v61  ;;  %vm1983_vm2 = vcmp.eq.f32.partialorder %v6746_v61, 0.0  ;;  %v1984_v22 = vand.u32 2147483648, %v6746_v61 }
 0x1de   : > { %v6863_v24 = vadd.f32 %v1833_v56, %v6489_v1  ;;  %5539 = vrsqrt.f32 %v6838_v53  ;;  %vm1988_vm3 = vcmp.eq.f32.partialorder %v6778_v40, inf  ;;  %vm1990_vm4 = vcmp.eq.f32.partialorder %v6778_v40, 0.0 }
 0x1df   : > { %v6872_v12 = vadd.f32 %v1832_v16, %v6491_v31  ;;  %v6876_v26 = vpop.f32.mrb[88].mxu0  ;;  %5266 = vmatmul.mubr.msk.f32.gmra.mrb[12].mxu1 %vm880_vm0, %v1971_v60  ;;  %v1975_v31 = vsel %vm1974_vm14, %v6752_v49, %v1973_v51  ;;  %v5532_v15 = vpop.eup %5531  ;;  %v1982_v16 = vsel %vm1981_vm1, %v6746_v61, %v1980_v20  ;;  %5541 = vrsqrt.f32 %v6830_v52 }
 0x1e0   : > { %8349 = vst [vmem:[#allocation64_spill] sm:$0xff] %v6876_v26  ;;  %v1835_v1 = vmul.f32 %v6876_v26, %v6876_v26  ;;  %v6883_v19 = vpop.f32.mrb[89].mxu0  ;;  %v1978_v29 = vsel %vm1976_vm15, %v1977_v54, %v1975_v31  ;;  %v1987_v4 = vmul.f32 %v5532_v15, %v6778_v40  ;;  %v5534_v18 = vpop.eup %5533  ;;  %v1985_v49 = vsel %vm1983_vm2, %v1984_v22, %v1982_v16 }
 0x1e1   : > { %8350 = vst [vmem:[#allocation65_spill] sm:$0xff] %v6883_v19  ;;  %v1834_v56 = vmul.f32 %v6883_v19, %v6883_v19  ;;  %5268 = vmatprep.mubr.msk.f32.mxu1 %vm880_vm0, %v1978_v29  ;;  %vm1995_vm5 = vcmp.eq.f32.partialorder %v6772_v62, inf  ;;  %v1998_v20 = vand.u32 2147483648, %v6772_v62  ;;  %vm1997_vm6 = vcmp.eq.f32.partialorder %v6772_v62, 0.0 }
 0x1e2   : > { %v6897_v17 = vadd.f32 %v1835_v1, %v6505_v30  ;;  %v1991_v30 = vand.u32 2147483648, %v6778_v40  ;;  %v1989_v60 = vsel %vm1988_vm3, %v6778_v40, %v1987_v4  ;;  %v1994_v1 = vmul.f32 %v5534_v18, %v6772_v62 }
 0x1e3   : > { %v6904_v51 = vadd.f32 %v1834_v56, %v6507_v33  ;;  %v6906_v54 = vpop.f32.mrb[90].mxu0  ;;  %5269 = vmatmul.mubr.msk.f32.gmra.mrb[14].mxu1 %vm880_vm0, %v1985_v49  ;;  %v5536_v15 = vpop.eup %5535  ;;  %5543 = vrsqrt.f32 %v6872_v12  ;;  %vm2002_vm7 = vcmp.eq.f32.partialorder %v6807_v23, inf  ;;  %vm2004_vm8 = vcmp.eq.f32.partialorder %v6807_v23, 0.0 }
 0x1e4   : > { %8351 = vst [vmem:[#allocation66_spill] sm:$0xff] %v6906_v54  ;;  %v1837_v61 = vmul.f32 %v6906_v54, %v6906_v54  ;;  %v6913_v27 = vpop.f32.mrb[91].mxu0  ;;  %v1992_v31 = vsel %vm1990_vm4, %v1991_v30, %v1989_v60  ;;  %v1996_v40 = vsel %vm1995_vm5, %v6772_v62, %v1994_v1  ;;  %v2001_v4 = vmul.f32 %v5536_v15, %v6807_v23 }
 0x1e5   : > { %8352 = vst [vmem:[#allocation67_spill] sm:$0xff] %v6913_v27  ;;  %v1836_v33 = vmul.f32 %v6913_v27, %v6913_v27  ;;  %5271 = vmatprep.mubr.msk.f32.mxu1 %vm880_vm0, %v1992_v31  ;;  %v1999_v22 = vsel %vm1997_vm6, %v1998_v20, %v1996_v40  ;;  %v2005_v62 = vand.u32 2147483648, %v6807_v23  ;;  %5545 = vrsqrt.f32 %v6863_v24 }
 0x1e6   : > { %v6923_v56 = vadd.f32 %v1837_v61, %v6521_v32  ;;  %v2003_v30 = vsel %vm2002_vm7, %v6807_v23, %v2001_v4  ;;  %vm2009_vm9 = vcmp.eq.f32.partialorder %v6800_v57, inf  ;;  %vm2011_vm10 = vcmp.eq.f32.partialorder %v6800_v57, 0.0 }
 0x1e7   : > { %v6930_v29 = vadd.f32 %v1836_v33, %v6523_v35  ;;  %v6932_v16 = vpop.f32.mrb[92].mxu0  ;;  %5272 = vmatmul.mubr.msk.f32.gmra.mrb[16].mxu1 %vm880_vm0, %v1999_v22  ;;  %v5538_v35 = vpop.eup %5537  ;;  %v2006_v60 = vsel %vm2004_vm8, %v2005_v62, %v2003_v30  ;;  %v2012_v20 = vand.u32 2147483648, %v6800_v57  ;;  %5547 = vrsqrt.f32 %v6904_v51 }
 0x1e8   : > { %8353 = vst [vmem:[#allocation68_spill] sm:$0xff] %v6932_v16  ;;  %v1839_v32 = vmul.f32 %v6932_v16, %v6932_v16  ;;  %v6938_v18 = vpop.f32.mrb[93].mxu0  ;;  %v2008_v1 = vmul.f32 %v5538_v35, %v6800_v57  ;;  %v5540_v33 = vpop.eup %5539  ;;  %5274 = vmatprep.mubr.msk.f32.mxu1 %vm880_vm0, %v2006_v60  ;;  %vm2016_vm11 = vcmp.eq.f32.partialorder %v6838_v53, inf  ;;  %5549 = vrsqrt.f32 %v6897_v17 }
 0x1e9   : > { %8354 = vst [vmem:[#allocation69_spill] sm:$0xff] %v6938_v18  ;;  %v1838_v49 = vmul.f32 %v6938_v18, %v6938_v18  ;;  %v5542_v62 = vpop.eup %5541  ;;  %vm2018_vm12 = vcmp.eq.f32.partialorder %v6838_v53, 0.0  ;;  %5551 = vrsqrt.f32 %v6930_v29  ;;  %vm2023_vm13 = vcmp.eq.f32.partialorder %v6830_v52, inf }
 0x1ea   : > { %v6948_v61 = vadd.f32 %v1839_v32, %v6537_v34  ;;  %v2010_v34 = vsel %vm2009_vm9, %v6800_v57, %v2008_v1  ;;  %v2019_v32 = vand.u32 2147483648, %v6838_v53  ;;  %v2022_v60 = vmul.f32 %v5542_v62, %v6830_v52  ;;  %v3044_v62 = vld [vmem:[%s8218_s6 + $0x8] sm:$0xff] }
 0x1eb   : > { %v6953_v31 = vadd.f32 %v1838_v49, %v6539_v37  ;;  %v6958_v15 = vpop.f32.mrb[94].mxu0  ;;  %v2015_v37 = vmul.f32 %v5540_v33, %v6838_v53  ;;  %v2013_v22 = vsel %vm2011_vm10, %v2012_v20, %v2010_v34  ;;  %5553 = vrsqrt.f32 %v6923_v56 }
 0x1ec   : > { %v1841_v23 = vmul.f32 %v6958_v15, %v6958_v15  ;;  %v6964_v40 = vpop.f32.mrb[95].mxu0  ;;  %5275 = vmatmul.mubr.msk.f32.gmra.mrb[18].mxu1 %vm880_vm0, %v2013_v22  ;;  %vm2025_vm14 = vcmp.eq.f32.partialorder %v6830_v52, 0.0  ;;  %vm2030_vm15 = vcmp.eq.f32.partialorder %v6872_v12, inf  ;;  %v2033_v34 = vand.u32 2147483648, %v6872_v12 }
 0x1ed   : > { %v1840_v4 = vmul.f32 %v6964_v40, %v6964_v40  ;;  %v2017_v35 = vsel %vm2016_vm11, %v6838_v53, %v2015_v37  ;;  %v5544_v1 = vpop.eup %5543  ;;  %v2024_v53 = vsel %vm2023_vm13, %v6830_v52, %v2022_v60  ;;  %vm2032_vm1 = vcmp.eq.f32.partialorder %v6872_v12, 0.0 }
 0x1ee   : > { %v6974_v57 = vadd.f32 %v1841_v23, %v6553_v36  ;;  %v2020_v30 = vsel %vm2018_vm12, %v2019_v32, %v2017_v35  ;;  %v2026_v36 = vand.u32 2147483648, %v6830_v52  ;;  %vm2037_vm2 = vcmp.eq.f32.partialorder %v6863_v24, inf }
 0x1ef   : > { %v6979_v49 = vadd.f32 %v1840_v4, %v6555_v39  ;;  %5277 = vmatprep.mubr.msk.f32.mxu1 %vm880_vm0, %v2020_v30  ;;  %v2029_v39 = vmul.f32 %v5544_v1, %v6872_v12  ;;  %v5546_v33 = vpop.eup %5545  ;;  %v2040_v22 = vand.u32 2147483648, %v6863_v24  ;;  %vm2039_vm3 = vcmp.eq.f32.partialorder %v6863_v24, 0.0 }
 0x1f0   : > { %v2027_v20 = vsel %vm2025_vm14, %v2026_v36, %v2024_v53  ;;  %v2036_v37 = vmul.f32 %v5546_v33, %v6863_v24  ;;  %vm2044_vm4 = vcmp.eq.f32.partialorder %v6904_v51, inf  ;;  %v2047_v1 = vand.u32 2147483648, %v6904_v51 }
 0x1f1   : > { %5555 = vrsqrt.f32 %v6979_v49  ;;  %5278 = vmatmul.mubr.msk.f32.gmra.mrb[20].mxu1 %vm880_vm0, %v2027_v20  ;;  %v2031_v23 = vsel %vm2030_vm15, %v6872_v12, %v2029_v39  ;;  %v5548_v4 = vpop.eup %5547  ;;  %v3043_v12 = vld [vmem:[%s8218_s6] sm:$0xff]  ;;  %vm2046_vm5 = vcmp.eq.f32.partialorder %v6904_v51, 0.0  ;;  %vm2051_vm6 = vcmp.eq.f32.partialorder %v6897_v17, inf }
 0x1f2   : > { %5557 = vrsqrt.f32 %v6953_v31  ;;  %v2034_v52 = vsel %vm2032_vm1, %v2033_v34, %v2031_v23  ;;  %v2038_v32 = vsel %vm2037_vm2, %v6863_v24, %v2036_v37  ;;  %v2043_v30 = vmul.f32 %v5548_v4, %v6904_v51  ;;  %v5550_v60 = vpop.eup %5549 }
 0x1f3   : > { %5559 = vrsqrt.f32 %v6948_v61  ;;  %5280 = vmatprep.mubr.msk.f32.mxu1 %vm880_vm0, %v2034_v52  ;;  %v2041_v35 = vsel %vm2039_vm3, %v2040_v22, %v2038_v32  ;;  %v2050_v36 = vmul.f32 %v5550_v60, %v6897_v17  ;;  %v7025_v53 = vpack.c.bf16 %v3044_v62, %v3043_v12  ;;  %v5552_v39 = vpop.eup %5551 }
 0x1f4   : > { %5561 = vrsqrt.f32 %v6974_v57  ;;  %v2045_v24 = vsel %vm2044_vm4, %v6904_v51, %v2043_v30  ;;  %v2054_v20 = vand.u32 2147483648, %v6897_v17  ;;  %vm2053_vm7 = vcmp.eq.f32.partialorder %v6897_v17, 0.0 }
 0x1f5   : > { %5281 = vmatmul.mubr.msk.f32.gmra.mrb[22].mxu1 %vm880_vm0, %v2041_v35  ;;  %v2048_v33 = vsel %vm2046_vm5, %v2047_v1, %v2045_v24  ;;  %v5554_v34 = vpop.eup %5553  ;;  %v2052_v51 = vsel %vm2051_vm6, %v6897_v17, %v2050_v36  ;;  %v2057_v23 = vmul.f32 %v5552_v39, %v6930_v29  ;;  %vm2058_vm8 = vcmp.eq.f32.partialorder %v6930_v29, inf  ;;  %5432 = vmatprep.subr.bf16.mxu1 %v7025_v53 }
 0x1f6   : > { %5283 = vmatprep.mubr.msk.f32.mxu1 %vm880_vm0, %v2048_v33  ;;  %v2055_v52 = vsel %vm2053_vm7, %v2054_v20, %v2052_v51  ;;  %vm2060_vm9 = vcmp.eq.f32.partialorder %v6930_v29, 0.0  ;;  %v2061_v22 = vand.u32 2147483648, %v6930_v29  ;;  %v2064_v4 = vmul.f32 %v5554_v34, %v6923_v56 }
 0x1f7   : > { %v2059_v12 = vsel %vm2058_vm8, %v6930_v29, %v2057_v23  ;;  %vm2065_vm10 = vcmp.eq.f32.partialorder %v6923_v56, inf  ;;  %vm2067_vm11 = vcmp.eq.f32.partialorder %v6923_v56, 0.0  ;;  %v2068_v30 = vand.u32 2147483648, %v6923_v56 }
 0x1f8   : > { %v2062_v62 = vsel %vm2060_vm9, %v2061_v22, %v2059_v12  ;;  %v2066_v35 = vsel %vm2065_vm10, %v6923_v56, %v2064_v4  ;;  %vm2072_vm12 = vcmp.eq.f32.partialorder %v6953_v31, inf  ;;  %vm2074_vm13 = vcmp.eq.f32.partialorder %v6953_v31, 0.0  ;;  %v2098_v22 = vld [vmem:[%s7076_s14] sm:$0xff]  ;;  %v2100_v12 = vld [vmem:[%s7076_s14 + $0x10] sm:$0xff] }
 0x1f9   : > { %5284 = vmatmul.mubr.msk.f32.gmra.mrb[24].mxu1 %vm880_vm0, %v2055_v52  ;;  %v2075_v29 = vand.u32 2147483648, %v6953_v31  ;;  %vm2086_vm14 = vcmp.eq.f32.partialorder %v6979_v49, inf  ;;  %v2069_v24 = vsel %vm2067_vm11, %v2068_v30, %v2066_v35  ;;  %vm2079_vm15 = vcmp.eq.f32.partialorder %v6948_v61, inf  ;;  %v2104_v35 = vld [vmem:[%s7076_s14 + $0x30] sm:$0xff]  ;;  %v2105_v30 = vld [vmem:[%s7076_s14 + $0x38] sm:$0xff] }
 0x1fa   : > { %5286 = vmatprep.mubr.msk.f32.mxu1 %vm880_vm0, %v2062_v62  ;;  %v2089_v20 = vand.u32 2147483648, %v6979_v49  ;;  %vm2088_vm1 = vcmp.eq.f32.partialorder %v6979_v49, 0.0  ;;  %vm2081_vm2 = vcmp.eq.f32.partialorder %v6948_v61, 0.0  ;;  %vm2093_vm3 = vcmp.eq.f32.partialorder %v6974_v57, inf  ;;  %v2103_v62 = vld [vmem:[%s7076_s14 + $0x28] sm:$0xff] }
 0x1fb   : > { %v5556_v37 = vpop.eup %5555  ;;  %vm2095_vm4 = vcmp.eq.f32.partialorder %v6974_v57, 0.0 }
 0x1fc   : > { %v5558_v32 = vpop.eup %5557  ;;  %v2085_v17 = vmul.f32 %v5556_v37, %v6979_v49 }
 0x1fd   : > { %v2071_v60 = vmul.f32 %v5558_v32, %v6953_v31  ;;  %v5560_v1 = vpop.eup %5559  ;;  %5287 = vmatmul.mubr.msk.f32.gmra.mrb[26].mxu1 %vm880_vm0, %v2069_v24  ;;  %v2099_v32 = vld [vmem:[%s7076_s14 + $0x8] sm:$0xff]  ;;  %v2110_v24 = vld [vmem:[%s7076_s14 + $0x60] sm:$0xff] }
 0x1fe   : > { %v2078_v39 = vmul.f32 %v5560_v1, %v6948_v61  ;;  %v2087_v56 = vsel %vm2086_vm14, %v6979_v49, %v2085_v17  ;;  %v5562_v34 = vpop.eup %5561  ;;  %v2096_v49 = vand.u32 2147483648, %v6974_v57  ;;  %v2101_v17 = vld [vmem:[%s7076_s14 + $0x18] sm:$0xff]  ;;  %v2108_v1 = vld [vmem:[%s7076_s14 + $0x50] sm:$0xff] }
 0x1ff   : > { %v2073_v36 = vsel %vm2072_vm12, %v6953_v31, %v2071_v60  ;;  %v2082_v31 = vand.u32 2147483648, %v6948_v61  ;;  %v2090_v23 = vsel %vm2088_vm1, %v2089_v20, %v2087_v56  ;;  %v2092_v37 = vmul.f32 %v5562_v34, %v6974_v57  ;;  %v2106_v60 = vld [vmem:[%s7076_s14 + $0x40] sm:$0xff]  ;;  %v2113_v56 = vld [vmem:[%s7076_s14 + $0x78] sm:$0xff]  ;;  %v2115_v20 = vld [vmem:[%s7076_s14 + $0x88] sm:$0xff] }
 0x200   : > { %v2076_v33 = vsel %vm2074_vm13, %v2075_v29, %v2073_v36  ;;  %v2080_v51 = vsel %vm2079_vm15, %v6948_v61, %v2078_v39  ;;  %v2109_v29 = vld [vmem:[%s7076_s14 + $0x58] sm:$0xff]  ;;  %v2111_v36 = vld [vmem:[%s7076_s14 + $0x68] sm:$0xff]  ;;  %v2112_v39 = vld [vmem:[%s7076_s14 + $0x70] sm:$0xff] }
 0x201   : > { %5289 = vmatprep.mubr.msk.f32.mxu1 %vm880_vm0, %v2076_v33  ;;  %v2083_v52 = vsel %vm2081_vm2, %v2082_v31, %v2080_v51  ;;  %v2094_v61 = vsel %vm2093_vm3, %v6974_v57, %v2092_v37  ;;  %v2102_v57 = vld [vmem:[%s7076_s14 + $0x20] sm:$0xff]  ;;  %v2116_v34 = vld [vmem:[%s7076_s14 + $0x90] sm:$0xff]  ;;  %v2117_v51 = vld [vmem:[%s7076_s14 + $0x98] sm:$0xff] }
 0x202   : > { %5290 = vmatmul.mubr.msk.f32.gmra.mrb[28].mxu1 %vm880_vm0, %v2083_v52  ;;  %v2097_v4 = vsel %vm2095_vm4, %v2096_v49, %v2094_v61  ;;  %v2114_v33 = vld [vmem:[%s7076_s14 + $0x80] sm:$0xff]  ;;  %v2120_v37 = vld [vmem:[%s7076_s14 + $0xb0] sm:$0xff]  ;;  %v2121_v52 = vld [vmem:[%s7076_s14 + $0xb8] sm:$0xff] }
 0x203   : > { %5292 = vmatprep.mubr.msk.f32.mxu1 %vm880_vm0, %v2090_v23  ;;  %v2118_v31 = vld [vmem:[%s7076_s14 + $0xa0] sm:$0xff]  ;;  %v2119_v23 = vld [vmem:[%s7076_s14 + $0xa8] sm:$0xff] }
 0x204   : > { %v2122_v61 = vld [vmem:[%s7076_s14 + $0xc0] sm:$0xff]  ;;  %v2123_v49 = vld [vmem:[%s7076_s14 + $0xc8] sm:$0xff] }
 0x206   : > { %5293 = vmatmul.mubr.msk.f32.gmra.mrb[30].mxu1 %vm880_vm0, %v2097_v4  ;;  %v2125_v4 = vld [vmem:[%s7076_s14 + $0xd8] sm:$0xff] }
 0x207   : > { %5303 = vmatprep.mubr.msk.f32.mxu1 %vm880_vm0, %v2098_v22  ;;  %v2124_v22 = vld [vmem:[%s7076_s14 + $0xd0] sm:$0xff] }
 0x20a   : > { %5304 = vmatmul.mubr.msk.f32.vlgmr.msra.gmra.mrb[0].mxu1 %vm880_vm0, %v2099_v32  ;;  %v2126_v32 = vld [vmem:[%s7076_s14 + $0xe0] sm:$0xff] }
 0x20b   : > { %5306 = vmatprep.mubr.msk.f32.mxu1 %vm880_vm0, %v2100_v12  ;;  %5434 = vmatpush3.bf16.msra.mxu1 %v7025_v53  ;;  %v2107_v53 = vld [vmem:[%s7076_s14 + $0x48] sm:$0xff] }
 0x20c   : > { %v2127_v12 = vld [vmem:[%s7076_s14 + $0xe8] sm:$0xff] }
 0x20e   : > { %5307 = vmatmul.mubr.msk.f32.gmra.mrb[2].mxu1 %vm880_vm0, %v2101_v17  ;;  %v2128_v17 = vld [vmem:[%s7076_s14 + $0xf0] sm:$0xff] }
 0x20f   : > { %5309 = vmatprep.mubr.msk.f32.mxu1 %vm880_vm0, %v2102_v57  ;;  %v2129_v57 = vld [vmem:[%s7076_s14 + $0xf8] sm:$0xff] }
 0x212   : > { %5310 = vmatmul.mubr.msk.f32.gmra.mrb[4].mxu1 %vm880_vm0, %v2103_v62  ;;  %v3045_v62 = vld [vmem:[%s8218_s6 + $0x10] sm:$0xff] }
 0x213   : > { %5312 = vmatprep.mubr.msk.f32.mxu1 %vm880_vm0, %v2104_v35  ;;  %v3046_v35 = vld [vmem:[%s8218_s6 + $0x18] sm:$0xff] }
 0x216   : > { %5313 = vmatmul.mubr.msk.f32.gmra.mrb[6].mxu1 %vm880_vm0, %v2105_v30  ;;  %v5435_v30 = vpack.c.bf16 %v3046_v35, %v3045_v62 }
 0x217   : > { %5315 = vmatprep.mubr.msk.f32.mxu1 %vm880_vm0, %v2106_v60  ;;  %v7158_v60 = vld [vmem:[%s8217_s5] ss:$0 sm:$0xff] }
 0x218   : > { %5436 = vmatprep.subr.bf16.mxu1 %v5435_v30 }
 0x219   : > { %5438 = vmatpush3.bf16.msra.mxu1 %v5435_v30 }
 0x21a   : > { %5316 = vmatmul.mubr.msk.f32.gmra.mrb[8].mxu1 %vm880_vm0, %v2107_v53 }
 0x21b   : > { %5318 = vmatprep.mubr.msk.f32.mxu1 %vm880_vm0, %v2108_v1 }
 0x21e   : > { %5319 = vmatmul.mubr.msk.f32.gmra.mrb[10].mxu1 %vm880_vm0, %v2109_v29 }
 0x21f   : > { %5321 = vmatprep.mubr.msk.f32.mxu1 %vm880_vm0, %v2110_v24 }
 0x222   : > { %5322 = vmatmul.mubr.msk.f32.gmra.mrb[12].mxu1 %vm880_vm0, %v2111_v36 }
 0x223   : > { %5324 = vmatprep.mubr.msk.f32.mxu1 %vm880_vm0, %v2112_v39 }
 0x226   : > { %5325 = vmatmul.mubr.msk.f32.gmra.mrb[14].mxu1 %vm880_vm0, %v2113_v56 }
 0x227   : > { %5327 = vmatprep.mubr.msk.f32.mxu1 %vm880_vm0, %v2114_v33 }
 0x22a   : > { %5328 = vmatmul.mubr.msk.f32.gmra.mrb[16].mxu1 %vm880_vm0, %v2115_v20 }
 0x22b   : > { %5330 = vmatprep.mubr.msk.f32.mxu1 %vm880_vm0, %v2116_v34 }
 0x22e   : > { %5331 = vmatmul.mubr.msk.f32.gmra.mrb[18].mxu1 %vm880_vm0, %v2117_v51 }
 0x22f   : > { %5333 = vmatprep.mubr.msk.f32.mxu1 %vm880_vm0, %v2118_v31 }
 0x232   : > { %5334 = vmatmul.mubr.msk.f32.gmra.mrb[20].mxu1 %vm880_vm0, %v2119_v23 }
 0x233   : > { %5336 = vmatprep.mubr.msk.f32.mxu1 %vm880_vm0, %v2120_v37 }
 0x236   : > { %5337 = vmatmul.mubr.msk.f32.gmra.mrb[22].mxu1 %vm880_vm0, %v2121_v52 }
 0x237   : > { %5339 = vmatprep.mubr.msk.f32.mxu1 %vm880_vm0, %v2122_v61 }
 0x23a   : > { %5340 = vmatmul.mubr.msk.f32.gmra.mrb[24].mxu1 %vm880_vm0, %v2123_v49 }
 0x23b   : > { %5342 = vmatprep.mubr.msk.f32.mxu1 %vm880_vm0, %v2124_v22 }
 0x23e   : > { %5343 = vmatmul.mubr.msk.f32.gmra.mrb[26].mxu1 %vm880_vm0, %v2125_v4 }
 0x23f   : > { %5345 = vmatprep.mubr.msk.f32.mxu1 %vm880_vm0, %v2126_v32 }
 0x242   : > { %5346 = vmatmul.mubr.msk.f32.gmra.mrb[28].mxu1 %vm880_vm0, %v2127_v12 }
 0x243   : > { %5348 = vmatprep.mubr.msk.f32.mxu1 %vm880_vm0, %v2128_v17 }
 0x246   : > { %5349 = vmatmul.mubr.msk.f32.gmra.mrb[30].mxu1 %vm880_vm0, %v2129_v57 }
 0x2dd   : > { %v5305_v53 = vpop.f32.mrb[0].mxu1 }
 0x2de   : > { %v7161_v1 = vadd.f32 %v5305_v53, %v7158_v60  ;;  %v2621_v29 = vpop.f32.mrb[1].mxu1 }
 0x2df   : > { %v7164_v24 = vadd.f32 %v7158_v60, %v2621_v29 }
 0x2e0   : > { %v4809_v36 = vmul.f32 -1.442695, %v7161_v1 }
 0x2e1   : > { %v4808_v39 = vmul.f32 -1.442695, %v7164_v24  ;;  %v5308_v56 = vpop.f32.mrb[2].mxu1 }
 0x2e2   : > { %5563 = vpow2.f32 %v4809_v36  ;;  %v7169_v33 = vadd.f32 %v5308_v56, %v7158_v60  ;;  %v2631_v20 = vpop.f32.mrb[3].mxu1 }
 0x2e3   : > { %5565 = vpow2.f32 %v4808_v39  ;;  %v7172_v34 = vadd.f32 %v7158_v60, %v2631_v20 }
 0x2e4   : > { %v4811_v51 = vmul.f32 -1.442695, %v7169_v33 }
 0x2e5   : > { %v4810_v31 = vmul.f32 -1.442695, %v7172_v34  ;;  %v5311_v23 = vpop.f32.mrb[4].mxu1 }
 0x2e6   : > { %5567 = vpow2.f32 %v4811_v51  ;;  %v7177_v37 = vadd.f32 %v5311_v23, %v7158_v60  ;;  %v2641_v52 = vpop.f32.mrb[5].mxu1 }
 0x2e7   : > { %5569 = vpow2.f32 %v4810_v31  ;;  %v7180_v61 = vadd.f32 %v7158_v60, %v2641_v52 }
 0x2e8   : > { %v4813_v49 = vmul.f32 -1.442695, %v7177_v37 }
 0x2e9   : > { %v4812_v22 = vmul.f32 -1.442695, %v7180_v61  ;;  %v5314_v4 = vpop.f32.mrb[6].mxu1 }
 0x2ea   : > { %5571 = vpow2.f32 %v4813_v49  ;;  %v7185_v32 = vadd.f32 %v5314_v4, %v7158_v60  ;;  %v2651_v12 = vpop.f32.mrb[7].mxu1 }
 0x2eb   : > { %5573 = vpow2.f32 %v4812_v22  ;;  %v7188_v17 = vadd.f32 %v7158_v60, %v2651_v12 }
 0x2ec   : > { %v5564_v57 = vpop.eup %5563  ;;  %v4815_v62 = vmul.f32 -1.442695, %v7185_v32 }
 0x2ed   : > { %v5566_v35 = vpop.eup %5565  ;;  %v2916_v30 = vadd.f32 1.0, %v5564_v57  ;;  %v4814_v53 = vmul.f32 -1.442695, %v7188_v17  ;;  %v5317_v29 = vpop.f32.mrb[8].mxu1 }
 0x2ee   : > { %v2915_v36 = vadd.f32 1.0, %v5566_v35  ;;  %5575 = vpow2.f32 %v4815_v62  ;;  %v7193_v39 = vadd.f32 %v5317_v29, %v7158_v60  ;;  %v2661_v56 = vpop.f32.mrb[9].mxu1 }
 0x2ef   : > { %5577 = vrcp.f32 %v2916_v30  ;;  %v7196_v20 = vadd.f32 %v7158_v60, %v2661_v56 }
 0x2f0   : > { %v5568_v51 = vpop.eup %5567  ;;  %5579 = vrcp.f32 %v2915_v36  ;;  %v4817_v31 = vmul.f32 -1.442695, %v7193_v39 }
 0x2f1   : > { %v5570_v23 = vpop.eup %5569  ;;  %v2918_v52 = vadd.f32 1.0, %v5568_v51  ;;  %5581 = vpow2.f32 %v4814_v53  ;;  %v4816_v49 = vmul.f32 -1.442695, %v7196_v20  ;;  %v5320_v22 = vpop.f32.mrb[10].mxu1 }
 0x2f2   : > { %v2917_v4 = vadd.f32 1.0, %v5570_v23  ;;  %5583 = vpow2.f32 %v4817_v31  ;;  %v7201_v12 = vadd.f32 %v5320_v22, %v7158_v60  ;;  %v2671_v57 = vpop.f32.mrb[11].mxu1 }
 0x2f3   : > { %5585 = vrcp.f32 %v2918_v52  ;;  %v7204_v62 = vadd.f32 %v7158_v60, %v2671_v57 }
 0x2f4   : > { %v5572_v35 = vpop.eup %5571  ;;  %5587 = vrcp.f32 %v2917_v4  ;;  %v4819_v30 = vmul.f32 -1.442695, %v7201_v12 }
 0x2f5   : > { %v5574_v29 = vpop.eup %5573  ;;  %v2920_v36 = vadd.f32 1.0, %v5572_v35  ;;  %5589 = vpow2.f32 %v4816_v49  ;;  %v4818_v53 = vmul.f32 -1.442695, %v7204_v62  ;;  %v5323_v56 = vpop.f32.mrb[12].mxu1 }
 0x2f6   : > { %v2919_v51 = vadd.f32 1.0, %v5574_v29  ;;  %5591 = vpow2.f32 %v4819_v30  ;;  %v7209_v31 = vadd.f32 %v5323_v56, %v7158_v60  ;;  %v2681_v23 = vpop.f32.mrb[13].mxu1 }
 0x2f7   : > { %5593 = vrcp.f32 %v2920_v36  ;;  %v7212_v52 = vadd.f32 %v7158_v60, %v2681_v23 }
 0x2f8   : > { %v5576_v22 = vpop.eup %5575  ;;  %5595 = vrcp.f32 %v2919_v51  ;;  %v4821_v4 = vmul.f32 -1.442695, %v7209_v31 }
 0x2f9   : > { %v5578_v57 = vpop.eup %5577  ;;  %v2922_v35 = vadd.f32 1.0, %v5576_v22  ;;  %5597 = vpow2.f32 %v4818_v53  ;;  %v4820_v49 = vmul.f32 -1.442695, %v7212_v52  ;;  %v5326_v18 = vpop.f32.mrb[14].mxu1 }
 0x2fa   : > { %v5580_v29 = vpop.eup %5579  ;;  %5599 = vpow2.f32 %v4821_v4  ;;  %v7217_v30 = vadd.f32 %v5326_v18, %v7158_v60  ;;  %v2691_v56 = vpop.f32.mrb[15].mxu1  ;;  %v3012_v27 = vmul.f32 %v5578_v57, %v7161_v1 }
 0x2fb   : > { %v5582_v36 = vpop.eup %5581  ;;  %v3011_v23 = vmul.f32 %v5580_v29, %v7164_v24  ;;  %v7221_v16 = vadd.f32 %v7158_v60, %v2691_v56  ;;  %5601 = vpow2.f32 %v4820_v49 }
 0x2fc   : > { %v5584_v51 = vpop.eup %5583  ;;  %v2921_v22 = vadd.f32 1.0, %v5582_v36  ;;  %v4823_v53 = vmul.f32 -1.442695, %v7217_v30  ;;  %5603 = vrcp.f32 %v2922_v35 }
 0x2fd   : > { %v5586_v54 = vpop.eup %5585  ;;  %v2924_v4 = vadd.f32 1.0, %v5584_v51  ;;  %v4822_v18 = vmul.f32 -1.442695, %v7221_v16  ;;  %v5329_v19 = vpop.f32.mrb[16].mxu1  ;;  %5359 = vmatprep.mubr.msk.f32.mxu1 %vm880_vm0, %v3011_v23 }
 0x2fe   : > { %v5588_v26 = vpop.eup %5587  ;;  %5605 = vrcp.f32 %v2921_v22  ;;  %v7228_v24 = vadd.f32 %v5329_v19, %v7158_v60  ;;  %v2701_v29 = vpop.f32.mrb[17].mxu1  ;;  %5360 = vmatmul.mubr.msk.f32.vlgmr.msra.gmra.mrb[32].mxu1 %vm880_vm0, %v3012_v27  ;;  %v3014_v56 = vmul.f32 %v5586_v54, %v7169_v33 }
 0x2ff   : > { %v5590_v1 = vpop.eup %5589  ;;  %v3013_v57 = vmul.f32 %v5588_v26, %v7172_v34  ;;  %5607 = vrcp.f32 %v2924_v4  ;;  %v7233_v35 = vadd.f32 %v7158_v60, %v2701_v29 }
 0x300   : > { %v5592_v49 = vpop.eup %5591  ;;  %v2923_v36 = vadd.f32 1.0, %v5590_v1  ;;  %5609 = vpow2.f32 %v4823_v53  ;;  %v4825_v23 = vmul.f32 -1.442695, %v7228_v24 }
 0x301   : > { %v5594_v51 = vpop.eup %5593  ;;  %v2926_v19 = vadd.f32 1.0, %v5592_v49  ;;  %5611 = vpow2.f32 %v4822_v18  ;;  %v4824_v22 = vmul.f32 -1.442695, %v7233_v35  ;;  %v5332_v27 = vpop.f32.mrb[18].mxu1  ;;  %5362 = vmatprep.mubr.msk.f32.mxu1 %vm880_vm0, %v3013_v57 }
 0x302   : > { %v5596_v26 = vpop.eup %5595  ;;  %5613 = vrcp.f32 %v2923_v36  ;;  %v7240_v34 = vadd.f32 %v5332_v27, %v7158_v60  ;;  %v2711_v4 = vpop.f32.mrb[19].mxu1  ;;  %5363 = vmatmul.mubr.msk.f32.gmra.mrb[34].mxu1 %vm880_vm0, %v3014_v56  ;;  %v3016_v29 = vmul.f32 %v5594_v51, %v7177_v37 }
 0x303   : > { %v5598_v54 = vpop.eup %5597  ;;  %v3015_v33 = vmul.f32 %v5596_v26, %v7180_v61  ;;  %5615 = vrcp.f32 %v2926_v19  ;;  %v7245_v53 = vadd.f32 %v7158_v60, %v2711_v4 }
 0x304   : > { %v5600_v18 = vpop.eup %5599  ;;  %v2925_v1 = vadd.f32 1.0, %v5598_v54  ;;  %5617 = vpow2.f32 %v4825_v23  ;;  %v4827_v57 = vmul.f32 -1.442695, %v7240_v34 }
 0x305   : > { %v2928_v49 = vadd.f32 1.0, %v5600_v18  ;;  %5619 = vpow2.f32 %v4824_v22  ;;  %v5335_v36 = vpop.f32.mrb[20].mxu1  ;;  %5365 = vmatprep.mubr.msk.f32.mxu1 %vm880_vm0, %v3015_v33  ;;  %v5602_v56 = vpop.eup %5601  ;;  %v4826_v61 = vmul.f32 -1.442695, %v7245_v53 }
 0x306   : > { %5621 = vrcp.f32 %v2925_v1  ;;  %v7252_v19 = vadd.f32 %v5335_v36, %v7158_v60  ;;  %v2721_v27 = vpop.f32.mrb[21].mxu1  ;;  %5366 = vmatmul.mubr.msk.f32.gmra.mrb[36].mxu1 %vm880_vm0, %v3016_v29  ;;  %v5604_v37 = vpop.eup %5603  ;;  %v2927_v23 = vadd.f32 1.0, %v5602_v56 }
 0x307   : > { %5623 = vrcp.f32 %v2928_v49  ;;  %v7256_v51 = vadd.f32 %v7158_v60, %v2721_v27  ;;  %v3018_v29 = vmul.f32 %v5604_v37, %v7185_v32 }
 0x308   : > { %v5606_v22 = vpop.eup %5605  ;;  %5625 = vpow2.f32 %v4827_v57  ;;  %v4829_v26 = vmul.f32 -1.442695, %v7252_v19 }
 0x309   : > { %v5608_v4 = vpop.eup %5607  ;;  %v3017_v54 = vmul.f32 %v5606_v22, %v7188_v17  ;;  %5627 = vrcp.f32 %v2927_v23  ;;  %v4828_v33 = vmul.f32 -1.442695, %v7256_v51  ;;  %v5338_v18 = vpop.f32.mrb[22].mxu1 }
 0x30a   : > { %v5610_v1 = vpop.eup %5609  ;;  %5629 = vpow2.f32 %v4826_v61  ;;  %v7263_v49 = vadd.f32 %v5338_v18, %v7158_v60  ;;  %v2731_v36 = vpop.f32.mrb[23].mxu1 }
 0x30b   : > { %v5612_v56 = vpop.eup %5611  ;;  %v2930_v27 = vadd.f32 1.0, %v5610_v1  ;;  %5631 = vpow2.f32 %v4829_v26  ;;  %5368 = vmatprep.mubr.msk.f32.mxu1 %vm880_vm0, %v3017_v54  ;;  %v7267_v57 = vadd.f32 %v7158_v60, %v2731_v36  ;;  %v3020_v54 = vmul.f32 %v5608_v4, %v7193_v39 }
 0x30c   : > { %v5614_v17 = vpop.eup %5613  ;;  %v2929_v23 = vadd.f32 1.0, %v5612_v56  ;;  %5633 = vpow2.f32 %v4828_v33  ;;  %v4831_v22 = vmul.f32 -1.442695, %v7263_v49  ;;  %5369 = vmatmul.mubr.msk.f32.gmra.mrb[38].mxu1 %vm880_vm0, %v3018_v29 }
 0x30d   : > { %v5616_v32 = vpop.eup %5615  ;;  %v3019_v61 = vmul.f32 %v5614_v17, %v7196_v20  ;;  %5635 = vrcp.f32 %v2930_v27  ;;  %v4830_v37 = vmul.f32 -1.442695, %v7267_v57  ;;  %v5341_v18 = vpop.f32.mrb[24].mxu1 }
 0x30e   : > { %v5618_v26 = vpop.eup %5617  ;;  %5637 = vrcp.f32 %v2929_v23  ;;  %v7275_v1 = vadd.f32 %v5341_v18, %v7158_v60  ;;  %v2741_v36 = vpop.f32.mrb[25].mxu1 }
 0x30f   : > { %v5620_v33 = vpop.eup %5619  ;;  %v2932_v56 = vadd.f32 1.0, %v5618_v26  ;;  %5639 = vpow2.f32 %v4831_v22  ;;  %5371 = vmatprep.mubr.msk.f32.mxu1 %vm880_vm0, %v3019_v61  ;;  %v7279_v29 = vadd.f32 %v7158_v60, %v2741_v36  ;;  %v3022_v61 = vmul.f32 %v5616_v32, %v7201_v12 }
 0x310   : > { %v5622_v20 = vpop.eup %5621  ;;  %v2931_v27 = vadd.f32 1.0, %v5620_v33  ;;  %5641 = vpow2.f32 %v4830_v37  ;;  %v4833_v17 = vmul.f32 -1.442695, %v7275_v1  ;;  %5372 = vmatmul.mubr.msk.f32.gmra.mrb[40].mxu1 %vm880_vm0, %v3020_v54 }
 0x311   : > { %v5624_v39 = vpop.eup %5623  ;;  %v3021_v4 = vmul.f32 %v5622_v20, %v7204_v62  ;;  %5643 = vrcp.f32 %v2932_v56  ;;  %v4832_v23 = vmul.f32 -1.442695, %v7279_v29  ;;  %v5344_v18 = vpop.f32.mrb[26].mxu1 }
 0x312   : > { %v5626_v22 = vpop.eup %5625  ;;  %5645 = vrcp.f32 %v2931_v27  ;;  %v7287_v26 = vadd.f32 %v5344_v18, %v7158_v60  ;;  %v2751_v36 = vpop.f32.mrb[27].mxu1  ;;  %v3024_v32 = vmul.f32 %v5624_v39, %v7209_v31 }
 0x313   : > { %v5628_v37 = vpop.eup %5627  ;;  %v2934_v33 = vadd.f32 1.0, %v5626_v22  ;;  %5647 = vpow2.f32 %v4833_v17  ;;  %5374 = vmatprep.mubr.msk.f32.mxu1 %vm880_vm0, %v3021_v4  ;;  %v7291_v54 = vadd.f32 %v7158_v60, %v2751_v36 }
 0x314   : > { %v5630_v62 = vpop.eup %5629  ;;  %v3023_v56 = vmul.f32 %v5628_v37, %v7212_v52  ;;  %5649 = vpow2.f32 %v4832_v23  ;;  %v4835_v20 = vmul.f32 -1.442695, %v7287_v26  ;;  %5375 = vmatmul.mubr.msk.f32.gmra.mrb[42].mxu1 %vm880_vm0, %v3022_v61 }
 0x315   : > { %v5632_v12 = vpop.eup %5631  ;;  %5651 = vrcp.f32 %v2934_v33  ;;  %v2933_v27 = vadd.f32 1.0, %v5630_v62  ;;  %v5347_v18 = vpop.f32.mrb[28].mxu1  ;;  %v4834_v4 = vmul.f32 -1.442695, %v7291_v54 }
 0x316   : > { %v5634_v17 = vpop.eup %5633  ;;  %v2936_v22 = vadd.f32 1.0, %v5632_v12  ;;  %5653 = vpow2.f32 %v4835_v20  ;;  %v7299_v36 = vadd.f32 %v5347_v18, %v7158_v60  ;;  %5377 = vmatprep.mubr.msk.f32.mxu1 %vm880_vm0, %v3023_v56  ;;  %v2761_v52 = vpop.f32.mrb[29].mxu1 }
 0x317   : > { %v5636_v23 = vpop.eup %5635  ;;  %5655 = vrcp.f32 %v2933_v27  ;;  %v2935_v61 = vadd.f32 1.0, %v5634_v17  ;;  %v7303_v37 = vadd.f32 %v7158_v60, %v2761_v52 }
 0x318   : > { %v5638_v31 = vpop.eup %5637  ;;  %5657 = vrcp.f32 %v2936_v22  ;;  %v4837_v39 = vmul.f32 -1.442695, %v7299_v36  ;;  %5378 = vmatmul.mubr.msk.f32.gmra.mrb[44].mxu1 %vm880_vm0, %v3024_v32  ;;  %v3026_v62 = vmul.f32 %v5636_v23, %v7217_v30 }
 0x319   : > { %v5640_v33 = vpop.eup %5639  ;;  %v3025_v20 = vmul.f32 %v5638_v31, %v7221_v16  ;;  %5659 = vrcp.f32 %v2935_v61  ;;  %v5350_v56 = vpop.f32.mrb[30].mxu1  ;;  %v4836_v27 = vmul.f32 -1.442695, %v7303_v37 }
 0x31a   : > { %v5642_v12 = vpop.eup %5641  ;;  %v2938_v18 = vadd.f32 1.0, %v5640_v33  ;;  %5661 = vpow2.f32 %v4834_v4  ;;  %v7311_v17 = vadd.f32 %v5350_v56, %v7158_v60  ;;  %v2771_v22 = vpop.f32.mrb[31].mxu1 }
 0x31b   : > { %v5644_v52 = vpop.eup %5643  ;;  %v2937_v3 = vadd.f32 1.0, %v5642_v12  ;;  %5663 = vpow2.f32 %v4837_v39  ;;  %5380 = vmatprep.mubr.msk.f32.mxu1 %vm880_vm0, %v3025_v20  ;;  %v7315_v30 = vadd.f32 %v7158_v60, %v2771_v22 }
 0x31c   : > { %v5646_v16 = vpop.eup %5645  ;;  %5665 = vrcp.f32 %v2938_v18  ;;  %v4839_v32 = vmul.f32 -1.442695, %v7311_v17  ;;  %5381 = vmatmul.mubr.msk.f32.gmra.mrb[46].mxu1 %vm880_vm0, %v3026_v62  ;;  %v3028_v31 = vmul.f32 %v5644_v52, %v7228_v24 }
 0x31d   : > { %v5648_v4 = vpop.eup %5647  ;;  %v3027_v23 = vmul.f32 %v5646_v16, %v7233_v35  ;;  %5667 = vrcp.f32 %v2937_v3  ;;  %v4838_v39 = vmul.f32 -1.442695, %v7315_v30 }
 0x31e   : > { %v5650_v61 = vpop.eup %5649  ;;  %v2940_v33 = vadd.f32 1.0, %v5648_v4  ;;  %5669 = vpow2.f32 %v4836_v27 }
 0x31f   : > { %v5652_v20 = vpop.eup %5651  ;;  %v2939_v60 = vadd.f32 1.0, %v5650_v61  ;;  %5671 = vpow2.f32 %v4839_v32  ;;  %5383 = vmatprep.mubr.msk.f32.mxu1 %vm880_vm0, %v3027_v23 }
 0x320   : > { %v5654_v56 = vpop.eup %5653  ;;  %5673 = vrcp.f32 %v2940_v33  ;;  %5384 = vmatmul.mubr.msk.f32.gmra.mrb[48].mxu1 %vm880_vm0, %v3028_v31  ;;  %v3030_v18 = vmul.f32 %v5652_v20, %v7240_v34 }
 0x321   : > { %v5656_v62 = vpop.eup %5655  ;;  %5675 = vrcp.f32 %v2939_v60  ;;  %v2942_v12 = vadd.f32 1.0, %v5654_v56 }
 0x322   : > { %v5658_v35 = vpop.eup %5657  ;;  %v3029_v3 = vmul.f32 %v5656_v62, %v7245_v53  ;;  %5677 = vpow2.f32 %v4838_v39 }
 0x323   : > { %v5660_v24 = vpop.eup %5659  ;;  %5679 = vrcp.f32 %v2942_v12  ;;  %v3032_v23 = vmul.f32 %v5658_v35, %v7252_v19 }
 0x324   : > { %v5662_v27 = vpop.eup %5661  ;;  %v3031_v22 = vmul.f32 %v5660_v24, %v7256_v51  ;;  %5386 = vmatprep.mubr.msk.f32.mxu1 %vm880_vm0, %v3029_v3 }
 0x325   : > { %v5664_v52 = vpop.eup %5663  ;;  %v2941_v16 = vadd.f32 1.0, %v5662_v27  ;;  %5387 = vmatmul.mubr.msk.f32.gmra.mrb[50].mxu1 %vm880_vm0, %v3030_v18 }
 0x326   : > { %v5666_v32 = vpop.eup %5665  ;;  %v2944_v4 = vadd.f32 1.0, %v5664_v52  ;;  %5389 = vmatprep.mubr.msk.f32.mxu1 %vm880_vm0, %v3031_v22 }
 0x327   : > { %v5668_v53 = vpop.eup %5667  ;;  %5681 = vrcp.f32 %v2941_v16  ;;  %v3034_v60 = vmul.f32 %v5666_v32, %v7263_v49 }
 0x328   : > { %v5670_v61 = vpop.eup %5669  ;;  %v3033_v34 = vmul.f32 %v5668_v53, %v7267_v57  ;;  %5683 = vrcp.f32 %v2944_v4 }
 0x329   : > { %v5672_v31 = vpop.eup %5671  ;;  %v2943_v51 = vadd.f32 1.0, %v5670_v61  ;;  %5390 = vmatmul.mubr.msk.f32.gmra.mrb[52].mxu1 %vm880_vm0, %v3032_v23 }
 0x32a   : > { %v5674_v33 = vpop.eup %5673  ;;  %v2946_v39 = vadd.f32 1.0, %v5672_v31  ;;  %5392 = vmatprep.mubr.msk.f32.mxu1 %vm880_vm0, %v3033_v34 }
 0x32b   : > { %v5676_v20 = vpop.eup %5675  ;;  %5685 = vrcp.f32 %v2943_v51  ;;  %v3036_v57 = vmul.f32 %v5674_v33, %v7275_v1 }
 0x32c   : > { %v5678_v56 = vpop.eup %5677  ;;  %v3035_v19 = vmul.f32 %v5676_v20, %v7279_v29  ;;  %5687 = vrcp.f32 %v2946_v39 }
 0x32d   : > { %v2945_v62 = vadd.f32 1.0, %v5678_v56  ;;  %5393 = vmatmul.mubr.msk.f32.gmra.mrb[54].mxu1 %vm880_vm0, %v3034_v60  ;;  %v5680_v35 = vpop.eup %5679 }
 0x32e   : > { %5395 = vmatprep.mubr.msk.f32.mxu1 %vm880_vm0, %v3035_v19  ;;  %v3038_v49 = vmul.f32 %v5680_v35, %v7287_v26 }
 0x32f   : > { %5689 = vrcp.f32 %v2945_v62 }
 0x331   : > { %v5682_v3 = vpop.eup %5681  ;;  %5396 = vmatmul.mubr.msk.f32.gmra.mrb[56].mxu1 %vm880_vm0, %v3036_v57 }
 0x332   : > { %v3037_v12 = vmul.f32 %v5682_v3, %v7291_v54  ;;  %v5684_v24 = vpop.eup %5683 }
 0x333   : > { %v3040_v1 = vmul.f32 %v5684_v24, %v7299_v36 }
 0x334   : > { %5398 = vmatprep.mubr.msk.f32.mxu1 %vm880_vm0, %v3037_v12 }
 0x335   : > { %v5686_v29 = vpop.eup %5685  ;;  %5399 = vmatmul.mubr.msk.f32.gmra.mrb[58].mxu1 %vm880_vm0, %v3038_v49 }
 0x336   : > { %v3039_v18 = vmul.f32 %v5686_v29, %v7303_v37  ;;  %v5688_v27 = vpop.eup %5687  ;;  %v7355_v37 = vld [vmem:[%s8219_s7] ss:$0 sm:$0xff] }
 0x337   : > { %v3042_v26 = vmul.f32 %v5688_v27, %v7311_v17 }
 0x338   : > { %5401 = vmatprep.mubr.msk.f32.mxu1 %vm880_vm0, %v3039_v18 }
 0x339   : > { %v5690_v22 = vpop.eup %5689  ;;  %5402 = vmatmul.mubr.msk.f32.gmra.mrb[60].mxu1 %vm880_vm0, %v3040_v1 }
 0x33a   : > { %v3041_v54 = vmul.f32 %v5690_v22, %v7315_v30 }
 0x33c   : > { %5404 = vmatprep.mubr.msk.f32.mxu1 %vm880_vm0, %v3041_v54 }
 0x33d   : > { %5405 = vmatmul.mubr.msk.f32.gmra.mrb[62].mxu1 %vm880_vm0, %v3042_v26 }
 0x3d1   : > { %v5361_v36 = vpop.f32.mrb[32].mxu1 }
 0x3d2   : > { %v3222_v17 = vadd.f32 %v5361_v36, %v7355_v37  ;;  %v3216_v30 = vpop.f32.mrb[33].mxu1 }
 0x3d3   : > { %v3217_v52 = vadd.f32 %v7355_v37, %v3216_v30 }
 0x3d4   : > { %3376 = vst.msk [vmem:[%s7362_s28 + $0x8] sm:$0xff] %vm880_vm0, %v3222_v17  ;;  %3441 = vrot.lane.b32.xlu0 %v3222_v17, %s5715_s29 }
 0x3d5   : > { %3375 = vst.msk [vmem:[%s7362_s28] sm:$0xff] %vm880_vm0, %v3217_v52  ;;  %v5364_v16 = vpop.f32.mrb[34].mxu1 }
 0x3d6   : > { %v3232_v32 = vadd.f32 %v5364_v16, %v7355_v37  ;;  %v3226_v4 = vpop.f32.mrb[35].mxu1 }
 0x3d7   : > { %v3227_v53 = vadd.f32 %v7355_v37, %v3226_v4 }
 0x3d8   : > { %3378 = vst.msk [vmem:[%s7362_s28 + $0x18] sm:$0xff] %vm880_vm0, %v3232_v32  ;;  %3445 = vrot.lane.b32.xlu1 %v3232_v32, %s5715_s29  ;;  %3439 = vrot.lane.b32.xlu0 %v3217_v52, %s5715_s29 }
 0x3d9   : > { %3377 = vst.msk [vmem:[%s7362_s28 + $0x10] sm:$0xff] %vm880_vm0, %v3227_v53  ;;  %v5367_v23 = vpop.f32.mrb[36].mxu1 }
 0x3da   : > { %v3242_v61 = vadd.f32 %v5367_v23, %v7355_v37  ;;  %v3236_v34 = vpop.f32.mrb[37].mxu1 }
 0x3db   : > { %v3237_v31 = vadd.f32 %v7355_v37, %v3236_v34 }
 0x3dc   : > { %3380 = vst.msk [vmem:[%s7362_s28 + $0x28] sm:$0xff] %vm880_vm0, %v3242_v61  ;;  %3443 = vrot.lane.b32.xlu1 %v3227_v53, %s5715_s29 }
 0x3dd   : > { %3379 = vst.msk [vmem:[%s7362_s28 + $0x20] sm:$0xff] %vm880_vm0, %v3237_v31  ;;  %3447 = vrot.lane.b32.xlu0 %v3237_v31, %s5715_s29 }
 0x3df   : > { %v5370_v51 = vpop.f32.mrb[38].mxu1 }
 0x3e0   : > { %v3252_v33 = vadd.f32 %v5370_v51, %v7355_v37  ;;  %v3246_v39 = vpop.f32.mrb[39].mxu1  ;;  %3449 = vrot.lane.b32.xlu1 %v3242_v61, %s5715_s29 }
 0x3e1   : > { %v3247_v20 = vadd.f32 %v7355_v37, %v3246_v39 }
 0x3e2   : > { %3382 = vst.msk [vmem:[%s7362_s28 + $0x38] sm:$0xff] %vm880_vm0, %v3252_v33 }
 0x3e3   : > { %3381 = vst.msk [vmem:[%s7362_s28 + $0x30] sm:$0xff] %vm880_vm0, %v3247_v20  ;;  %v5373_v60 = vpop.f32.mrb[40].mxu1  ;;  %3451 = vrot.lane.b32.xlu0 %v3247_v20, %s5715_s29 }
 0x3e4   : > { %v3262_v56 = vadd.f32 %v5373_v60, %v7355_v37  ;;  %v3256_v19 = vpop.f32.mrb[41].mxu1  ;;  %3453 = vrot.lane.b32.xlu1 %v3252_v33, %s5715_s29 }
 0x3e5   : > { %v3257_v62 = vadd.f32 %v7355_v37, %v3256_v19 }
 0x3e6   : > { %3384 = vst.msk [vmem:[%s7362_s28 + $0x48] sm:$0xff] %vm880_vm0, %v3262_v56 }
 0x3e7   : > { %3383 = vst.msk [vmem:[%s7362_s28 + $0x40] sm:$0xff] %vm880_vm0, %v3257_v62  ;;  %v5376_v57 = vpop.f32.mrb[42].mxu1  ;;  %3455 = vrot.lane.b32.xlu0 %v3257_v62, %s5715_s29 }
 0x3e8   : > { %v3272_v35 = vadd.f32 %v5376_v57, %v7355_v37  ;;  %v3266_v3 = vpop.f32.mrb[43].mxu1  ;;  %3457 = vrot.lane.b32.xlu1 %v3262_v56, %s5715_s29 }
 0x3e9   : > { %v3267_v12 = vadd.f32 %v7355_v37, %v3266_v3 }
 0x3ea   : > { %3386 = vst.msk [vmem:[%s7362_s28 + $0x58] sm:$0xff] %vm880_vm0, %v3272_v35 }
 0x3eb   : > { %3385 = vst.msk [vmem:[%s7362_s28 + $0x50] sm:$0xff] %vm880_vm0, %v3267_v12  ;;  %v5379_v49 = vpop.f32.mrb[44].mxu1  ;;  %3459 = vrot.lane.b32.xlu0 %v3267_v12, %s5715_s29 }
 0x3ec   : > { %v3282_v24 = vadd.f32 %v5379_v49, %v7355_v37  ;;  %v3276_v29 = vpop.f32.mrb[45].mxu1  ;;  %3461 = vrot.lane.b32.xlu1 %v3272_v35, %s5715_s29 }
 0x3ed   : > { %v3277_v18 = vadd.f32 %v7355_v37, %v3276_v29 }
 0x3ee   : > { %3388 = vst.msk [vmem:[%s7362_s28 + $0x68] sm:$0xff] %vm880_vm0, %v3282_v24 }
 0x3ef   : > { %3387 = vst.msk [vmem:[%s7362_s28 + $0x60] sm:$0xff] %vm880_vm0, %v3277_v18  ;;  %v5382_v1 = vpop.f32.mrb[46].mxu1  ;;  %3463 = vrot.lane.b32.xlu0 %v3277_v18, %s5715_s29 }
 0x3f0   : > { %v3292_v27 = vadd.f32 %v5382_v1, %v7355_v37  ;;  %v3286_v22 = vpop.f32.mrb[47].mxu1  ;;  %3465 = vrot.lane.b32.xlu1 %v3282_v24, %s5715_s29 }
 0x3f1   : > { %v3287_v54 = vadd.f32 %v7355_v37, %v3286_v22 }
 0x3f2   : > { %3390 = vst.msk [vmem:[%s7362_s28 + $0x78] sm:$0xff] %vm880_vm0, %v3292_v27 }
 0x3f3   : > { %3389 = vst.msk [vmem:[%s7362_s28 + $0x70] sm:$0xff] %vm880_vm0, %v3287_v54  ;;  %v5385_v26 = vpop.f32.mrb[48].mxu1  ;;  %3467 = vrot.lane.b32.xlu0 %v3287_v54, %s5715_s29 }
 0x3f4   : > { %v3302_v36 = vadd.f32 %v5385_v26, %v7355_v37  ;;  %v3296_v17 = vpop.f32.mrb[49].mxu1  ;;  %3469 = vrot.lane.b32.xlu1 %v3292_v27, %s5715_s29 }
 0x3f5   : > { %v3297_v30 = vadd.f32 %v7355_v37, %v3296_v17 }
 0x3f6   : > { %3392 = vst.msk [vmem:[%s7362_s28 + $0x88] sm:$0xff] %vm880_vm0, %v3302_v36 }
 0x3f7   : > { %3391 = vst.msk [vmem:[%s7362_s28 + $0x80] sm:$0xff] %vm880_vm0, %v3297_v30  ;;  %3471 = vrot.lane.b32.xlu0 %v3297_v30, %s5715_s29 }
 0x3f8   : > { %v5388_v52 = vpop.f32.mrb[50].mxu1  ;;  %3473 = vrot.lane.b32.xlu1 %v3302_v36, %s5715_s29 }
 0x3f9   : > { %v3312_v16 = vadd.f32 %v5388_v52, %v7355_v37  ;;  %v3306_v32 = vpop.f32.mrb[51].mxu1 }
 0x3fa   : > { %v3307_v4 = vadd.f32 %v7355_v37, %v3306_v32 }
 0x3fb   : > { %3394 = vst.msk [vmem:[%s7362_s28 + $0x98] sm:$0xff] %vm880_vm0, %v3312_v16 }
 0x3fc   : > { %3393 = vst.msk [vmem:[%s7362_s28 + $0x90] sm:$0xff] %vm880_vm0, %v3307_v4  ;;  %v5391_v53 = vpop.f32.mrb[52].mxu1  ;;  %3475 = vrot.lane.b32.xlu0 %v3307_v4, %s5715_s29  ;;  %3477 = vrot.lane.b32.xlu1 %v3312_v16, %s5715_s29 }
 0x3fd   : > { %v3322_v23 = vadd.f32 %v5391_v53, %v7355_v37  ;;  %v3316_v61 = vpop.f32.mrb[53].mxu1 }
 0x3fe   : > { %v3317_v34 = vadd.f32 %v7355_v37, %v3316_v61 }
 0x3ff   : > { %3396 = vst.msk [vmem:[%s7362_s28 + $0xa8] sm:$0xff] %vm880_vm0, %v3322_v23 }
 0x400   : > { %3395 = vst.msk [vmem:[%s7362_s28 + $0xa0] sm:$0xff] %vm880_vm0, %v3317_v34  ;;  %v5394_v31 = vpop.f32.mrb[54].mxu1  ;;  %3479 = vrot.lane.b32.xlu0 %v3317_v34, %s5715_s29  ;;  %3481 = vrot.lane.b32.xlu1 %v3322_v23, %s5715_s29 }
 0x401   : > { %v3332_v51 = vadd.f32 %v5394_v31, %v7355_v37  ;;  %v3326_v33 = vpop.f32.mrb[55].mxu1 }
 0x402   : > { %v3327_v39 = vadd.f32 %v7355_v37, %v3326_v33 }
 0x403   : > { %3398 = vst.msk [vmem:[%s7362_s28 + $0xb8] sm:$0xff] %vm880_vm0, %v3332_v51 }
 0x404   : > { %3397 = vst.msk [vmem:[%s7362_s28 + $0xb0] sm:$0xff] %vm880_vm0, %v3327_v39  ;;  %v5397_v20 = vpop.f32.mrb[56].mxu1  ;;  %3483 = vrot.lane.b32.xlu0 %v3327_v39, %s5715_s29  ;;  %3485 = vrot.lane.b32.xlu1 %v3332_v51, %s5715_s29 }
 0x405   : > { %v3342_v60 = vadd.f32 %v5397_v20, %v7355_v37  ;;  %v3336_v56 = vpop.f32.mrb[57].mxu1 }
 0x406   : > { %v3337_v19 = vadd.f32 %v7355_v37, %v3336_v56  ;;  %v8357_v56 = vld [vmem:[#allocation30_spill] sm:$0xff] }
 0x407   : > { %3400 = vst.msk [vmem:[%s7362_s28 + $0xc8] sm:$0xff] %vm880_vm0, %v3342_v60 }
 0x408   : > { %3399 = vst.msk [vmem:[%s7362_s28 + $0xc0] sm:$0xff] %vm880_vm0, %v3337_v19  ;;  %v5400_v62 = vpop.f32.mrb[58].mxu1  ;;  %3487 = vrot.lane.b32.xlu0 %v3337_v19, %s5715_s29  ;;  %3489 = vrot.lane.b32.xlu1 %v3342_v60, %s5715_s29 }
 0x409   : > { %v3352_v57 = vadd.f32 %v5400_v62, %v7355_v37  ;;  %v3346_v35 = vpop.f32.mrb[59].mxu1 }
 0x40a   : > { %v3347_v3 = vadd.f32 %v7355_v37, %v3346_v35  ;;  %v8359_v35 = vld [vmem:[#allocation58_spill] sm:$0xff] }
 0x40b   : > { %3402 = vst.msk [vmem:[%s7362_s28 + $0xd8] sm:$0xff] %vm880_vm0, %v3352_v57 }
 0x40c   : > { %3401 = vst.msk [vmem:[%s7362_s28 + $0xd0] sm:$0xff] %vm880_vm0, %v3347_v3  ;;  %v5403_v12 = vpop.f32.mrb[60].mxu1  ;;  %3491 = vrot.lane.b32.xlu0 %v3347_v3, %s5715_s29  ;;  %3493 = vrot.lane.b32.xlu1 %v3352_v57, %s5715_s29 }
 0x40d   : > { %v3362_v49 = vadd.f32 %v5403_v12, %v7355_v37  ;;  %v3356_v24 = vpop.f32.mrb[61].mxu1 }
 0x40e   : > { %v3357_v29 = vadd.f32 %v7355_v37, %v3356_v24  ;;  %v8360_v24 = vld [vmem:[#allocation31_spill] sm:$0xff] }
 0x40f   : > { %3404 = vst.msk [vmem:[%s7362_s28 + $0xe8] sm:$0xff] %vm880_vm0, %v3362_v49 }
 0x410   : > { %3403 = vst.msk [vmem:[%s7362_s28 + $0xe0] sm:$0xff] %vm880_vm0, %v3357_v29  ;;  %3495 = vrot.lane.b32.xlu0 %v3357_v29, %s5715_s29  ;;  %v5406_v18 = vpop.f32.mrb[62].mxu1  ;;  %3497 = vrot.lane.b32.xlu1 %v3362_v49, %s5715_s29 }
 0x411   : > { %v3372_v1 = vadd.f32 %v5406_v18, %v7355_v37  ;;  %v3366_v27 = vpop.f32.mrb[63].mxu1  ;;  %v8361_v18 = vld [vmem:[#allocation5_spill] sm:$0xff] }
 0x412   : > { %v3367_v22 = vadd.f32 %v7355_v37, %v3366_v27 }
 0x413   : > { %3406 = vst.msk [vmem:[%s7362_s28 + $0xf8] sm:$0xff] %vm880_vm0, %v3372_v1 }
 0x414   : > { %3405 = vst.msk [vmem:[%s7362_s28 + $0xf0] sm:$0xff] %vm880_vm0, %v3367_v22  ;;  %3499 = vrot.lane.b32.xlu0 %v3367_v22, %s5715_s29  ;;  %3501 = vrot.lane.b32.xlu1 %v3372_v1, %s5715_s29  ;;  %vm4015_vm0 = vcmask 130048  }
 0x446   : > { %v3442_v54 = vpop.permute.xlu0 %3441 }
 0x447   : > { %v3536_v26 = vmul.f32 %v6216_v6, %v3442_v54  ;;  %v3568_v30 = vmul.f32 %v6301_v47, %v3442_v54  ;;  %v3600_v32 = vmul.f32 %v6557_v42, %v3442_v54  ;;  %v8362_v54 = vld [vmem:[#allocation59_spill] sm:$0xff] }
 0x449   : > { %3729 = vrot.lane.b32.xlu1 %v3536_v26, %s5716_s21 }
 0x44a   : > { %v3446_v36 = vpop.permute.xlu1 %3445  ;;  %v3440_v17 = vpop.permute.xlu0 %3439 }
 0x44b   : > { %v3535_v37 = vmul.f32 %v3440_v17, %v6218_v7  ;;  %v3567_v4 = vmul.f32 %v3440_v17, %v6307_v50  ;;  %v3538_v53 = vmul.f32 %v6220_v8, %v3446_v36  ;;  %v3599_v47 = vmul.f32 %v3440_v17, %v6561_v45 }
 0x44c   : > { %v3570_v61 = vmul.f32 %v6317_v55, %v3446_v36  ;;  %v3602_v8 = vmul.f32 %v6569_v43, %v3446_v36  ;;  %v8363_v36 = vld [vmem:[#allocation32_spill] sm:$0xff] }
 0x44d   : > { %3793 = vrot.lane.b32.xlu1 %v3568_v30, %s5716_s21  ;;  %3727 = vrot.lane.b32.xlu0 %v3535_v37, %s5716_s21 }
 0x44e   : > { %v3444_v52 = vpop.permute.xlu1 %3443 }
 0x44f   : > { %v3448_v16 = vpop.permute.xlu0 %3447  ;;  %v3537_v42 = vmul.f32 %v3444_v52, %v6222_v9  ;;  %v3569_v45 = vmul.f32 %v3444_v52, %v6323_v58  ;;  %v3601_v51 = vmul.f32 %v3444_v52, %v6573_v44  ;;  %v8356_v44 = vld [vmem:[#allocation57_spill] sm:$0xff]  ;;  %v8364_v52 = vld [vmem:[#allocation6_spill] sm:$0xff] }
 0x450   : > { %v3539_v39 = vmul.f32 %v3448_v16, %v6226_v11  ;;  %v3571_v19 = vmul.f32 %v3448_v16, %v8357_v56  ;;  %v8358_v11 = vld [vmem:[#allocation4_spill] sm:$0xff]  ;;  %v3603_v3 = vmul.f32 %v3448_v16, %v8359_v35  ;;  %v8372_v35 = vld [vmem:[#allocation35_spill] sm:$0xff] }
 0x451   : > { %3857 = vrot.lane.b32.xlu1 %v3600_v32, %s5716_s21  ;;  %3791 = vrot.lane.b32.xlu0 %v3567_v4, %s5716_s21  ;;  %v8365_v32 = vld [vmem:[#allocation60_spill] sm:$0xff] }
 0x452   : > { %v3450_v6 = vpop.permute.xlu1 %3449 }
 0x453   : > { %v3540_v9 = vmul.f32 %v6224_v10, %v3450_v6  ;;  %v3572_v58 = vmul.f32 %v6333_v63, %v3450_v6  ;;  %v3604_v60 = vmul.f32 %v8356_v44, %v3450_v6 }
 0x455   : > { %v3452_v7 = vpop.permute.xlu0 %3451  ;;  %3733 = vrot.lane.b32.xlu1 %v3538_v53, %s5716_s21  ;;  %3855 = vrot.lane.b32.xlu0 %v3599_v47, %s5716_s21  ;;  %v8366_v47 = vld [vmem:[#allocation33_spill] sm:$0xff] }
 0x456   : > { %v3454_v23 = vpop.permute.xlu1 %3453  ;;  %v3541_v1 = vmul.f32 %v3452_v7, %v8361_v18  ;;  %v3573_v17 = vmul.f32 %v3452_v7, %v8363_v36  ;;  %v3605_v4 = vmul.f32 %v3452_v7, %v8365_v32  ;;  %v8374_v18 = vld [vmem:[#allocation29_spill] sm:$0xff]  ;;  %v8376_v36 = vld [vmem:[#allocation28_spill] sm:$0xff] }
 0x457   : > { %v3542_v57 = vmul.f32 %v8358_v11, %v3454_v23  ;;  %v3574_v29 = vmul.f32 %v8360_v24, %v3454_v23  ;;  %v3606_v26 = vmul.f32 %v8362_v54, %v3454_v23  ;;  %v8373_v24 = vld [vmem:[#allocation9_spill] sm:$0xff]  ;;  %v8375_v54 = vld [vmem:[#allocation56_spill] sm:$0xff] }
 0x459   : > { %v7508_v50 = vpop.permute.xlu0 %3455  ;;  %3797 = vrot.lane.b32.xlu1 %v3570_v61, %s5716_s21  ;;  %3731 = vrot.lane.b32.xlu0 %v3537_v42, %s5716_s21  ;;  %v8367_v61 = vld [vmem:[#allocation7_spill] sm:$0xff] }
 0x45a   : > { %v3458_v34 = vpop.permute.xlu1 %3457  ;;  %v3543_v42 = vmul.f32 %v7508_v50, %v8367_v61 }
 0x45b   : > { %v3544_v16 = vmul.f32 %v8364_v52, %v3458_v34  ;;  %v3576_v23 = vmul.f32 %v8366_v47, %v3458_v34  ;;  %v8377_v52 = vld [vmem:[#allocation55_spill] sm:$0xff]  ;;  %v8378_v47 = vld [vmem:[#allocation36_spill] sm:$0xff] }
 0x45d   : > { %v7514_v31 = vpop.permute.xlu0 %3459  ;;  %3861 = vrot.lane.b32.xlu1 %v3602_v8, %s5716_s21  ;;  %3795 = vrot.lane.b32.xlu0 %v3569_v45, %s5716_s21  ;;  %v8368_v45 = vld [vmem:[#allocation61_spill] sm:$0xff] }
 0x45e   : > { %v7518_v55 = vpop.permute.xlu1 %3461 }
 0x461   : > { %v7522_v33 = vpop.permute.xlu0 %3463  ;;  %3737 = vrot.lane.b32.xlu1 %v3540_v9, %s5716_s21  ;;  %3859 = vrot.lane.b32.xlu0 %v3601_v51, %s5716_s21  ;;  %v3608_v9 = vmul.f32 %v8368_v45, %v3458_v34  ;;  %v8369_v51 = vld [vmem:[#allocation34_spill] sm:$0xff] }
 0x462   : > { %v7526_v43 = vpop.permute.xlu1 %3465 }
 0x465   : > { %v7530_v20 = vpop.permute.xlu0 %3467  ;;  %3801 = vrot.lane.b32.xlu1 %v3572_v58, %s5716_s21  ;;  %3735 = vrot.lane.b32.xlu0 %v3539_v39, %s5716_s21  ;;  %v3575_v58 = vmul.f32 %v7508_v50, %v8369_v51  ;;  %v8382_v51 = vld [vmem:[#allocation38_spill] sm:$0xff] }
 0x466   : > { %v7534_v10 = vpop.permute.xlu1 %3469 }
 0x469   : > { %v7538_v62 = vpop.permute.xlu0 %3471  ;;  %3865 = vrot.lane.b32.xlu1 %v3604_v60, %s5716_s21  ;;  %3799 = vrot.lane.b32.xlu0 %v3571_v19, %s5716_s21  ;;  %v8370_v60 = vld [vmem:[#allocation8_spill] sm:$0xff]  ;;  %v8371_v19 = vld [vmem:[#allocation62_spill] sm:$0xff] }
 0x46a   : > { %v7542_v63 = vpop.permute.xlu1 %3473  ;;  %v3546_v56 = vmul.f32 %v8370_v60, %v7518_v55  ;;  %v3607_v11 = vmul.f32 %v7508_v50, %v8371_v19  ;;  %v3611_v60 = vmul.f32 %v7522_v33, %v6695_v13 }
 0x46d   : > { %3741 = vrot.lane.b32.xlu1 %v3542_v57, %s5716_s21  ;;  %3863 = vrot.lane.b32.xlu0 %v3603_v3, %s5716_s21  ;;  %v3578_v3 = vmul.f32 %v8372_v35, %v7518_v55  ;;  %v3613_v35 = vmul.f32 %v7530_v20, %v6730_v28 }
 0x46e   : > { %v7548_v12 = vpop.permute.xlu0 %3475  ;;  %v7550_v49 = vpop.permute.xlu1 %3477 }
 0x471   : > { %3805 = vrot.lane.b32.xlu1 %v3574_v29, %s5716_s21  ;;  %3739 = vrot.lane.b32.xlu0 %v3541_v1, %s5716_s21  ;;  %v3545_v29 = vmul.f32 %v7514_v31, %v8373_v24 }
 0x472   : > { %v7556_v27 = vpop.permute.xlu0 %3479  ;;  %v7558_v22 = vpop.permute.xlu1 %3481 }
 0x475   : > { %3869 = vrot.lane.b32.xlu1 %v3606_v26, %s5716_s21  ;;  %3803 = vrot.lane.b32.xlu0 %v3573_v17, %s5716_s21 }
 0x476   : > { %v7564_v30 = vpop.permute.xlu0 %3483  ;;  %v7566_v37 = vpop.permute.xlu1 %3485 }
 0x479   : > { %3745 = vrot.lane.b32.xlu1 %v3544_v16, %s5716_s21  ;;  %3867 = vrot.lane.b32.xlu0 %v3605_v4, %s5716_s21  ;;  %v3610_v4 = vmul.f32 %v6652_v14, %v7518_v55  ;;  %v8381_v55 = vld [vmem:[#allocation11_spill] sm:$0xff] }
 0x47a   : > { %v7572_v6 = vpop.permute.xlu0 %3487  ;;  %v7574_v53 = vpop.permute.xlu1 %3489  ;;  %v3547_v45 = vmul.f32 %v7522_v33, %v8381_v55  ;;  %v8396_v55 = vld [vmem:[#allocation45_spill] sm:$0xff] }
 0x47d   : > { %3809 = vrot.lane.b32.xlu1 %v3576_v23, %s5716_s21  ;;  %3743 = vrot.lane.b32.xlu0 %v3543_v42, %s5716_s21  ;;  %v8379_v23 = vld [vmem:[#allocation10_spill] sm:$0xff]  ;;  %v8380_v42 = vld [vmem:[#allocation37_spill] sm:$0xff] }
 0x47e   : > { %v7581_v8 = vpop.permute.xlu0 %3491  ;;  %v7583_v7 = vpop.permute.xlu1 %3493  ;;  %v3548_v61 = vmul.f32 %v8379_v23, %v7526_v43  ;;  %v3580_v14 = vmul.f32 %v8380_v42, %v7526_v43 }
 0x481   : > { %3873 = vrot.lane.b32.xlu1 %v3608_v9, %s5716_s21  ;;  %3807 = vrot.lane.b32.xlu0 %v3575_v58, %s5716_s21  ;;  %v3612_v9 = vmul.f32 %v6686_v5, %v7526_v43  ;;  %v8385_v43 = vld [vmem:[#allocation13_spill] sm:$0xff] }
 0x482   : > { %v7590_v39 = vpop.permute.xlu0 %3495  ;;  %v7592_v44 = vpop.permute.xlu1 %3497  ;;  %v3549_v19 = vmul.f32 %v7530_v20, %v8385_v43 }
 0x485   : > { %3749 = vrot.lane.b32.xlu1 %v3546_v56, %s5716_s21  ;;  %3871 = vrot.lane.b32.xlu0 %v3607_v11, %s5716_s21  ;;  %v8384_v56 = vld [vmem:[#allocation39_spill] sm:$0xff]  ;;  %v3614_v11 = vmul.f32 %v6722_v59, %v7534_v10 }
 0x486   : > { %v3500_v34 = vpop.permute.xlu0 %3499  ;;  %v3502_v57 = vpop.permute.xlu1 %3501  ;;  %v3582_v5 = vmul.f32 %v8384_v56, %v7534_v10 }
 0x487   : > { %v7605_v1 = vmul.f32 %v3500_v34, %v8374_v18  ;;  %v7608_v26 = vmul.f32 %v3500_v34, %v8375_v54  ;;  %v7611_v50 = vmul.f32 %v3500_v34, %v6964_v40  ;;  %v7614_v17 = vmul.f32 %v8376_v36, %v3502_v57  ;;  %v8386_v34 = vld [vmem:[#allocation40_spill] sm:$0xff]  ;;  %v8390_v18 = vld [vmem:[#allocation42_spill] sm:$0xff] }
 0x488   : > { %v7617_v16 = vmul.f32 %v8377_v52, %v3502_v57  ;;  %v7620_v32 = vmul.f32 %v6958_v15, %v3502_v57  ;;  %v3577_v40 = vmul.f32 %v7514_v31, %v8378_v47  ;;  %v3609_v15 = vmul.f32 %v7514_v31, %v6659_v41  ;;  %v8383_v31 = vld [vmem:[#allocation12_spill] sm:$0xff]  ;;  %v8393_v52 = vld [vmem:[#allocation17_spill] sm:$0xff] }
 0x489   : > { %3813 = vrot.lane.b32.xlu1 %v3578_v3, %s5716_s21  ;;  %3747 = vrot.lane.b32.xlu0 %v3545_v29, %s5716_s21  ;;  %v3579_v41 = vmul.f32 %v7522_v33, %v8382_v51  ;;  %v3550_v58 = vmul.f32 %v8383_v31, %v7534_v10  ;;  %v3581_v13 = vmul.f32 %v7530_v20, %v8386_v34  ;;  %v8387_v33 = vld [vmem:[#allocation14_spill] sm:$0xff]  ;;  %v8388_v3 = vld [vmem:[#allocation41_spill] sm:$0xff]  ;;  %v8389_v10 = vld [vmem:[#allocation15_spill] sm:$0xff] }
 0x48a   : > { %v3552_v57 = vmul.f32 %v8387_v33, %v7542_v63  ;;  %v3584_v59 = vmul.f32 %v8388_v3, %v7542_v63  ;;  %v3551_v24 = vmul.f32 %v7538_v62, %v8389_v10  ;;  %v3616_v29 = vmul.f32 %v6754_v0, %v7542_v63  ;;  %v8391_v20 = vld [vmem:[#allocation16_spill] sm:$0xff]  ;;  %v8392_v0 = vld [vmem:[#allocation43_spill] sm:$0xff]  ;;  %v8398_v31 = vld [vmem:[#allocation46_spill] sm:$0xff] }
 0x48b   : > { %v3583_v28 = vmul.f32 %v7538_v62, %v8390_v18  ;;  %v3554_v54 = vmul.f32 %v8391_v20, %v7550_v49  ;;  %v3615_v36 = vmul.f32 %v7538_v62, %v6760_v48  ;;  %v3586_v63 = vmul.f32 %v8392_v0, %v7550_v49  ;;  %v8394_v48 = vld [vmem:[#allocation44_spill] sm:$0xff]  ;;  %v8407_v0 = vld [vmem:[#allocation50_spill] sm:$0xff] }
 0x48c   : > { %v3585_v62 = vmul.f32 %v7548_v12, %v8394_v48  ;;  %v8409_v48 = vld [vmem:[#allocation65_spill] sm:$0xff] }
 0x48d   : > { %3877 = vrot.lane.b32.xlu1 %v3610_v4, %s5716_s21  ;;  %3811 = vrot.lane.b32.xlu0 %v3577_v40, %s5716_s21  ;;  %v3553_v4 = vmul.f32 %v7548_v12, %v8393_v52  ;;  %v3618_v40 = vmul.f32 %v6780_v38, %v7550_v49  ;;  %v8395_v38 = vld [vmem:[#allocation18_spill] sm:$0xff]  ;;  %v8408_v52 = vld [vmem:[#allocation64_spill] sm:$0xff] }
 0x48e   : > { %v3556_v49 = vmul.f32 %v8395_v38, %v7558_v22 }
 0x491   : > { %3753 = vrot.lane.b32.xlu1 %v3548_v61, %s5716_s21  ;;  %3875 = vrot.lane.b32.xlu0 %v3609_v15, %s5716_s21  ;;  %v3617_v15 = vmul.f32 %v7548_v12, %v6786_v2 }
 0x495   : > { %3817 = vrot.lane.b32.xlu1 %v3580_v14, %s5716_s21  ;;  %3751 = vrot.lane.b32.xlu0 %v3547_v45, %s5716_s21  ;;  %v3588_v45 = vmul.f32 %v8396_v55, %v7558_v22 }
 0x499   : > { %3881 = vrot.lane.b32.xlu1 %v3612_v9, %s5716_s21  ;;  %3815 = vrot.lane.b32.xlu0 %v3579_v41, %s5716_s21  ;;  %v8397_v9 = vld [vmem:[#allocation19_spill] sm:$0xff]  ;;  %v3620_v41 = vmul.f32 %v6810_v46, %v7558_v22  ;;  %v3619_v46 = vmul.f32 %v7556_v27, %v6817_v25  ;;  %v8400_v22 = vld [vmem:[#allocation21_spill] sm:$0xff]  ;;  %v8402_v25 = vld [vmem:[#allocation48_spill] sm:$0xff] }
 0x49a   : > { %v3555_v51 = vmul.f32 %v7556_v27, %v8397_v9 }
 0x49d   : > { %3757 = vrot.lane.b32.xlu1 %v3550_v58, %s5716_s21  ;;  %3879 = vrot.lane.b32.xlu0 %v3611_v60, %s5716_s21  ;;  %v3587_v58 = vmul.f32 %v7556_v27, %v8398_v31  ;;  %v8399_v60 = vld [vmem:[#allocation20_spill] sm:$0xff]  ;;  %v3589_v27 = vmul.f32 %v7564_v30, %v8402_v25  ;;  %v8415_v31 = vld [vmem:[#allocation67_spill] sm:$0xff] }
 0x49e   : > { %v3558_v56 = vmul.f32 %v8399_v60, %v7566_v37  ;;  %v8416_v60 = vld [vmem:[#allocation26_spill] sm:$0xff] }
 0x4a1   : > { %3821 = vrot.lane.b32.xlu1 %v3582_v5, %s5716_s21  ;;  %3755 = vrot.lane.b32.xlu0 %v3549_v19, %s5716_s21  ;;  %v3557_v19 = vmul.f32 %v7564_v30, %v8400_v22 }
 0x4a5   : > { %3885 = vrot.lane.b32.xlu1 %v3614_v11, %s5716_s21  ;;  %3819 = vrot.lane.b32.xlu0 %v3581_v13, %s5716_s21  ;;  %v8401_v11 = vld [vmem:[#allocation47_spill] sm:$0xff] }
 0x4a6   : > { %v3590_v34 = vmul.f32 %v8401_v11, %v7566_v37 }
 0x4a9   : > { %3761 = vrot.lane.b32.xlu1 %v3552_v57, %s5716_s21  ;;  %3883 = vrot.lane.b32.xlu0 %v3613_v35, %s5716_s21  ;;  %v3622_v57 = vmul.f32 %v6842_v21, %v7566_v37  ;;  %v8405_v37 = vld [vmem:[#allocation23_spill] sm:$0xff] }
 0x4ad   : > { %3825 = vrot.lane.b32.xlu1 %v3584_v59, %s5716_s21  ;;  %3759 = vrot.lane.b32.xlu0 %v3551_v24, %s5716_s21  ;;  %v8403_v59 = vld [vmem:[#allocation63_spill] sm:$0xff]  ;;  %v8404_v24 = vld [vmem:[#allocation22_spill] sm:$0xff] }
 0x4ae   : > { %v3621_v10 = vmul.f32 %v7564_v30, %v8403_v59  ;;  %v8406_v30 = vld [vmem:[#allocation49_spill] sm:$0xff] }
 0x4af   : > { %v3592_v20 = vmul.f32 %v8406_v30, %v7574_v53 }
 0x4b1   : > { %3889 = vrot.lane.b32.xlu1 %v3616_v29, %s5716_s21  ;;  %3823 = vrot.lane.b32.xlu0 %v3583_v28, %s5716_s21  ;;  %v3560_v29 = vmul.f32 %v8404_v24, %v7574_v53  ;;  %v3559_v28 = vmul.f32 %v7572_v6, %v8405_v37 }
 0x4b5   : > { %3765 = vrot.lane.b32.xlu1 %v3554_v54, %s5716_s21  ;;  %3887 = vrot.lane.b32.xlu0 %v3615_v36, %s5716_s21 }
 0x4b9   : > { %3829 = vrot.lane.b32.xlu1 %v3586_v63, %s5716_s21  ;;  %3763 = vrot.lane.b32.xlu0 %v3553_v4, %s5716_s21  ;;  %v3591_v63 = vmul.f32 %v7572_v6, %v8407_v0  ;;  %v3624_v4 = vmul.f32 %v8408_v52, %v7574_v53 }
 0x4bb   : > { %v3730_v47 = vpop.permute.xlu1 %3729 }
 0x4bc   : > { %4017 = vst.msk [vmem:[%s7701_s27 + $0x8] sm:$0xff] %vm4015_vm0, %v3730_v47 }
 0x4bd   : > { %3893 = vrot.lane.b32.xlu1 %v3618_v40, %s5716_s21  ;;  %3827 = vrot.lane.b32.xlu0 %v3585_v62, %s5716_s21  ;;  %v3623_v62 = vmul.f32 %v7572_v6, %v8409_v48  ;;  %v8412_v6 = vld [vmem:[#allocation51_spill] sm:$0xff] }
 0x4bf   : > { %v3794_v23 = vpop.permute.xlu1 %3793  ;;  %v3728_v61 = vpop.permute.xlu0 %3727 }
 0x4c0   : > { %4049 = vst.msk [vmem:[%s7701_s27 + $0x108] sm:$0xff] %vm4015_vm0, %v3794_v23  ;;  %4016 = vst.msk [vmem:[%s7701_s27] sm:$0xff] %vm4015_vm0, %v3728_v61  ;;  %v8410_v23 = vld [vmem:[#allocation24_spill] sm:$0xff] }
 0x4c1   : > { %3769 = vrot.lane.b32.xlu1 %v3556_v49, %s5716_s21  ;;  %3891 = vrot.lane.b32.xlu0 %v3617_v15, %s5716_s21  ;;  %v3562_v61 = vmul.f32 %v8410_v23, %v7583_v7  ;;  %v8411_v49 = vld [vmem:[#allocation25_spill] sm:$0xff] }
 0x4c2   : > { %v3561_v15 = vmul.f32 %v7581_v8, %v8411_v49 }
 0x4c3   : > { %v3858_v42 = vpop.permute.xlu1 %3857  ;;  %v3792_v14 = vpop.permute.xlu0 %3791 }
 0x4c4   : > { %4081 = vst.msk [vmem:[%s7701_s27 + $0x208] sm:$0xff] %vm4015_vm0, %v3858_v42  ;;  %4048 = vst.msk [vmem:[%s7701_s27 + $0x100] sm:$0xff] %vm4015_vm0, %v3792_v14  ;;  %v3594_v42 = vmul.f32 %v8412_v6, %v7583_v7 }
 0x4c5   : > { %3833 = vrot.lane.b32.xlu1 %v3588_v45, %s5716_s21  ;;  %3767 = vrot.lane.b32.xlu0 %v3555_v51, %s5716_s21  ;;  %v8413_v45 = vld [vmem:[#allocation52_spill] sm:$0xff]  ;;  %v8414_v51 = vld [vmem:[#allocation66_spill] sm:$0xff] }
 0x4c6   : > { %v3593_v9 = vmul.f32 %v7581_v8, %v8413_v45 }
 0x4c7   : > { %v3734_v2 = vpop.permute.xlu1 %3733  ;;  %v3856_v12 = vpop.permute.xlu0 %3855 }
 0x4c8   : > { %4019 = vst.msk [vmem:[%s7701_s27 + $0x18] sm:$0xff] %vm4015_vm0, %v3734_v2  ;;  %4080 = vst.msk [vmem:[%s7701_s27 + $0x200] sm:$0xff] %vm4015_vm0, %v3856_v12  ;;  %v3626_v2 = vmul.f32 %v8414_v51, %v7583_v7 }
 0x4c9   : > { %3897 = vrot.lane.b32.xlu1 %v3620_v41, %s5716_s21  ;;  %3831 = vrot.lane.b32.xlu0 %v3587_v58, %s5716_s21  ;;  %v3625_v58 = vmul.f32 %v7581_v8, %v8415_v31  ;;  %v8418_v8 = vld [vmem:[#allocation53_spill] sm:$0xff] }
 0x4ca   : > { %v3596_v22 = vmul.f32 %v8418_v8, %v7592_v44 }
 0x4cb   : > { %v3798_v5 = vpop.permute.xlu1 %3797  ;;  %v3732_v43 = vpop.permute.xlu0 %3731 }
 0x4cc   : > { %4051 = vst.msk [vmem:[%s7701_s27 + $0x118] sm:$0xff] %vm4015_vm0, %v3798_v5  ;;  %4018 = vst.msk [vmem:[%s7701_s27 + $0x10] sm:$0xff] %vm4015_vm0, %v3732_v43  ;;  %v8417_v43 = vld [vmem:[#allocation27_spill] sm:$0xff] }
 0x4cd   : > { %3773 = vrot.lane.b32.xlu1 %v3558_v56, %s5716_s21  ;;  %3895 = vrot.lane.b32.xlu0 %v3619_v46, %s5716_s21  ;;  %v3564_v56 = vmul.f32 %v8416_v60, %v7592_v44  ;;  %v3563_v46 = vmul.f32 %v7590_v39, %v8417_v43 }
 0x4cf   : > { %v3862_v13 = vpop.permute.xlu1 %3861  ;;  %v3796_v33 = vpop.permute.xlu0 %3795 }
 0x4d0   : > { %4083 = vst.msk [vmem:[%s7701_s27 + $0x218] sm:$0xff] %vm4015_vm0, %v3862_v13  ;;  %4050 = vst.msk [vmem:[%s7701_s27 + $0x110] sm:$0xff] %vm4015_vm0, %v3796_v33  ;;  %v8420_v33 = vld [vmem:[#allocation68_spill] sm:$0xff] }
 0x4d1   : > { %3837 = vrot.lane.b32.xlu1 %v3590_v34, %s5716_s21  ;;  %3771 = vrot.lane.b32.xlu0 %v3557_v19, %s5716_s21  ;;  %v8419_v34 = vld [vmem:[#allocation54_spill] sm:$0xff]  ;;  %v3628_v25 = vmul.f32 %v8420_v33, %v7592_v44 }
 0x4d2   : > { %v3595_v13 = vmul.f32 %v7590_v39, %v8419_v34 }
 0x4d3   : > { %v3738_v35 = vpop.permute.xlu1 %3737  ;;  %v3860_v3 = vpop.permute.xlu0 %3859 }
 0x4d4   : > { %4021 = vst.msk [vmem:[%s7701_s27 + $0x28] sm:$0xff] %vm4015_vm0, %v3738_v35  ;;  %4082 = vst.msk [vmem:[%s7701_s27 + $0x210] sm:$0xff] %vm4015_vm0, %v3860_v3  ;;  %v8421_v35 = vld [vmem:[#allocation69_spill] sm:$0xff] }
 0x4d5   : > { %3901 = vrot.lane.b32.xlu1 %v3622_v57, %s5716_s21  ;;  %3835 = vrot.lane.b32.xlu0 %v3589_v27, %s5716_s21  ;;  %v3627_v3 = vmul.f32 %v7590_v39, %v8421_v35 }
 0x4d7   : > { %v3802_v18 = vpop.permute.xlu1 %3801  ;;  %v3736_v21 = vpop.permute.xlu0 %3735 }
 0x4d8   : > { %4053 = vst.msk [vmem:[%s7701_s27 + $0x128] sm:$0xff] %vm4015_vm0, %v3802_v18  ;;  %4020 = vst.msk [vmem:[%s7701_s27 + $0x20] sm:$0xff] %vm4015_vm0, %v3736_v21 }
 0x4d9   : > { %3777 = vrot.lane.b32.xlu1 %v3560_v29, %s5716_s21  ;;  %3899 = vrot.lane.b32.xlu0 %v3621_v10, %s5716_s21 }
 0x4db   : > { %v3866_v54 = vpop.permute.xlu1 %3865  ;;  %v3800_v36 = vpop.permute.xlu0 %3799 }
 0x4dc   : > { %4085 = vst.msk [vmem:[%s7701_s27 + $0x228] sm:$0xff] %vm4015_vm0, %v3866_v54  ;;  %4052 = vst.msk [vmem:[%s7701_s27 + $0x120] sm:$0xff] %vm4015_vm0, %v3800_v36 }
 0x4dd   : > { %3841 = vrot.lane.b32.xlu1 %v3592_v20, %s5716_s21  ;;  %3775 = vrot.lane.b32.xlu0 %v3559_v28, %s5716_s21 }
 0x4df   : > { %v3742_v47 = vpop.permute.xlu1 %3741  ;;  %v3864_v40 = vpop.permute.xlu0 %3863 }
 0x4e0   : > { %4023 = vst.msk [vmem:[%s7701_s27 + $0x38] sm:$0xff] %vm4015_vm0, %v3742_v47  ;;  %4084 = vst.msk [vmem:[%s7701_s27 + $0x220] sm:$0xff] %vm4015_vm0, %v3864_v40 }
 0x4e1   : > { %3905 = vrot.lane.b32.xlu1 %v3624_v4, %s5716_s21  ;;  %3839 = vrot.lane.b32.xlu0 %v3591_v63, %s5716_s21 }
 0x4e3   : > { %v3806_v38 = vpop.permute.xlu1 %3805  ;;  %v3740_v53 = vpop.permute.xlu0 %3739 }
 0x4e4   : > { %4055 = vst.msk [vmem:[%s7701_s27 + $0x138] sm:$0xff] %vm4015_vm0, %v3806_v38  ;;  %4022 = vst.msk [vmem:[%s7701_s27 + $0x30] sm:$0xff] %vm4015_vm0, %v3740_v53 }
 0x4e5   : > { %3781 = vrot.lane.b32.xlu1 %v3562_v61, %s5716_s21  ;;  %3903 = vrot.lane.b32.xlu0 %v3623_v62, %s5716_s21 }
 0x4e7   : > { %v3870_v14 = vpop.permute.xlu1 %3869  ;;  %v3804_v55 = vpop.permute.xlu0 %3803 }
 0x4e8   : > { %4087 = vst.msk [vmem:[%s7701_s27 + $0x238] sm:$0xff] %vm4015_vm0, %v3870_v14  ;;  %4054 = vst.msk [vmem:[%s7701_s27 + $0x130] sm:$0xff] %vm4015_vm0, %v3804_v55 }
 0x4e9   : > { %3845 = vrot.lane.b32.xlu1 %v3594_v42, %s5716_s21  ;;  %3779 = vrot.lane.b32.xlu0 %v3561_v15, %s5716_s21 }
 0x4eb   : > { %v3746_v12 = vpop.permute.xlu1 %3745  ;;  %v3868_v41 = vpop.permute.xlu0 %3867 }
 0x4ec   : > { %4025 = vst.msk [vmem:[%s7701_s27 + $0x48] sm:$0xff] %vm4015_vm0, %v3746_v12  ;;  %4086 = vst.msk [vmem:[%s7701_s27 + $0x230] sm:$0xff] %vm4015_vm0, %v3868_v41 }
 0x4ed   : > { %3909 = vrot.lane.b32.xlu1 %v3626_v2, %s5716_s21  ;;  %3843 = vrot.lane.b32.xlu0 %v3593_v9, %s5716_s21 }
 0x4ef   : > { %v3810_v5 = vpop.permute.xlu1 %3809  ;;  %v3744_v7 = vpop.permute.xlu0 %3743 }
 0x4f0   : > { %4057 = vst.msk [vmem:[%s7701_s27 + $0x148] sm:$0xff] %vm4015_vm0, %v3810_v5  ;;  %4024 = vst.msk [vmem:[%s7701_s27 + $0x40] sm:$0xff] %vm4015_vm0, %v3744_v7 }
 0x4f1   : > { %3785 = vrot.lane.b32.xlu1 %v3564_v56, %s5716_s21  ;;  %3907 = vrot.lane.b32.xlu0 %v3625_v58, %s5716_s21 }
 0x4f3   : > { %v3874_v19 = vpop.permute.xlu1 %3873  ;;  %v3808_v11 = vpop.permute.xlu0 %3807 }
 0x4f4   : > { %4089 = vst.msk [vmem:[%s7701_s27 + $0x248] sm:$0xff] %vm4015_vm0, %v3874_v19  ;;  %4056 = vst.msk [vmem:[%s7701_s27 + $0x140] sm:$0xff] %vm4015_vm0, %v3808_v11 }
 0x4f5   : > { %3849 = vrot.lane.b32.xlu1 %v3596_v22, %s5716_s21  ;;  %3783 = vrot.lane.b32.xlu0 %v3563_v46, %s5716_s21 }
 0x4f7   : > { %v3750_v27 = vpop.permute.xlu1 %3749  ;;  %v3872_v57 = vpop.permute.xlu0 %3871 }
 0x4f8   : > { %4027 = vst.msk [vmem:[%s7701_s27 + $0x58] sm:$0xff] %vm4015_vm0, %v3750_v27  ;;  %4088 = vst.msk [vmem:[%s7701_s27 + $0x240] sm:$0xff] %vm4015_vm0, %v3872_v57 }
 0x4f9   : > { %3913 = vrot.lane.b32.xlu1 %v3628_v25, %s5716_s21  ;;  %3847 = vrot.lane.b32.xlu0 %v3595_v13, %s5716_s21 }
 0x4fb   : > { %v3814_v59 = vpop.permute.xlu1 %3813  ;;  %v3748_v10 = vpop.permute.xlu0 %3747 }
 0x4fc   : > { %4059 = vst.msk [vmem:[%s7701_s27 + $0x158] sm:$0xff] %vm4015_vm0, %v3814_v59  ;;  %4026 = vst.msk [vmem:[%s7701_s27 + $0x50] sm:$0xff] %vm4015_vm0, %v3748_v10  ;;  %v4348_v10 = vld [vmem:[%s7701_s27] sm:$0xff] (%p5798_p5) }
 0x4fd   : > { %3789 = vrot.lane.b32.xlu1 %v7614_v17, %s5716_s21  ;;  %3911 = vrot.lane.b32.xlu0 %v3627_v3, %s5716_s21  ;;  %4349 = vst [vmem:[%s8011_s18] sm:$0xff] (%p5798_p5), %v4348_v10  ;;  %v4476_v10 = vld [vmem:[%s7701_s27 + $0x200] sm:$0xff] (%p5798_p5) }
 0x4fe   : > { %4477 = vst [vmem:[%s8011_s18 + $0x400] sm:$0xff] (%p5798_p5), %v4476_v10 }
 0x4ff   : > { %v3878_v44 = vpop.permute.xlu1 %3877  ;;  %v3812_v24 = vpop.permute.xlu0 %3811 }
 0x500   : > { %4091 = vst.msk [vmem:[%s7701_s27 + $0x258] sm:$0xff] %vm4015_vm0, %v3878_v44  ;;  %4058 = vst.msk [vmem:[%s7701_s27 + $0x150] sm:$0xff] %vm4015_vm0, %v3812_v24  ;;  %v4350_v44 = vld [vmem:[%s7701_s27 + $0x8] sm:$0xff] (%p5798_p5)  ;;  %v4352_v24 = vld [vmem:[%s7701_s27 + $0x10] sm:$0xff] (%p5798_p5) }
 0x501   : > { %3853 = vrot.lane.b32.xlu1 %v7617_v16, %s5716_s21  ;;  %3787 = vrot.lane.b32.xlu0 %v7605_v1, %s5716_s21  ;;  %4351 = vst [vmem:[%s8011_s18 + $0x8] sm:$0xff] (%p5798_p5), %v4350_v44  ;;  %4353 = vst [vmem:[%s8011_s18 + $0x10] sm:$0xff] (%p5798_p5), %v4352_v24 }
 0x502   : > { %v4478_v44 = vld [vmem:[%s7701_s27 + $0x208] sm:$0xff] (%p5798_p5)  ;;  %v4480_v24 = vld [vmem:[%s7701_s27 + $0x210] sm:$0xff] (%p5798_p5) }
 0x503   : > { %v3754_v39 = vpop.permute.xlu1 %3753  ;;  %v3876_v17 = vpop.permute.xlu0 %3875  ;;  %4479 = vst [vmem:[%s8011_s18 + $0x408] sm:$0xff] (%p5798_p5), %v4478_v44  ;;  %4481 = vst [vmem:[%s8011_s18 + $0x410] sm:$0xff] (%p5798_p5), %v4480_v24 }
 0x504   : > { %4029 = vst.msk [vmem:[%s7701_s27 + $0x68] sm:$0xff] %vm4015_vm0, %v3754_v39  ;;  %4090 = vst.msk [vmem:[%s7701_s27 + $0x250] sm:$0xff] %vm4015_vm0, %v3876_v17  ;;  %v4354_v39 = vld [vmem:[%s7701_s27 + $0x18] sm:$0xff] (%p5798_p5)  ;;  %v4356_v17 = vld [vmem:[%s7701_s27 + $0x20] sm:$0xff] (%p5798_p5) }
 0x505   : > { %3917 = vrot.lane.b32.xlu1 %v7620_v32, %s5716_s21  ;;  %3851 = vrot.lane.b32.xlu0 %v7608_v26, %s5716_s21  ;;  %4355 = vst [vmem:[%s8011_s18 + $0x18] sm:$0xff] (%p5798_p5), %v4354_v39  ;;  %4357 = vst [vmem:[%s8011_s18 + $0x20] sm:$0xff] (%p5798_p5), %v4356_v17 }
 0x506   : > { %v4482_v39 = vld [vmem:[%s7701_s27 + $0x218] sm:$0xff] (%p5798_p5)  ;;  %v4484_v17 = vld [vmem:[%s7701_s27 + $0x220] sm:$0xff] (%p5798_p5) }
 0x507   : > { %v3818_v16 = vpop.permute.xlu1 %3817  ;;  %v3752_v29 = vpop.permute.xlu0 %3751  ;;  %4483 = vst [vmem:[%s8011_s18 + $0x418] sm:$0xff] (%p5798_p5), %v4482_v39  ;;  %4485 = vst [vmem:[%s8011_s18 + $0x420] sm:$0xff] (%p5798_p5), %v4484_v17 }
 0x508   : > { %4061 = vst.msk [vmem:[%s7701_s27 + $0x168] sm:$0xff] %vm4015_vm0, %v3818_v16  ;;  %4028 = vst.msk [vmem:[%s7701_s27 + $0x60] sm:$0xff] %vm4015_vm0, %v3752_v29  ;;  %v4358_v16 = vld [vmem:[%s7701_s27 + $0x28] sm:$0xff] (%p5798_p5)  ;;  %v4360_v29 = vld [vmem:[%s7701_s27 + $0x30] sm:$0xff] (%p5798_p5) }
 0x509   : > { %3915 = vrot.lane.b32.xlu0 %v7611_v50, %s5716_s21  ;;  %4359 = vst [vmem:[%s8011_s18 + $0x28] sm:$0xff] (%p5798_p5), %v4358_v16  ;;  %4361 = vst [vmem:[%s8011_s18 + $0x30] sm:$0xff] (%p5798_p5), %v4360_v29  ;;  %v4486_v16 = vld [vmem:[%s7701_s27 + $0x228] sm:$0xff] (%p5798_p5) }
 0x50a   : > { %v4488_v29 = vld [vmem:[%s7701_s27 + $0x230] sm:$0xff] (%p5798_p5)  ;;  %4487 = vst [vmem:[%s8011_s18 + $0x428] sm:$0xff] (%p5798_p5), %v4486_v16 }
 0x50b   : > { %v3882_v1 = vpop.permute.xlu1 %3881  ;;  %v3816_v18 = vpop.permute.xlu0 %3815  ;;  %4489 = vst [vmem:[%s8011_s18 + $0x430] sm:$0xff] (%p5798_p5), %v4488_v29 }
 0x50c   : > { %4093 = vst.msk [vmem:[%s7701_s27 + $0x268] sm:$0xff] %vm4015_vm0, %v3882_v1  ;;  %4060 = vst.msk [vmem:[%s7701_s27 + $0x160] sm:$0xff] %vm4015_vm0, %v3816_v18  ;;  %v4362_v1 = vld [vmem:[%s7701_s27 + $0x38] sm:$0xff] (%p5798_p5)  ;;  %v4364_v18 = vld [vmem:[%s7701_s27 + $0x40] sm:$0xff] (%p5798_p5) }
 0x50d   : > { %4363 = vst [vmem:[%s8011_s18 + $0x38] sm:$0xff] (%p5798_p5), %v4362_v1  ;;  %4365 = vst [vmem:[%s8011_s18 + $0x40] sm:$0xff] (%p5798_p5), %v4364_v18  ;;  %v4490_v1 = vld [vmem:[%s7701_s27 + $0x238] sm:$0xff] (%p5798_p5)  ;;  %v4492_v18 = vld [vmem:[%s7701_s27 + $0x240] sm:$0xff] (%p5798_p5) }
 0x50e   : > { %4491 = vst [vmem:[%s8011_s18 + $0x438] sm:$0xff] (%p5798_p5), %v4490_v1  ;;  %4493 = vst [vmem:[%s8011_s18 + $0x440] sm:$0xff] (%p5798_p5), %v4492_v18 }
 0x50f   : > { %v3758_v26 = vpop.permute.xlu1 %3757  ;;  %v3880_v32 = vpop.permute.xlu0 %3879 }
 0x510   : > { %4031 = vst.msk [vmem:[%s7701_s27 + $0x78] sm:$0xff] %vm4015_vm0, %v3758_v26  ;;  %4092 = vst.msk [vmem:[%s7701_s27 + $0x260] sm:$0xff] %vm4015_vm0, %v3880_v32  ;;  %v4366_v26 = vld [vmem:[%s7701_s27 + $0x48] sm:$0xff] (%p5798_p5)  ;;  %v4368_v32 = vld [vmem:[%s7701_s27 + $0x50] sm:$0xff] (%p5798_p5) }
 0x511   : > { %4367 = vst [vmem:[%s8011_s18 + $0x48] sm:$0xff] (%p5798_p5), %v4366_v26  ;;  %4369 = vst [vmem:[%s8011_s18 + $0x50] sm:$0xff] (%p5798_p5), %v4368_v32  ;;  %v4494_v26 = vld [vmem:[%s7701_s27 + $0x248] sm:$0xff] (%p5798_p5)  ;;  %v4496_v32 = vld [vmem:[%s7701_s27 + $0x250] sm:$0xff] (%p5798_p5) }
 0x512   : > { %4495 = vst [vmem:[%s8011_s18 + $0x448] sm:$0xff] (%p5798_p5), %v4494_v26  ;;  %4497 = vst [vmem:[%s8011_s18 + $0x450] sm:$0xff] (%p5798_p5), %v4496_v32 }
 0x513   : > { %v3822_v21 = vpop.permute.xlu1 %3821  ;;  %v3756_v37 = vpop.permute.xlu0 %3755 }
 0x514   : > { %4063 = vst.msk [vmem:[%s7701_s27 + $0x178] sm:$0xff] %vm4015_vm0, %v3822_v21  ;;  %4030 = vst.msk [vmem:[%s7701_s27 + $0x70] sm:$0xff] %vm4015_vm0, %v3756_v37  ;;  %v4370_v21 = vld [vmem:[%s7701_s27 + $0x58] sm:$0xff] (%p5798_p5)  ;;  %v4372_v37 = vld [vmem:[%s7701_s27 + $0x60] sm:$0xff] (%p5798_p5) }
 0x515   : > { %4371 = vst [vmem:[%s8011_s18 + $0x58] sm:$0xff] (%p5798_p5), %v4370_v21  ;;  %4373 = vst [vmem:[%s8011_s18 + $0x60] sm:$0xff] (%p5798_p5), %v4372_v37  ;;  %v4498_v21 = vld [vmem:[%s7701_s27 + $0x258] sm:$0xff] (%p5798_p5) }
 0x516   : > { %4499 = vst [vmem:[%s8011_s18 + $0x458] sm:$0xff] (%p5798_p5), %v4498_v21 }
 0x517   : > { %v3886_v50 = vpop.permute.xlu1 %3885  ;;  %v3820_v28 = vpop.permute.xlu0 %3819  ;;  %v4500_v37 = vld [vmem:[%s7701_s27 + $0x260] sm:$0xff] (%p5798_p5) }
 0x518   : > { %4095 = vst.msk [vmem:[%s7701_s27 + $0x278] sm:$0xff] %vm4015_vm0, %v3886_v50  ;;  %4062 = vst.msk [vmem:[%s7701_s27 + $0x170] sm:$0xff] %vm4015_vm0, %v3820_v28  ;;  %v4374_v50 = vld [vmem:[%s7701_s27 + $0x68] sm:$0xff] (%p5798_p5) }
 0x519   : > { %4375 = vst [vmem:[%s8011_s18 + $0x68] sm:$0xff] (%p5798_p5), %v4374_v50  ;;  %v4502_v50 = vld [vmem:[%s7701_s27 + $0x268] sm:$0xff] (%p5798_p5)  ;;  %4501 = vst [vmem:[%s8011_s18 + $0x460] sm:$0xff] (%p5798_p5), %v4500_v37 }
 0x51a   : > { %4503 = vst [vmem:[%s8011_s18 + $0x468] sm:$0xff] (%p5798_p5), %v4502_v50 }
 0x51b   : > { %v3762_v30 = vpop.permute.xlu1 %3761  ;;  %v3884_v20 = vpop.permute.xlu0 %3883  ;;  %v4376_v28 = vld [vmem:[%s7701_s27 + $0x70] sm:$0xff] (%p5798_p5) }
 0x51c   : > { %4033 = vst.msk [vmem:[%s7701_s27 + $0x88] sm:$0xff] %vm4015_vm0, %v3762_v30  ;;  %4094 = vst.msk [vmem:[%s7701_s27 + $0x270] sm:$0xff] %vm4015_vm0, %v3884_v20  ;;  %v4378_v30 = vld [vmem:[%s7701_s27 + $0x78] sm:$0xff] (%p5798_p5) }
 0x51d   : > { %4377 = vst [vmem:[%s8011_s18 + $0x70] sm:$0xff] (%p5798_p5), %v4376_v28  ;;  %4379 = vst [vmem:[%s8011_s18 + $0x78] sm:$0xff] (%p5798_p5), %v4378_v30 }
 0x51f   : > { %v3826_v54 = vpop.permute.xlu1 %3825  ;;  %v3760_v36 = vpop.permute.xlu0 %3759  ;;  %v4506_v30 = vld [vmem:[%s7701_s27 + $0x278] sm:$0xff] (%p5798_p5) }
 0x520   : > { %4065 = vst.msk [vmem:[%s7701_s27 + $0x188] sm:$0xff] %vm4015_vm0, %v3826_v54  ;;  %4032 = vst.msk [vmem:[%s7701_s27 + $0x80] sm:$0xff] %vm4015_vm0, %v3760_v36 }
 0x521   : > { %4507 = vst [vmem:[%s8011_s18 + $0x478] sm:$0xff] (%p5798_p5), %v4506_v30 }
 0x523   : > { %v3890_v0 = vpop.permute.xlu1 %3889  ;;  %v3824_v63 = vpop.permute.xlu0 %3823  ;;  %v4382_v54 = vld [vmem:[%s7701_s27 + $0x88] sm:$0xff] (%p5798_p5)  ;;  %v4504_v28 = vld [vmem:[%s7701_s27 + $0x270] sm:$0xff] (%p5798_p5) }
 0x524   : > { %4097 = vst.msk [vmem:[%s7701_s27 + $0x288] sm:$0xff] %vm4015_vm0, %v3890_v0  ;;  %4064 = vst.msk [vmem:[%s7701_s27 + $0x180] sm:$0xff] %vm4015_vm0, %v3824_v63 }
 0x525   : > { %4383 = vst [vmem:[%s8011_s18 + $0x88] sm:$0xff] (%p5798_p5), %v4382_v54  ;;  %4505 = vst [vmem:[%s8011_s18 + $0x470] sm:$0xff] (%p5798_p5), %v4504_v28 }
 0x527   : > { %v3766_v52 = vpop.permute.xlu1 %3765  ;;  %v3888_v4 = vpop.permute.xlu0 %3887  ;;  %v4380_v20 = vld [vmem:[%s7701_s27 + $0x80] sm:$0xff] (%p5798_p5) }
 0x528   : > { %4035 = vst.msk [vmem:[%s7701_s27 + $0x98] sm:$0xff] %vm4015_vm0, %v3766_v52  ;;  %4096 = vst.msk [vmem:[%s7701_s27 + $0x280] sm:$0xff] %vm4015_vm0, %v3888_v4 }
 0x529   : > { %4381 = vst [vmem:[%s8011_s18 + $0x80] sm:$0xff] (%p5798_p5), %v4380_v20 }
 0x52b   : > { %v3830_v47 = vpop.permute.xlu1 %3829  ;;  %v3764_v40 = vpop.permute.xlu0 %3763  ;;  %v4510_v54 = vld [vmem:[%s7701_s27 + $0x288] sm:$0xff] (%p5798_p5) }
 0x52c   : > { %4067 = vst.msk [vmem:[%s7701_s27 + $0x198] sm:$0xff] %vm4015_vm0, %v3830_v47  ;;  %4034 = vst.msk [vmem:[%s7701_s27 + $0x90] sm:$0xff] %vm4015_vm0, %v3764_v40 }
 0x52d   : > { %4511 = vst [vmem:[%s8011_s18 + $0x488] sm:$0xff] (%p5798_p5), %v4510_v54 }
 0x52f   : > { %v3894_v48 = vpop.permute.xlu1 %3893  ;;  %v3828_v62 = vpop.permute.xlu0 %3827  ;;  %v4386_v0 = vld [vmem:[%s7701_s27 + $0x98] sm:$0xff] (%p5798_p5)  ;;  %v4508_v20 = vld [vmem:[%s7701_s27 + $0x280] sm:$0xff] (%p5798_p5) }
 0x530   : > { %4099 = vst.msk [vmem:[%s7701_s27 + $0x298] sm:$0xff] %vm4015_vm0, %v3894_v48  ;;  %4066 = vst.msk [vmem:[%s7701_s27 + $0x190] sm:$0xff] %vm4015_vm0, %v3828_v62 }
 0x531   : > { %4387 = vst [vmem:[%s8011_s18 + $0x98] sm:$0xff] (%p5798_p5), %v4386_v0  ;;  %4509 = vst [vmem:[%s8011_s18 + $0x480] sm:$0xff] (%p5798_p5), %v4508_v20 }
 0x533   : > { %v3770_v23 = vpop.permute.xlu1 %3769  ;;  %v3892_v61 = vpop.permute.xlu0 %3891  ;;  %v4384_v36 = vld [vmem:[%s7701_s27 + $0x90] sm:$0xff] (%p5798_p5) }
 0x534   : > { %4037 = vst.msk [vmem:[%s7701_s27 + $0xa8] sm:$0xff] %vm4015_vm0, %v3770_v23  ;;  %4098 = vst.msk [vmem:[%s7701_s27 + $0x290] sm:$0xff] %vm4015_vm0, %v3892_v61 }
 0x535   : > { %4385 = vst [vmem:[%s8011_s18 + $0x90] sm:$0xff] (%p5798_p5), %v4384_v36 }
 0x537   : > { %v3834_v38 = vpop.permute.xlu1 %3833  ;;  %v3768_v53 = vpop.permute.xlu0 %3767  ;;  %v4514_v0 = vld [vmem:[%s7701_s27 + $0x298] sm:$0xff] (%p5798_p5) }
 0x538   : > { %4069 = vst.msk [vmem:[%s7701_s27 + $0x1a8] sm:$0xff] %vm4015_vm0, %v3834_v38  ;;  %4036 = vst.msk [vmem:[%s7701_s27 + $0xa0] sm:$0xff] %vm4015_vm0, %v3768_v53 }
 0x539   : > { %4515 = vst [vmem:[%s8011_s18 + $0x498] sm:$0xff] (%p5798_p5), %v4514_v0 }
 0x53b   : > { %v3898_v49 = vpop.permute.xlu1 %3897  ;;  %v3832_v15 = vpop.permute.xlu0 %3831  ;;  %v4390_v52 = vld [vmem:[%s7701_s27 + $0xa8] sm:$0xff] (%p5798_p5)  ;;  %v4512_v36 = vld [vmem:[%s7701_s27 + $0x290] sm:$0xff] (%p5798_p5) }
 0x53c   : > { %4101 = vst.msk [vmem:[%s7701_s27 + $0x2a8] sm:$0xff] %vm4015_vm0, %v3898_v49  ;;  %4068 = vst.msk [vmem:[%s7701_s27 + $0x1a0] sm:$0xff] %vm4015_vm0, %v3832_v15  ;;  %v4412_v15 = vld [vmem:[%s7701_s27 + $0x100] sm:$0xff] (%p5798_p5) }
 0x53d   : > { %4391 = vst [vmem:[%s8011_s18 + $0xa8] sm:$0xff] (%p5798_p5), %v4390_v52  ;;  %4413 = vst [vmem:[%s8011_s18 + $0x200] sm:$0xff] (%p5798_p5), %v4412_v15 }
 0x53e   : > { %4513 = vst [vmem:[%s8011_s18 + $0x490] sm:$0xff] (%p5798_p5), %v4512_v36 }
 0x53f   : > { %v3774_v6 = vpop.permute.xlu1 %3773  ;;  %v3896_v42 = vpop.permute.xlu0 %3895  ;;  %v4388_v63 = vld [vmem:[%s7701_s27 + $0xa0] sm:$0xff] (%p5798_p5) }
 0x540   : > { %4039 = vst.msk [vmem:[%s7701_s27 + $0xb8] sm:$0xff] %vm4015_vm0, %v3774_v6  ;;  %4100 = vst.msk [vmem:[%s7701_s27 + $0x2a0] sm:$0xff] %vm4015_vm0, %v3896_v42  ;;  %v4414_v6 = vld [vmem:[%s7701_s27 + $0x108] sm:$0xff] (%p5798_p5)  ;;  %v4416_v42 = vld [vmem:[%s7701_s27 + $0x110] sm:$0xff] (%p5798_p5) }
 0x541   : > { %4389 = vst [vmem:[%s8011_s18 + $0xa0] sm:$0xff] (%p5798_p5), %v4388_v63  ;;  %4415 = vst [vmem:[%s8011_s18 + $0x208] sm:$0xff] (%p5798_p5), %v4414_v6 }
 0x542   : > { %4417 = vst [vmem:[%s8011_s18 + $0x210] sm:$0xff] (%p5798_p5), %v4416_v42 }
 0x543   : > { %v3838_v14 = vpop.permute.xlu1 %3837  ;;  %v3772_v55 = vpop.permute.xlu0 %3771  ;;  %v4518_v52 = vld [vmem:[%s7701_s27 + $0x2a8] sm:$0xff] (%p5798_p5) }
 0x544   : > { %4071 = vst.msk [vmem:[%s7701_s27 + $0x1b8] sm:$0xff] %vm4015_vm0, %v3838_v14  ;;  %4038 = vst.msk [vmem:[%s7701_s27 + $0xb0] sm:$0xff] %vm4015_vm0, %v3772_v55  ;;  %v4418_v14 = vld [vmem:[%s7701_s27 + $0x118] sm:$0xff] (%p5798_p5)  ;;  %v4420_v55 = vld [vmem:[%s7701_s27 + $0x120] sm:$0xff] (%p5798_p5) }
 0x545   : > { %4419 = vst [vmem:[%s8011_s18 + $0x218] sm:$0xff] (%p5798_p5), %v4418_v14  ;;  %4421 = vst [vmem:[%s8011_s18 + $0x220] sm:$0xff] (%p5798_p5), %v4420_v55 }
 0x546   : > { %4519 = vst [vmem:[%s8011_s18 + $0x4a8] sm:$0xff] (%p5798_p5), %v4518_v52 }
 0x547   : > { %v3902_v45 = vpop.permute.xlu1 %3901  ;;  %v3836_v9 = vpop.permute.xlu0 %3835  ;;  %v4394_v47 = vld [vmem:[%s7701_s27 + $0xb8] sm:$0xff] (%p5798_p5)  ;;  %v4516_v63 = vld [vmem:[%s7701_s27 + $0x2a0] sm:$0xff] (%p5798_p5) }
 0x548   : > { %4103 = vst.msk [vmem:[%s7701_s27 + $0x2b8] sm:$0xff] %vm4015_vm0, %v3902_v45  ;;  %4070 = vst.msk [vmem:[%s7701_s27 + $0x1b0] sm:$0xff] %vm4015_vm0, %v3836_v9  ;;  %v4422_v45 = vld [vmem:[%s7701_s27 + $0x128] sm:$0xff] (%p5798_p5)  ;;  %v4424_v9 = vld [vmem:[%s7701_s27 + $0x130] sm:$0xff] (%p5798_p5) }
 0x549   : > { %4395 = vst [vmem:[%s8011_s18 + $0xb8] sm:$0xff] (%p5798_p5), %v4394_v47  ;;  %4423 = vst [vmem:[%s8011_s18 + $0x228] sm:$0xff] (%p5798_p5), %v4422_v45 }
 0x54a   : > { %4425 = vst [vmem:[%s8011_s18 + $0x230] sm:$0xff] (%p5798_p5), %v4424_v9  ;;  %4517 = vst [vmem:[%s8011_s18 + $0x4a0] sm:$0xff] (%p5798_p5), %v4516_v63 }
 0x54b   : > { %v3778_v51 = vpop.permute.xlu1 %3777  ;;  %v3900_v2 = vpop.permute.xlu0 %3899  ;;  %v4392_v4 = vld [vmem:[%s7701_s27 + $0xb0] sm:$0xff] (%p5798_p5) }
 0x54c   : > { %4041 = vst.msk [vmem:[%s7701_s27 + $0xc8] sm:$0xff] %vm4015_vm0, %v3778_v51  ;;  %4102 = vst.msk [vmem:[%s7701_s27 + $0x2b0] sm:$0xff] %vm4015_vm0, %v3900_v2  ;;  %v4426_v51 = vld [vmem:[%s7701_s27 + $0x138] sm:$0xff] (%p5798_p5)  ;;  %v4428_v2 = vld [vmem:[%s7701_s27 + $0x140] sm:$0xff] (%p5798_p5) }
 0x54d   : > { %4393 = vst [vmem:[%s8011_s18 + $0xb0] sm:$0xff] (%p5798_p5), %v4392_v4  ;;  %4427 = vst [vmem:[%s8011_s18 + $0x238] sm:$0xff] (%p5798_p5), %v4426_v51 }
 0x54e   : > { %4429 = vst [vmem:[%s8011_s18 + $0x240] sm:$0xff] (%p5798_p5), %v4428_v2 }
 0x54f   : > { %v3842_v12 = vpop.permute.xlu1 %3841  ;;  %v3776_v41 = vpop.permute.xlu0 %3775  ;;  %v4522_v47 = vld [vmem:[%s7701_s27 + $0x2b8] sm:$0xff] (%p5798_p5) }
 0x550   : > { %4073 = vst.msk [vmem:[%s7701_s27 + $0x1c8] sm:$0xff] %vm4015_vm0, %v3842_v12  ;;  %4040 = vst.msk [vmem:[%s7701_s27 + $0xc0] sm:$0xff] %vm4015_vm0, %v3776_v41  ;;  %v4430_v12 = vld [vmem:[%s7701_s27 + $0x148] sm:$0xff] (%p5798_p5)  ;;  %v4432_v41 = vld [vmem:[%s7701_s27 + $0x150] sm:$0xff] (%p5798_p5) }
 0x551   : > { %4431 = vst [vmem:[%s8011_s18 + $0x248] sm:$0xff] (%p5798_p5), %v4430_v12  ;;  %4433 = vst [vmem:[%s8011_s18 + $0x250] sm:$0xff] (%p5798_p5), %v4432_v41 }
 0x552   : > { %4523 = vst [vmem:[%s8011_s18 + $0x4b8] sm:$0xff] (%p5798_p5), %v4522_v47 }
 0x553   : > { %v3906_v31 = vpop.permute.xlu1 %3905  ;;  %v3840_v58 = vpop.permute.xlu0 %3839  ;;  %v4398_v48 = vld [vmem:[%s7701_s27 + $0xc8] sm:$0xff] (%p5798_p5)  ;;  %v4520_v4 = vld [vmem:[%s7701_s27 + $0x2b0] sm:$0xff] (%p5798_p5) }
 0x554   : > { %4105 = vst.msk [vmem:[%s7701_s27 + $0x2c8] sm:$0xff] %vm4015_vm0, %v3906_v31  ;;  %4072 = vst.msk [vmem:[%s7701_s27 + $0x1c0] sm:$0xff] %vm4015_vm0, %v3840_v58  ;;  %v4434_v31 = vld [vmem:[%s7701_s27 + $0x158] sm:$0xff] (%p5798_p5)  ;;  %v4436_v58 = vld [vmem:[%s7701_s27 + $0x160] sm:$0xff] (%p5798_p5) }
 0x555   : > { %4399 = vst [vmem:[%s8011_s18 + $0xc8] sm:$0xff] (%p5798_p5), %v4398_v48  ;;  %4435 = vst [vmem:[%s8011_s18 + $0x258] sm:$0xff] (%p5798_p5), %v4434_v31 }
 0x556   : > { %4437 = vst [vmem:[%s8011_s18 + $0x260] sm:$0xff] (%p5798_p5), %v4436_v58  ;;  %4521 = vst [vmem:[%s8011_s18 + $0x4b0] sm:$0xff] (%p5798_p5), %v4520_v4 }
 0x557   : > { %v3782_v60 = vpop.permute.xlu1 %3781  ;;  %v3904_v56 = vpop.permute.xlu0 %3903  ;;  %v4396_v40 = vld [vmem:[%s7701_s27 + $0xc0] sm:$0xff] (%p5798_p5) }
 0x558   : > { %4043 = vst.msk [vmem:[%s7701_s27 + $0xd8] sm:$0xff] %vm4015_vm0, %v3782_v60  ;;  %4104 = vst.msk [vmem:[%s7701_s27 + $0x2c0] sm:$0xff] %vm4015_vm0, %v3904_v56  ;;  %v4438_v60 = vld [vmem:[%s7701_s27 + $0x168] sm:$0xff] (%p5798_p5)  ;;  %v4440_v56 = vld [vmem:[%s7701_s27 + $0x170] sm:$0xff] (%p5798_p5) }
 0x559   : > { %4397 = vst [vmem:[%s8011_s18 + $0xc0] sm:$0xff] (%p5798_p5), %v4396_v40  ;;  %4439 = vst [vmem:[%s8011_s18 + $0x268] sm:$0xff] (%p5798_p5), %v4438_v60 }
 0x55a   : > { %4441 = vst [vmem:[%s8011_s18 + $0x270] sm:$0xff] (%p5798_p5), %v4440_v56 }
 0x55b   : > { %v3846_v5 = vpop.permute.xlu1 %3845  ;;  %v3780_v7 = vpop.permute.xlu0 %3779  ;;  %v4526_v48 = vld [vmem:[%s7701_s27 + $0x2c8] sm:$0xff] (%p5798_p5) }
 0x55c   : > { %4075 = vst.msk [vmem:[%s7701_s27 + $0x1d8] sm:$0xff] %vm4015_vm0, %v3846_v5  ;;  %4042 = vst.msk [vmem:[%s7701_s27 + $0xd0] sm:$0xff] %vm4015_vm0, %v3780_v7  ;;  %v4442_v5 = vld [vmem:[%s7701_s27 + $0x178] sm:$0xff] (%p5798_p5)  ;;  %v4444_v7 = vld [vmem:[%s7701_s27 + $0x180] sm:$0xff] (%p5798_p5) }
 0x55d   : > { %4443 = vst [vmem:[%s8011_s18 + $0x278] sm:$0xff] (%p5798_p5), %v4442_v5  ;;  %4445 = vst [vmem:[%s8011_s18 + $0x280] sm:$0xff] (%p5798_p5), %v4444_v7 }
 0x55e   : > { %4527 = vst [vmem:[%s8011_s18 + $0x4c8] sm:$0xff] (%p5798_p5), %v4526_v48 }
 0x55f   : > { %v3910_v43 = vpop.permute.xlu1 %3909  ;;  %v3844_v46 = vpop.permute.xlu0 %3843  ;;  %v4402_v23 = vld [vmem:[%s7701_s27 + $0xd8] sm:$0xff] (%p5798_p5)  ;;  %v4524_v40 = vld [vmem:[%s7701_s27 + $0x2c0] sm:$0xff] (%p5798_p5) }
 0x560   : > { %4107 = vst.msk [vmem:[%s7701_s27 + $0x2d8] sm:$0xff] %vm4015_vm0, %v3910_v43  ;;  %4074 = vst.msk [vmem:[%s7701_s27 + $0x1d0] sm:$0xff] %vm4015_vm0, %v3844_v46  ;;  %v4446_v43 = vld [vmem:[%s7701_s27 + $0x188] sm:$0xff] (%p5798_p5)  ;;  %v4448_v46 = vld [vmem:[%s7701_s27 + $0x190] sm:$0xff] (%p5798_p5) }
 0x561   : > { %4403 = vst [vmem:[%s8011_s18 + $0xd8] sm:$0xff] (%p5798_p5), %v4402_v23  ;;  %4447 = vst [vmem:[%s8011_s18 + $0x288] sm:$0xff] (%p5798_p5), %v4446_v43 }
 0x562   : > { %4449 = vst [vmem:[%s8011_s18 + $0x290] sm:$0xff] (%p5798_p5), %v4448_v46  ;;  %4525 = vst [vmem:[%s8011_s18 + $0x4c0] sm:$0xff] (%p5798_p5), %v4524_v40 }
 0x563   : > { %v3786_v8 = vpop.permute.xlu1 %3785  ;;  %v3908_v22 = vpop.permute.xlu0 %3907  ;;  %v4400_v62 = vld [vmem:[%s7701_s27 + $0xd0] sm:$0xff] (%p5798_p5) }
 0x564   : > { %4045 = vst.msk [vmem:[%s7701_s27 + $0xe8] sm:$0xff] %vm4015_vm0, %v3786_v8  ;;  %4106 = vst.msk [vmem:[%s7701_s27 + $0x2d0] sm:$0xff] %vm4015_vm0, %v3908_v22  ;;  %v4450_v8 = vld [vmem:[%s7701_s27 + $0x198] sm:$0xff] (%p5798_p5)  ;;  %v4452_v22 = vld [vmem:[%s7701_s27 + $0x1a0] sm:$0xff] (%p5798_p5) }
 0x565   : > { %4401 = vst [vmem:[%s8011_s18 + $0xd0] sm:$0xff] (%p5798_p5), %v4400_v62  ;;  %4451 = vst [vmem:[%s8011_s18 + $0x298] sm:$0xff] (%p5798_p5), %v4450_v8 }
 0x566   : > { %4453 = vst [vmem:[%s8011_s18 + $0x2a0] sm:$0xff] (%p5798_p5), %v4452_v22 }
 0x567   : > { %v3850_v19 = vpop.permute.xlu1 %3849  ;;  %v3784_v11 = vpop.permute.xlu0 %3783  ;;  %v4530_v23 = vld [vmem:[%s7701_s27 + $0x2d8] sm:$0xff] (%p5798_p5) }
 0x568   : > { %4077 = vst.msk [vmem:[%s7701_s27 + $0x1e8] sm:$0xff] %vm4015_vm0, %v3850_v19  ;;  %4044 = vst.msk [vmem:[%s7701_s27 + $0xe0] sm:$0xff] %vm4015_vm0, %v3784_v11  ;;  %v4454_v19 = vld [vmem:[%s7701_s27 + $0x1a8] sm:$0xff] (%p5798_p5)  ;;  %v4456_v11 = vld [vmem:[%s7701_s27 + $0x1b0] sm:$0xff] (%p5798_p5) }
 0x569   : > { %4455 = vst [vmem:[%s8011_s18 + $0x2a8] sm:$0xff] (%p5798_p5), %v4454_v19  ;;  %4457 = vst [vmem:[%s8011_s18 + $0x2b0] sm:$0xff] (%p5798_p5), %v4456_v11 }
 0x56a   : > { %4531 = vst [vmem:[%s8011_s18 + $0x4d8] sm:$0xff] (%p5798_p5), %v4530_v23 }
 0x56b   : > { %v3914_v34 = vpop.permute.xlu1 %3913  ;;  %v3848_v13 = vpop.permute.xlu0 %3847  ;;  %v4406_v38 = vld [vmem:[%s7701_s27 + $0xe8] sm:$0xff] (%p5798_p5)  ;;  %v4528_v62 = vld [vmem:[%s7701_s27 + $0x2d0] sm:$0xff] (%p5798_p5) }
 0x56c   : > { %4109 = vst.msk [vmem:[%s7701_s27 + $0x2e8] sm:$0xff] %vm4015_vm0, %v3914_v34  ;;  %4076 = vst.msk [vmem:[%s7701_s27 + $0x1e0] sm:$0xff] %vm4015_vm0, %v3848_v13  ;;  %v4458_v34 = vld [vmem:[%s7701_s27 + $0x1b8] sm:$0xff] (%p5798_p5)  ;;  %v4460_v13 = vld [vmem:[%s7701_s27 + $0x1c0] sm:$0xff] (%p5798_p5) }
 0x56d   : > { %4407 = vst [vmem:[%s8011_s18 + $0xe8] sm:$0xff] (%p5798_p5), %v4406_v38  ;;  %4459 = vst [vmem:[%s8011_s18 + $0x2b8] sm:$0xff] (%p5798_p5), %v4458_v34 }
 0x56e   : > { %4461 = vst [vmem:[%s8011_s18 + $0x2c0] sm:$0xff] (%p5798_p5), %v4460_v13  ;;  %4529 = vst [vmem:[%s8011_s18 + $0x4d0] sm:$0xff] (%p5798_p5), %v4528_v62 }
 0x56f   : > { %v3790_v33 = vpop.permute.xlu1 %3789  ;;  %v3912_v25 = vpop.permute.xlu0 %3911  ;;  %v4404_v61 = vld [vmem:[%s7701_s27 + $0xe0] sm:$0xff] (%p5798_p5) }
 0x570   : > { %4047 = vst.msk [vmem:[%s7701_s27 + $0xf8] sm:$0xff] %vm4015_vm0, %v3790_v33  ;;  %4108 = vst.msk [vmem:[%s7701_s27 + $0x2e0] sm:$0xff] %vm4015_vm0, %v3912_v25  ;;  %v4462_v33 = vld [vmem:[%s7701_s27 + $0x1c8] sm:$0xff] (%p5798_p5)  ;;  %v4464_v25 = vld [vmem:[%s7701_s27 + $0x1d0] sm:$0xff] (%p5798_p5) }
 0x571   : > { %4405 = vst [vmem:[%s8011_s18 + $0xe0] sm:$0xff] (%p5798_p5), %v4404_v61  ;;  %4463 = vst [vmem:[%s8011_s18 + $0x2c8] sm:$0xff] (%p5798_p5), %v4462_v33 }
 0x572   : > { %4465 = vst [vmem:[%s8011_s18 + $0x2d0] sm:$0xff] (%p5798_p5), %v4464_v25 }
 0x573   : > { %v3854_v27 = vpop.permute.xlu1 %3853  ;;  %v3788_v57 = vpop.permute.xlu0 %3787  ;;  %v4534_v38 = vld [vmem:[%s7701_s27 + $0x2e8] sm:$0xff] (%p5798_p5) }
 0x574   : > { %4079 = vst.msk [vmem:[%s7701_s27 + $0x1f8] sm:$0xff] %vm4015_vm0, %v3854_v27  ;;  %4046 = vst.msk [vmem:[%s7701_s27 + $0xf0] sm:$0xff] %vm4015_vm0, %v3788_v57  ;;  %v4466_v27 = vld [vmem:[%s7701_s27 + $0x1d8] sm:$0xff] (%p5798_p5)  ;;  %v4468_v57 = vld [vmem:[%s7701_s27 + $0x1e0] sm:$0xff] (%p5798_p5) }
 0x575   : > { %4467 = vst [vmem:[%s8011_s18 + $0x2d8] sm:$0xff] (%p5798_p5), %v4466_v27  ;;  %4469 = vst [vmem:[%s8011_s18 + $0x2e0] sm:$0xff] (%p5798_p5), %v4468_v57 }
 0x576   : > { %4127 = sbr.rel (!%p5798_p5) target bundleno = 1413 (0x585), region = 98  ;;  %4535 = vst [vmem:[%s8011_s18 + $0x4e8] sm:$0xff] (%p5798_p5), %v4534_v38 }
 0x577   : > { %v3918_v35 = vpop.permute.xlu1 %3917  ;;  %v3852_v3 = vpop.permute.xlu0 %3851  ;;  %v4410_v49 = vld [vmem:[%s7701_s27 + $0xf8] sm:$0xff] (%p5798_p5)  ;;  %v4532_v61 = vld [vmem:[%s7701_s27 + $0x2e0] sm:$0xff] (%p5798_p5) }
 0x578   : > { %4111 = vst.msk [vmem:[%s7701_s27 + $0x2f8] sm:$0xff] %vm4015_vm0, %v3918_v35  ;;  %4078 = vst.msk [vmem:[%s7701_s27 + $0x1f0] sm:$0xff] %vm4015_vm0, %v3852_v3  ;;  %v4470_v35 = vld [vmem:[%s7701_s27 + $0x1e8] sm:$0xff] (%p5798_p5) }
 0x579   : > { %4411 = vst [vmem:[%s8011_s18 + $0xf8] sm:$0xff] (%p5798_p5), %v4410_v49  ;;  %4471 = vst [vmem:[%s8011_s18 + $0x2e8] sm:$0xff] (%p5798_p5), %v4470_v35 }
 0x57a   : > { %4533 = vst [vmem:[%s8011_s18 + $0x4e0] sm:$0xff] (%p5798_p5), %v4532_v61 }
 0x57b   : > { %v3916_v59 = vpop.permute.xlu0 %3915  ;;  %v4408_v53 = vld [vmem:[%s7701_s27 + $0xf0] sm:$0xff] (%p5798_p5) }
 0x57c   : > { %4110 = vst.msk [vmem:[%s7701_s27 + $0x2f0] sm:$0xff] %vm4015_vm0, %v3916_v59  ;;  %4409 = vst [vmem:[%s8011_s18 + $0xf0] sm:$0xff] (%p5798_p5), %v4408_v53  ;;  %v4474_v59 = vld [vmem:[%s7701_s27 + $0x1f8] sm:$0xff] (%p5798_p5) }
 0x57d   : > { %4475 = vst [vmem:[%s8011_s18 + $0x2f8] sm:$0xff] %v4474_v59 }
 0x57f   : > { %v4472_v3 = vld [vmem:[%s7701_s27 + $0x1f0] sm:$0xff]  ;;  %v4538_v49 = vld [vmem:[%s7701_s27 + $0x2f8] sm:$0xff] }
 0x580   : > { %4473 = vst [vmem:[%s8011_s18 + $0x2f0] sm:$0xff] %v4472_v3  ;;  %4539 = vst [vmem:[%s8011_s18 + $0x4f8] sm:$0xff] %v4538_v49 }
 0x583   : > { %v4536_v53 = vld [vmem:[%s7701_s27 + $0x2f0] sm:$0xff] }
 0x584   : > { %4537 = vst [vmem:[%s8011_s18 + $0x4f0] sm:$0xff] %v4536_v53 }
 0x585 PF: > { %p17_p11 = scmp.ge.s32.totalorder %s5786_s13, 4   ;;  %s8422_s30 = smov %s5709_s10 }
 0x586   : > { %s8423_s10 = smov %s5796_s16  ;;  %s8424_s11 = smov %s5786_s13 }
 0x587   :  { %19 = sbr.rel (!%p17_p11) target bundleno = 2 (0x2), region = 178 }

</bundles_post_ra>
